<compile_context>
chip_gen: v5e
topology: v5e:2x2
jax: 0.10.0
libtpu: 0.0.40
codegen_flags: <defaults>
</compile_context>

<pallas_src>
import numpy as np
import jax
import jax.numpy as jnp
from jax import lax
from jax.experimental import pallas as pl
from jax.experimental.pallas import tpu as pltpu


# ------------------------- static network geometry -------------------------

IN_H = IN_W = 28                               # input spatial size
KS = 5                                         # conv kernel size
C1_OUT, C1_IMG = 6, IN_H - KS + 1              # conv1: 6 x 24 x 24
P1_IMG = C1_IMG // 2                           # pool1: 6 x 12 x 12
C2_OUT, C2_IMG = 16, P1_IMG - KS + 1           # conv2: 16 x 8 x 8
P2_IMG = C2_IMG // 2                           # pool2: 16 x 4 x 4

# merged-lane widths
X_W = IN_H * IN_W                                      # 784
PATCH1_W = X_W - (IN_W * (KS - 1) + (KS - 1))          # 668
POOL1_W = 2 * (IN_W + 1) * (P1_IMG - 1) + 1            # 639
P1_W = P1_IMG * P1_IMG                                 # 144
PATCH2_W = P1_W - (P1_IMG * (KS - 1) + (KS - 1))       # 92
POOL2_W = 2 * (P1_IMG + 1) * (P2_IMG - 1) + 1          # 79
P2_W = P2_IMG * P2_IMG                                 # 16


def _pool_select_matrix(conv_w, pooled_img):
    """0/1 matrix mapping the max-of-4 row to the dense pooled row.

    Column (pooled_img*ph + pw) picks lane 2*conv_w*ph + 2*pw (the top-left
    corner of the 2x2 window in the conv-wide, row-stride `conv_w` layout).
    """
    rows = 2 * (conv_w + 1) * (pooled_img - 1) + 1
    g = np.zeros((rows, pooled_img * pooled_img), np.float32)
    for ph in range(pooled_img):
        for pw in range(pooled_img):
            g[2 * conv_w * ph + 2 * pw, pooled_img * ph + pw] = 1.0
    return g


_G1 = _pool_select_matrix(IN_W, P1_IMG)      # (639, 144)
_G2 = _pool_select_matrix(P1_IMG, P2_IMG)    # (79, 16)


# ------------------------------- the kernel --------------------------------

def _lenet5_kernel(x_ref, w1_ref, b1_ref, g1_ref, w2_ref, b2_ref, g2_ref,
                   w3_ref, b3_ref, w4_ref, b4_ref, w5_ref, b5_ref,
                   out_ref, patch1_scr, patch2_scr):
    batch = x_ref.shape[0]
    f32 = jnp.float32

    for b in range(batch):                      # tiny batch -> unrolled
        xrow = x_ref[b:b + 1, :]                # (1, 784), row-major lanes

        # ---- conv1 + bias + ReLU : (6,25) @ (25,668) on the MXU ----------
        # in-kernel im2col: patch row k=(i,j) is the image shifted by
        # 28*i + j (static lane-offset slice, written to VMEM scratch).
        for k in range(KS * KS):
            i, j = divmod(k, KS)
            d = IN_W * i + j
            patch1_scr[k:k + 1, :] = xrow[:, d:d + PATCH1_W]
        c1 = jnp.dot(w1_ref[...], patch1_scr[...],
                     preferred_element_type=f32)               # (6, 668)
        c1 = jnp.maximum(c1 + b1_ref[...], 0.0)
        # valid conv1 outputs live at lanes 28*oh + ow (oh, ow < 24)

        # ---- pool1 (2x2 max), fused: shifted max + selection matmul ------
        m1 = jnp.maximum(
            jnp.maximum(c1[:, 0:POOL1_W], c1[:, 1:POOL1_W + 1]),
            jnp.maximum(c1[:, IN_W:IN_W + POOL1_W],
                        c1[:, IN_W + 1:IN_W + 1 + POOL1_W]))
        p1 = jnp.dot(m1, g1_ref[...], preferred_element_type=f32)  # (6, 144)
        # p1 lanes are 12*ph + pw (dense 12x12 pooled map)

        # ---- conv2 + bias + ReLU : (16,150) @ (150,92) on the MXU --------
        for k in range(KS * KS):
            i, j = divmod(k, KS)
            d = P1_IMG * i + j
            patch2_scr[C1_OUT * k:C1_OUT * (k + 1), :] = p1[:, d:d + PATCH2_W]
        c2 = jnp.dot(w2_ref[...], patch2_scr[...],
                     preferred_element_type=f32)               # (16, 92)
        c2 = jnp.maximum(c2 + b2_ref[...], 0.0)
        # valid conv2 outputs live at lanes 12*oh + ow (oh, ow < 8)

        # ---- pool2 --------------------------------------------------------
        m2 = jnp.maximum(
            jnp.maximum(c2[:, 0:POOL2_W], c2[:, 1:POOL2_W + 1]),
            jnp.maximum(c2[:, P1_IMG:P1_IMG + POOL2_W],
                        c2[:, P1_IMG + 1:P1_IMG + 1 + POOL2_W]))
        p2 = jnp.dot(m2, g2_ref[...], preferred_element_type=f32)  # (16, 16)
        # p2[c, 4*ph+pw] == PyTorch feature c*16 + 4*ph + pw of .view(B, 256)

        # ---- fc1 (+ flatten) + ReLU ---------------------------------------
        y = b3_ref[...]                                          # (1, 120)
        for c in range(C2_OUT):
            y = y + jnp.dot(p2[c:c + 1, :], w3_ref[c],
                            preferred_element_type=f32)
        y = jnp.maximum(y, 0.0)

        # ---- fc2 + ReLU, fc3 ----------------------------------------------
        y = jnp.maximum(
            jnp.dot(y, w4_ref[...], preferred_element_type=f32) + b4_ref[...],
            0.0)
        y = jnp.dot(y, w5_ref[...], preferred_element_type=f32) + b5_ref[...]
        out_ref[b:b + 1, :] = y                                  # (1, 10)


# ------------------------------ Pallas wrapper ------------------------------

def prepare_params(params):
    """One-time repack of PyTorch-layout LeNet5 params into kernel layout."""
    w1, b1, w2, b2, w3, b3, w4, b4, w5, b5 = params
    return dict(
        w1m=w1.reshape(C1_OUT, KS * KS),                       # (6, 25), k=5i+j
        b1c=b1.reshape(C1_OUT, 1),
        # conv2 patch rows are ordered (k, ci) -> matching weight columns
        w2m=jnp.transpose(w2, (0, 2, 3, 1)).reshape(C2_OUT, KS * KS * C1_OUT),
        b2c=b2.reshape(C2_OUT, 1),
        # fc1 weight per conv2 channel: w3r[c, s, n] = w3[n, c*16 + s]
        w3r=jnp.transpose(w3.reshape(120, C2_OUT, P2_W), (1, 2, 0)),
        b3r=b3.reshape(1, 120),
        w4t=w4.T, b4r=b4.reshape(1, 84),
        w5t=w5.T, b5r=b5.reshape(1, 10),
    )


def lenet5_forward(x, kp):
    """x: (B, 1, 28, 28) f32, kp = prepare_params(params) -> (B, 10) f32."""
    batch = x.shape[0]
    assert x.shape[1:] == (1, IN_H, IN_W)
    x2d = x.reshape(batch, X_W)              # free, row-major boundary reshape

    vmem = pl.BlockSpec(memory_space=pltpu.MemorySpace.VMEM)
    operands = (x2d, kp["w1m"], kp["b1c"], jnp.asarray(_G1),
                kp["w2m"], kp["b2c"], jnp.asarray(_G2),
                kp["w3r"], kp["b3r"], kp["w4t"], kp["b4r"],
                kp["w5t"], kp["b5r"])
    return pl.pallas_call(
        _lenet5_kernel,
        out_shape=jax.ShapeDtypeStruct((batch, 10), jnp.float32),
        in_specs=[vmem] * len(operands),
        out_specs=vmem,
        scratch_shapes=[
            pltpu.VMEM((KS * KS, PATCH1_W), jnp.float32),           # conv1 im2col
            pltpu.VMEM((KS * KS * C1_OUT, PATCH2_W), jnp.float32),  # conv2 im2col
        ],
    )(*operands)


# ------------------------------ reference (JAX) ----------------------------

def lenet5_reference(x, params):
    (w1, b1, w2, b2, w3, b3, w4, b4, w5, b5) = params

    def conv(x, w, b):
        y = lax.conv_general_dilated(
            x, w, window_strides=(1, 1), padding='VALID',
            dimension_numbers=('NCHW', 'OIHW', 'NCHW'))
        return jnp.maximum(y + b[None, :, None, None], 0.0)

    def pool(x):
        return lax.reduce_window(x, -jnp.inf, lax.max,
                                 (1, 1, 2, 2), (1, 1, 2, 2), 'VALID')

    y = pool(conv(x, w1, b1))
    y = pool(conv(y, w2, b2))
    y = y.reshape(y.shape[0], -1)
    y = jnp.maximum(y @ w3.T + b3, 0.0)
    y = jnp.maximum(y @ w4.T + b4, 0.0)
    return y @ w5.T + b5


# ------------------------------ parameter init -----------------------------

def init_params(key):
    """Deterministic LeNet5 params (PyTorch-style uniform(+-1/sqrt(fan_in)))."""
    shapes = [
        ((6, 1, 5, 5), (6,)),       # conv1
        ((16, 6, 5, 5), (16,)),     # conv2
        ((120, 256), (120,)),       # fc1
        ((84, 120), (84,)),         # fc2
        ((10, 84), (10,)),          # fc3
    ]
    params = []
    for wshape, bshape in shapes:
        key, kw, kb = jax.random.split(key, 3)
        fan_in = int(np.prod(wshape[1:]))
        bound = 1.0 / (fan_in ** 0.5)
        params.append(jax.random.uniform(kw, wshape, jnp.float32, -bound, bound))
        params.append(jax.random.uniform(kb, bshape, jnp.float32, -bound, bound))
    return tuple(params)


# ----------------------------------- main ----------------------------------

if __name__ == "__main__":
    key = jax.random.PRNGKey(0)
    key, kx = jax.random.split(key)

    # fc1 expects 256 features => input must be (B, 1, 28, 28).
    x = jax.random.normal(kx, (2, 1, IN_H, IN_W), dtype=jnp.float32)
    params = init_params(key)

    kparams = prepare_params(params)           # one-time weight repack
    fwd = jax.jit(lenet5_forward)
    out = jax.block_until_ready(fwd(x, kparams))
    assert out.shape == (2, 10) and out.dtype == jnp.float32

    ref = jax.block_until_ready(lenet5_reference(x, params))
    assert jnp.allclose(out, ref, rtol=1e-2, atol=1e-2), (
        f"max abs diff {jnp.max(jnp.abs(out - ref))}")

    print("KERNEL_OK")
</pallas_src>

<mosaic_0001>
module attributes {stable_mosaic.version = 11 : i64} {
  func.func @_lenet5_kernel(%arg0: memref<2x784xf32, #tpu.memory_space<vmem>>, %arg1: memref<6x25xf32, #tpu.memory_space<vmem>>, %arg2: memref<6x1xf32, #tpu.memory_space<vmem>>, %arg3: memref<639x144xf32, #tpu.memory_space<vmem>>, %arg4: memref<16x150xf32, #tpu.memory_space<vmem>>, %arg5: memref<16x1xf32, #tpu.memory_space<vmem>>, %arg6: memref<79x16xf32, #tpu.memory_space<vmem>>, %arg7: memref<16x16x120xf32, #tpu.memory_space<vmem>>, %arg8: memref<1x120xf32, #tpu.memory_space<vmem>>, %arg9: memref<120x84xf32, #tpu.memory_space<vmem>>, %arg10: memref<1x84xf32, #tpu.memory_space<vmem>>, %arg11: memref<84x10xf32, #tpu.memory_space<vmem>>, %arg12: memref<1x10xf32, #tpu.memory_space<vmem>>, %arg13: memref<2x10xf32, #tpu.memory_space<vmem>>, %arg14: memref<25x668xf32, #tpu.memory_space<vmem>>, %arg15: memref<150x92xf32, #tpu.memory_space<vmem>>) attributes {dimension_semantics = [], scalar_prefetch = 0 : i64, scratch_operands = 2 : i64, tpu.core_type = #tpu.core_type<tc>} {
    %c0 = arith.constant 0 : index
    %c0_0 = arith.constant 0 : index
    %0 = vector.load %arg0[%c0, %c0_0] : memref<2x784xf32, #tpu.memory_space<vmem>>, vector<1x784xf32>
    %1 = vector.extract_strided_slice %0 {offsets = [0, 0], sizes = [1, 668], strides = [1, 1]} : vector<1x784xf32> to vector<1x668xf32>
    %c0_1 = arith.constant 0 : index
    %c0_2 = arith.constant 0 : index
    %2 = vector.load %arg14[%c0_1, %c0_2] : memref<25x668xf32, #tpu.memory_space<vmem>>, vector<1x668xf32>
    tpu.vector_store %arg14[%c0_1, %c0_2], %1 {strides = array<i32>} : memref<25x668xf32, #tpu.memory_space<vmem>>, vector<1x668xf32>,
    %3 = vector.extract_strided_slice %0 {offsets = [0, 1], sizes = [1, 668], strides = [1, 1]} : vector<1x784xf32> to vector<1x668xf32>
    %c1 = arith.constant 1 : index
    %c0_3 = arith.constant 0 : index
    %4 = vector.load %arg14[%c1, %c0_3] : memref<25x668xf32, #tpu.memory_space<vmem>>, vector<1x668xf32>
    tpu.vector_store %arg14[%c1, %c0_3], %3 {strides = array<i32>} : memref<25x668xf32, #tpu.memory_space<vmem>>, vector<1x668xf32>,
    %5 = vector.extract_strided_slice %0 {offsets = [0, 2], sizes = [1, 668], strides = [1, 1]} : vector<1x784xf32> to vector<1x668xf32>
    %c2 = arith.constant 2 : index
    %c0_4 = arith.constant 0 : index
    %6 = vector.load %arg14[%c2, %c0_4] : memref<25x668xf32, #tpu.memory_space<vmem>>, vector<1x668xf32>
    tpu.vector_store %arg14[%c2, %c0_4], %5 {strides = array<i32>} : memref<25x668xf32, #tpu.memory_space<vmem>>, vector<1x668xf32>,
    %7 = vector.extract_strided_slice %0 {offsets = [0, 3], sizes = [1, 668], strides = [1, 1]} : vector<1x784xf32> to vector<1x668xf32>
    %c3 = arith.constant 3 : index
    %c0_5 = arith.constant 0 : index
    %8 = vector.load %arg14[%c3, %c0_5] : memref<25x668xf32, #tpu.memory_space<vmem>>, vector<1x668xf32>
    tpu.vector_store %arg14[%c3, %c0_5], %7 {strides = array<i32>} : memref<25x668xf32, #tpu.memory_space<vmem>>, vector<1x668xf32>,
    %9 = vector.extract_strided_slice %0 {offsets = [0, 4], sizes = [1, 668], strides = [1, 1]} : vector<1x784xf32> to vector<1x668xf32>
    %c4 = arith.constant 4 : index
    %c0_6 = arith.constant 0 : index
    %10 = vector.load %arg14[%c4, %c0_6] : memref<25x668xf32, #tpu.memory_space<vmem>>, vector<1x668xf32>
    tpu.vector_store %arg14[%c4, %c0_6], %9 {strides = array<i32>} : memref<25x668xf32, #tpu.memory_space<vmem>>, vector<1x668xf32>,
    %11 = vector.extract_strided_slice %0 {offsets = [0, 28], sizes = [1, 668], strides = [1, 1]} : vector<1x784xf32> to vector<1x668xf32>
    %c5 = arith.constant 5 : index
    %c0_7 = arith.constant 0 : index
    %12 = vector.load %arg14[%c5, %c0_7] : memref<25x668xf32, #tpu.memory_space<vmem>>, vector<1x668xf32>
    tpu.vector_store %arg14[%c5, %c0_7], %11 {strides = array<i32>} : memref<25x668xf32, #tpu.memory_space<vmem>>, vector<1x668xf32>,
    %13 = vector.extract_strided_slice %0 {offsets = [0, 29], sizes = [1, 668], strides = [1, 1]} : vector<1x784xf32> to vector<1x668xf32>
    %c6 = arith.constant 6 : index
    %c0_8 = arith.constant 0 : index
    %14 = vector.load %arg14[%c6, %c0_8] : memref<25x668xf32, #tpu.memory_space<vmem>>, vector<1x668xf32>
    tpu.vector_store %arg14[%c6, %c0_8], %13 {strides = array<i32>} : memref<25x668xf32, #tpu.memory_space<vmem>>, vector<1x668xf32>,
    %15 = vector.extract_strided_slice %0 {offsets = [0, 30], sizes = [1, 668], strides = [1, 1]} : vector<1x784xf32> to vector<1x668xf32>
    %c7 = arith.constant 7 : index
    %c0_9 = arith.constant 0 : index
    %16 = vector.load %arg14[%c7, %c0_9] : memref<25x668xf32, #tpu.memory_space<vmem>>, vector<1x668xf32>
    tpu.vector_store %arg14[%c7, %c0_9], %15 {strides = array<i32>} : memref<25x668xf32, #tpu.memory_space<vmem>>, vector<1x668xf32>,
    %17 = vector.extract_strided_slice %0 {offsets = [0, 31], sizes = [1, 668], strides = [1, 1]} : vector<1x784xf32> to vector<1x668xf32>
    %c8 = arith.constant 8 : index
    %c0_10 = arith.constant 0 : index
    %18 = vector.load %arg14[%c8, %c0_10] : memref<25x668xf32, #tpu.memory_space<vmem>>, vector<1x668xf32>
    tpu.vector_store %arg14[%c8, %c0_10], %17 {strides = array<i32>} : memref<25x668xf32, #tpu.memory_space<vmem>>, vector<1x668xf32>,
    %19 = vector.extract_strided_slice %0 {offsets = [0, 32], sizes = [1, 668], strides = [1, 1]} : vector<1x784xf32> to vector<1x668xf32>
    %c9 = arith.constant 9 : index
    %c0_11 = arith.constant 0 : index
    %20 = vector.load %arg14[%c9, %c0_11] : memref<25x668xf32, #tpu.memory_space<vmem>>, vector<1x668xf32>
    tpu.vector_store %arg14[%c9, %c0_11], %19 {strides = array<i32>} : memref<25x668xf32, #tpu.memory_space<vmem>>, vector<1x668xf32>,
    %21 = vector.extract_strided_slice %0 {offsets = [0, 56], sizes = [1, 668], strides = [1, 1]} : vector<1x784xf32> to vector<1x668xf32>
    %c10 = arith.constant 10 : index
    %c0_12 = arith.constant 0 : index
    %22 = vector.load %arg14[%c10, %c0_12] : memref<25x668xf32, #tpu.memory_space<vmem>>, vector<1x668xf32>
    tpu.vector_store %arg14[%c10, %c0_12], %21 {strides = array<i32>} : memref<25x668xf32, #tpu.memory_space<vmem>>, vector<1x668xf32>,
    %23 = vector.extract_strided_slice %0 {offsets = [0, 57], sizes = [1, 668], strides = [1, 1]} : vector<1x784xf32> to vector<1x668xf32>
    %c11 = arith.constant 11 : index
    %c0_13 = arith.constant 0 : index
    %24 = vector.load %arg14[%c11, %c0_13] : memref<25x668xf32, #tpu.memory_space<vmem>>, vector<1x668xf32>
    tpu.vector_store %arg14[%c11, %c0_13], %23 {strides = array<i32>} : memref<25x668xf32, #tpu.memory_space<vmem>>, vector<1x668xf32>,
    %25 = vector.extract_strided_slice %0 {offsets = [0, 58], sizes = [1, 668], strides = [1, 1]} : vector<1x784xf32> to vector<1x668xf32>
    %c12 = arith.constant 12 : index
    %c0_14 = arith.constant 0 : index
    %26 = vector.load %arg14[%c12, %c0_14] : memref<25x668xf32, #tpu.memory_space<vmem>>, vector<1x668xf32>
    tpu.vector_store %arg14[%c12, %c0_14], %25 {strides = array<i32>} : memref<25x668xf32, #tpu.memory_space<vmem>>, vector<1x668xf32>,
    %27 = vector.extract_strided_slice %0 {offsets = [0, 59], sizes = [1, 668], strides = [1, 1]} : vector<1x784xf32> to vector<1x668xf32>
    %c13 = arith.constant 13 : index
    %c0_15 = arith.constant 0 : index
    %28 = vector.load %arg14[%c13, %c0_15] : memref<25x668xf32, #tpu.memory_space<vmem>>, vector<1x668xf32>
    tpu.vector_store %arg14[%c13, %c0_15], %27 {strides = array<i32>} : memref<25x668xf32, #tpu.memory_space<vmem>>, vector<1x668xf32>,
    %29 = vector.extract_strided_slice %0 {offsets = [0, 60], sizes = [1, 668], strides = [1, 1]} : vector<1x784xf32> to vector<1x668xf32>
    %c14 = arith.constant 14 : index
    %c0_16 = arith.constant 0 : index
    %30 = vector.load %arg14[%c14, %c0_16] : memref<25x668xf32, #tpu.memory_space<vmem>>, vector<1x668xf32>
    tpu.vector_store %arg14[%c14, %c0_16], %29 {strides = array<i32>} : memref<25x668xf32, #tpu.memory_space<vmem>>, vector<1x668xf32>,
    %31 = vector.extract_strided_slice %0 {offsets = [0, 84], sizes = [1, 668], strides = [1, 1]} : vector<1x784xf32> to vector<1x668xf32>
    %c15 = arith.constant 15 : index
    %c0_17 = arith.constant 0 : index
    %32 = vector.load %arg14[%c15, %c0_17] : memref<25x668xf32, #tpu.memory_space<vmem>>, vector<1x668xf32>
    tpu.vector_store %arg14[%c15, %c0_17], %31 {strides = array<i32>} : memref<25x668xf32, #tpu.memory_space<vmem>>, vector<1x668xf32>,
    %33 = vector.extract_strided_slice %0 {offsets = [0, 85], sizes = [1, 668], strides = [1, 1]} : vector<1x784xf32> to vector<1x668xf32>
    %c16 = arith.constant 16 : index
    %c0_18 = arith.constant 0 : index
    %34 = vector.load %arg14[%c16, %c0_18] : memref<25x668xf32, #tpu.memory_space<vmem>>, vector<1x668xf32>
    tpu.vector_store %arg14[%c16, %c0_18], %33 {strides = array<i32>} : memref<25x668xf32, #tpu.memory_space<vmem>>, vector<1x668xf32>,
    %35 = vector.extract_strided_slice %0 {offsets = [0, 86], sizes = [1, 668], strides = [1, 1]} : vector<1x784xf32> to vector<1x668xf32>
    %c17 = arith.constant 17 : index
    %c0_19 = arith.constant 0 : index
    %36 = vector.load %arg14[%c17, %c0_19] : memref<25x668xf32, #tpu.memory_space<vmem>>, vector<1x668xf32>
    tpu.vector_store %arg14[%c17, %c0_19], %35 {strides = array<i32>} : memref<25x668xf32, #tpu.memory_space<vmem>>, vector<1x668xf32>,
    %37 = vector.extract_strided_slice %0 {offsets = [0, 87], sizes = [1, 668], strides = [1, 1]} : vector<1x784xf32> to vector<1x668xf32>
    %c18 = arith.constant 18 : index
    %c0_20 = arith.constant 0 : index
    %38 = vector.load %arg14[%c18, %c0_20] : memref<25x668xf32, #tpu.memory_space<vmem>>, vector<1x668xf32>
    tpu.vector_store %arg14[%c18, %c0_20], %37 {strides = array<i32>} : memref<25x668xf32, #tpu.memory_space<vmem>>, vector<1x668xf32>,
    %39 = vector.extract_strided_slice %0 {offsets = [0, 88], sizes = [1, 668], strides = [1, 1]} : vector<1x784xf32> to vector<1x668xf32>
    %c19 = arith.constant 19 : index
    %c0_21 = arith.constant 0 : index
    %40 = vector.load %arg14[%c19, %c0_21] : memref<25x668xf32, #tpu.memory_space<vmem>>, vector<1x668xf32>
    tpu.vector_store %arg14[%c19, %c0_21], %39 {strides = array<i32>} : memref<25x668xf32, #tpu.memory_space<vmem>>, vector<1x668xf32>,
    %41 = vector.extract_strided_slice %0 {offsets = [0, 112], sizes = [1, 668], strides = [1, 1]} : vector<1x784xf32> to vector<1x668xf32>
    %c20 = arith.constant 20 : index
    %c0_22 = arith.constant 0 : index
    %42 = vector.load %arg14[%c20, %c0_22] : memref<25x668xf32, #tpu.memory_space<vmem>>, vector<1x668xf32>
    tpu.vector_store %arg14[%c20, %c0_22], %41 {strides = array<i32>} : memref<25x668xf32, #tpu.memory_space<vmem>>, vector<1x668xf32>,
    %43 = vector.extract_strided_slice %0 {offsets = [0, 113], sizes = [1, 668], strides = [1, 1]} : vector<1x784xf32> to vector<1x668xf32>
    %c21 = arith.constant 21 : index
    %c0_23 = arith.constant 0 : index
    %44 = vector.load %arg14[%c21, %c0_23] : memref<25x668xf32, #tpu.memory_space<vmem>>, vector<1x668xf32>
    tpu.vector_store %arg14[%c21, %c0_23], %43 {strides = array<i32>} : memref<25x668xf32, #tpu.memory_space<vmem>>, vector<1x668xf32>,
    %45 = vector.extract_strided_slice %0 {offsets = [0, 114], sizes = [1, 668], strides = [1, 1]} : vector<1x784xf32> to vector<1x668xf32>
    %c22 = arith.constant 22 : index
    %c0_24 = arith.constant 0 : index
    %46 = vector.load %arg14[%c22, %c0_24] : memref<25x668xf32, #tpu.memory_space<vmem>>, vector<1x668xf32>
    tpu.vector_store %arg14[%c22, %c0_24], %45 {strides = array<i32>} : memref<25x668xf32, #tpu.memory_space<vmem>>, vector<1x668xf32>,
    %47 = vector.extract_strided_slice %0 {offsets = [0, 115], sizes = [1, 668], strides = [1, 1]} : vector<1x784xf32> to vector<1x668xf32>
    %c23 = arith.constant 23 : index
    %c0_25 = arith.constant 0 : index
    %48 = vector.load %arg14[%c23, %c0_25] : memref<25x668xf32, #tpu.memory_space<vmem>>, vector<1x668xf32>
    tpu.vector_store %arg14[%c23, %c0_25], %47 {strides = array<i32>} : memref<25x668xf32, #tpu.memory_space<vmem>>, vector<1x668xf32>,
    %49 = vector.extract_strided_slice %0 {offsets = [0, 116], sizes = [1, 668], strides = [1, 1]} : vector<1x784xf32> to vector<1x668xf32>
    %c24 = arith.constant 24 : index
    %c0_26 = arith.constant 0 : index
    %50 = vector.load %arg14[%c24, %c0_26] : memref<25x668xf32, #tpu.memory_space<vmem>>, vector<1x668xf32>
    tpu.vector_store %arg14[%c24, %c0_26], %49 {strides = array<i32>} : memref<25x668xf32, #tpu.memory_space<vmem>>, vector<1x668xf32>,
    %c0_27 = arith.constant 0 : index
    %c0_28 = arith.constant 0 : index
    %51 = vector.load %arg1[%c0_27, %c0_28] : memref<6x25xf32, #tpu.memory_space<vmem>>, vector<6x25xf32>
    %c0_29 = arith.constant 0 : index
    %c0_30 = arith.constant 0 : index
    %52 = vector.load %arg14[%c0_29, %c0_30] : memref<25x668xf32, #tpu.memory_space<vmem>>, vector<25x668xf32>
    %cst = arith.constant dense<0.000000e+00> : vector<6x668xf32>
    %53 = tpu.matmul %51, %52, %cst {dimension_numbers = #tpu.dot_dimension_numbers<[1], [0], [0], [1], [0, 0, 1, 1], [], []>} : vector<6x25xf32>, vector<25x668xf32>, vector<6x668xf32> -> vector<6x668xf32>
    %c0_31 = arith.constant 0 : index
    %c0_32 = arith.constant 0 : index
    %54 = vector.load %arg2[%c0_31, %c0_32] : memref<6x1xf32, #tpu.memory_space<vmem>>, vector<6x1xf32>
    %55 = vector.broadcast %54 : vector<6x1xf32> to vector<6x668xf32>
    %56 = arith.addf %53, %55 : vector<6x668xf32>
    %cst_33 = arith.constant 0.000000e+00 : f32
    %57 = vector.broadcast %cst_33 : f32 to vector<6x668xf32>
    %58 = arith.maximumf %56, %57 : vector<6x668xf32>
    %59 = vector.extract_strided_slice %58 {offsets = [0, 0], sizes = [6, 639], strides = [1, 1]} : vector<6x668xf32> to vector<6x639xf32>
    %60 = vector.extract_strided_slice %58 {offsets = [0, 1], sizes = [6, 639], strides = [1, 1]} : vector<6x668xf32> to vector<6x639xf32>
    %61 = arith.maximumf %59, %60 : vector<6x639xf32>
    %62 = vector.extract_strided_slice %58 {offsets = [0, 28], sizes = [6, 639], strides = [1, 1]} : vector<6x668xf32> to vector<6x639xf32>
    %63 = vector.extract_strided_slice %58 {offsets = [0, 29], sizes = [6, 639], strides = [1, 1]} : vector<6x668xf32> to vector<6x639xf32>
    %64 = arith.maximumf %62, %63 : vector<6x639xf32>
    %65 = arith.maximumf %61, %64 : vector<6x639xf32>
    %c0_34 = arith.constant 0 : index
    %c0_35 = arith.constant 0 : index
    %66 = vector.load %arg3[%c0_34, %c0_35] : memref<639x144xf32, #tpu.memory_space<vmem>>, vector<639x144xf32>
    %cst_36 = arith.constant dense<0.000000e+00> : vector<6x144xf32>
    %67 = tpu.matmul %65, %66, %cst_36 {dimension_numbers = #tpu.dot_dimension_numbers<[1], [0], [0], [1], [0, 0, 1, 1], [], []>} : vector<6x639xf32>, vector<639x144xf32>, vector<6x144xf32> -> vector<6x144xf32>
    %68 = vector.extract_strided_slice %67 {offsets = [0, 0], sizes = [6, 92], strides = [1, 1]} : vector<6x144xf32> to vector<6x92xf32>
    %c0_37 = arith.constant 0 : index
    %c0_38 = arith.constant 0 : index
    %69 = vector.load %arg15[%c0_37, %c0_38] : memref<150x92xf32, #tpu.memory_space<vmem>>, vector<6x92xf32>
    tpu.vector_store %arg15[%c0_37, %c0_38], %68 {strides = array<i32>} : memref<150x92xf32, #tpu.memory_space<vmem>>, vector<6x92xf32>,
    %70 = vector.extract_strided_slice %67 {offsets = [0, 1], sizes = [6, 92], strides = [1, 1]} : vector<6x144xf32> to vector<6x92xf32>
    %c6_39 = arith.constant 6 : index
    %c0_40 = arith.constant 0 : index
    %71 = vector.load %arg15[%c6_39, %c0_40] : memref<150x92xf32, #tpu.memory_space<vmem>>, vector<6x92xf32>
    tpu.vector_store %arg15[%c6_39, %c0_40], %70 {strides = array<i32>} : memref<150x92xf32, #tpu.memory_space<vmem>>, vector<6x92xf32>,
    %72 = vector.extract_strided_slice %67 {offsets = [0, 2], sizes = [6, 92], strides = [1, 1]} : vector<6x144xf32> to vector<6x92xf32>
    %c12_41 = arith.constant 12 : index
    %c0_42 = arith.constant 0 : index
    %73 = vector.load %arg15[%c12_41, %c0_42] : memref<150x92xf32, #tpu.memory_space<vmem>>, vector<6x92xf32>
    tpu.vector_store %arg15[%c12_41, %c0_42], %72 {strides = array<i32>} : memref<150x92xf32, #tpu.memory_space<vmem>>, vector<6x92xf32>,
    %74 = vector.extract_strided_slice %67 {offsets = [0, 3], sizes = [6, 92], strides = [1, 1]} : vector<6x144xf32> to vector<6x92xf32>
    %c18_43 = arith.constant 18 : index
    %c0_44 = arith.constant 0 : index
    %75 = vector.load %arg15[%c18_43, %c0_44] : memref<150x92xf32, #tpu.memory_space<vmem>>, vector<6x92xf32>
    tpu.vector_store %arg15[%c18_43, %c0_44], %74 {strides = array<i32>} : memref<150x92xf32, #tpu.memory_space<vmem>>, vector<6x92xf32>,
    %76 = vector.extract_strided_slice %67 {offsets = [0, 4], sizes = [6, 92], strides = [1, 1]} : vector<6x144xf32> to vector<6x92xf32>
    %c24_45 = arith.constant 24 : index
    %c0_46 = arith.constant 0 : index
    %77 = vector.load %arg15[%c24_45, %c0_46] : memref<150x92xf32, #tpu.memory_space<vmem>>, vector<6x92xf32>
    tpu.vector_store %arg15[%c24_45, %c0_46], %76 {strides = array<i32>} : memref<150x92xf32, #tpu.memory_space<vmem>>, vector<6x92xf32>,
    %78 = vector.extract_strided_slice %67 {offsets = [0, 12], sizes = [6, 92], strides = [1, 1]} : vector<6x144xf32> to vector<6x92xf32>
    %c30 = arith.constant 30 : index
    %c0_47 = arith.constant 0 : index
    %79 = vector.load %arg15[%c30, %c0_47] : memref<150x92xf32, #tpu.memory_space<vmem>>, vector<6x92xf32>
    tpu.vector_store %arg15[%c30, %c0_47], %78 {strides = array<i32>} : memref<150x92xf32, #tpu.memory_space<vmem>>, vector<6x92xf32>,
    %80 = vector.extract_strided_slice %67 {offsets = [0, 13], sizes = [6, 92], strides = [1, 1]} : vector<6x144xf32> to vector<6x92xf32>
    %c36 = arith.constant 36 : index
    %c0_48 = arith.constant 0 : index
    %81 = vector.load %arg15[%c36, %c0_48] : memref<150x92xf32, #tpu.memory_space<vmem>>, vector<6x92xf32>
    tpu.vector_store %arg15[%c36, %c0_48], %80 {strides = array<i32>} : memref<150x92xf32, #tpu.memory_space<vmem>>, vector<6x92xf32>,
    %82 = vector.extract_strided_slice %67 {offsets = [0, 14], sizes = [6, 92], strides = [1, 1]} : vector<6x144xf32> to vector<6x92xf32>
    %c42 = arith.constant 42 : index
    %c0_49 = arith.constant 0 : index
    %83 = vector.load %arg15[%c42, %c0_49] : memref<150x92xf32, #tpu.memory_space<vmem>>, vector<6x92xf32>
    tpu.vector_store %arg15[%c42, %c0_49], %82 {strides = array<i32>} : memref<150x92xf32, #tpu.memory_space<vmem>>, vector<6x92xf32>,
    %84 = vector.extract_strided_slice %67 {offsets = [0, 15], sizes = [6, 92], strides = [1, 1]} : vector<6x144xf32> to vector<6x92xf32>
    %c48 = arith.constant 48 : index
    %c0_50 = arith.constant 0 : index
    %85 = vector.load %arg15[%c48, %c0_50] : memref<150x92xf32, #tpu.memory_space<vmem>>, vector<6x92xf32>
    tpu.vector_store %arg15[%c48, %c0_50], %84 {strides = array<i32>} : memref<150x92xf32, #tpu.memory_space<vmem>>, vector<6x92xf32>,
    %86 = vector.extract_strided_slice %67 {offsets = [0, 16], sizes = [6, 92], strides = [1, 1]} : vector<6x144xf32> to vector<6x92xf32>
    %c54 = arith.constant 54 : index
    %c0_51 = arith.constant 0 : index
    %87 = vector.load %arg15[%c54, %c0_51] : memref<150x92xf32, #tpu.memory_space<vmem>>, vector<6x92xf32>
    tpu.vector_store %arg15[%c54, %c0_51], %86 {strides = array<i32>} : memref<150x92xf32, #tpu.memory_space<vmem>>, vector<6x92xf32>,
    %88 = vector.extract_strided_slice %67 {offsets = [0, 24], sizes = [6, 92], strides = [1, 1]} : vector<6x144xf32> to vector<6x92xf32>
    %c60 = arith.constant 60 : index
    %c0_52 = arith.constant 0 : index
    %89 = vector.load %arg15[%c60, %c0_52] : memref<150x92xf32, #tpu.memory_space<vmem>>, vector<6x92xf32>
    tpu.vector_store %arg15[%c60, %c0_52], %88 {strides = array<i32>} : memref<150x92xf32, #tpu.memory_space<vmem>>, vector<6x92xf32>,
    %90 = vector.extract_strided_slice %67 {offsets = [0, 25], sizes = [6, 92], strides = [1, 1]} : vector<6x144xf32> to vector<6x92xf32>
    %c66 = arith.constant 66 : index
    %c0_53 = arith.constant 0 : index
    %91 = vector.load %arg15[%c66, %c0_53] : memref<150x92xf32, #tpu.memory_space<vmem>>, vector<6x92xf32>
    tpu.vector_store %arg15[%c66, %c0_53], %90 {strides = array<i32>} : memref<150x92xf32, #tpu.memory_space<vmem>>, vector<6x92xf32>,
    %92 = vector.extract_strided_slice %67 {offsets = [0, 26], sizes = [6, 92], strides = [1, 1]} : vector<6x144xf32> to vector<6x92xf32>
    %c72 = arith.constant 72 : index
    %c0_54 = arith.constant 0 : index
    %93 = vector.load %arg15[%c72, %c0_54] : memref<150x92xf32, #tpu.memory_space<vmem>>, vector<6x92xf32>
    tpu.vector_store %arg15[%c72, %c0_54], %92 {strides = array<i32>} : memref<150x92xf32, #tpu.memory_space<vmem>>, vector<6x92xf32>,
    %94 = vector.extract_strided_slice %67 {offsets = [0, 27], sizes = [6, 92], strides = [1, 1]} : vector<6x144xf32> to vector<6x92xf32>
    %c78 = arith.constant 78 : index
    %c0_55 = arith.constant 0 : index
    %95 = vector.load %arg15[%c78, %c0_55] : memref<150x92xf32, #tpu.memory_space<vmem>>, vector<6x92xf32>
    tpu.vector_store %arg15[%c78, %c0_55], %94 {strides = array<i32>} : memref<150x92xf32, #tpu.memory_space<vmem>>, vector<6x92xf32>,
    %96 = vector.extract_strided_slice %67 {offsets = [0, 28], sizes = [6, 92], strides = [1, 1]} : vector<6x144xf32> to vector<6x92xf32>
    %c84 = arith.constant 84 : index
    %c0_56 = arith.constant 0 : index
    %97 = vector.load %arg15[%c84, %c0_56] : memref<150x92xf32, #tpu.memory_space<vmem>>, vector<6x92xf32>
    tpu.vector_store %arg15[%c84, %c0_56], %96 {strides = array<i32>} : memref<150x92xf32, #tpu.memory_space<vmem>>, vector<6x92xf32>,
    %98 = vector.extract_strided_slice %67 {offsets = [0, 36], sizes = [6, 92], strides = [1, 1]} : vector<6x144xf32> to vector<6x92xf32>
    %c90 = arith.constant 90 : index
    %c0_57 = arith.constant 0 : index
    %99 = vector.load %arg15[%c90, %c0_57] : memref<150x92xf32, #tpu.memory_space<vmem>>, vector<6x92xf32>
    tpu.vector_store %arg15[%c90, %c0_57], %98 {strides = array<i32>} : memref<150x92xf32, #tpu.memory_space<vmem>>, vector<6x92xf32>,
    %100 = vector.extract_strided_slice %67 {offsets = [0, 37], sizes = [6, 92], strides = [1, 1]} : vector<6x144xf32> to vector<6x92xf32>
    %c96 = arith.constant 96 : index
    %c0_58 = arith.constant 0 : index
    %101 = vector.load %arg15[%c96, %c0_58] : memref<150x92xf32, #tpu.memory_space<vmem>>, vector<6x92xf32>
    tpu.vector_store %arg15[%c96, %c0_58], %100 {strides = array<i32>} : memref<150x92xf32, #tpu.memory_space<vmem>>, vector<6x92xf32>,
    %102 = vector.extract_strided_slice %67 {offsets = [0, 38], sizes = [6, 92], strides = [1, 1]} : vector<6x144xf32> to vector<6x92xf32>
    %c102 = arith.constant 102 : index
    %c0_59 = arith.constant 0 : index
    %103 = vector.load %arg15[%c102, %c0_59] : memref<150x92xf32, #tpu.memory_space<vmem>>, vector<6x92xf32>
    tpu.vector_store %arg15[%c102, %c0_59], %102 {strides = array<i32>} : memref<150x92xf32, #tpu.memory_space<vmem>>, vector<6x92xf32>,
    %104 = vector.extract_strided_slice %67 {offsets = [0, 39], sizes = [6, 92], strides = [1, 1]} : vector<6x144xf32> to vector<6x92xf32>
    %c108 = arith.constant 108 : index
    %c0_60 = arith.constant 0 : index
    %105 = vector.load %arg15[%c108, %c0_60] : memref<150x92xf32, #tpu.memory_space<vmem>>, vector<6x92xf32>
    tpu.vector_store %arg15[%c108, %c0_60], %104 {strides = array<i32>} : memref<150x92xf32, #tpu.memory_space<vmem>>, vector<6x92xf32>,
    %106 = vector.extract_strided_slice %67 {offsets = [0, 40], sizes = [6, 92], strides = [1, 1]} : vector<6x144xf32> to vector<6x92xf32>
    %c114 = arith.constant 114 : index
    %c0_61 = arith.constant 0 : index
    %107 = vector.load %arg15[%c114, %c0_61] : memref<150x92xf32, #tpu.memory_space<vmem>>, vector<6x92xf32>
    tpu.vector_store %arg15[%c114, %c0_61], %106 {strides = array<i32>} : memref<150x92xf32, #tpu.memory_space<vmem>>, vector<6x92xf32>,
    %108 = vector.extract_strided_slice %67 {offsets = [0, 48], sizes = [6, 92], strides = [1, 1]} : vector<6x144xf32> to vector<6x92xf32>
    %c120 = arith.constant 120 : index
    %c0_62 = arith.constant 0 : index
    %109 = vector.load %arg15[%c120, %c0_62] : memref<150x92xf32, #tpu.memory_space<vmem>>, vector<6x92xf32>
    tpu.vector_store %arg15[%c120, %c0_62], %108 {strides = array<i32>} : memref<150x92xf32, #tpu.memory_space<vmem>>, vector<6x92xf32>,
    %110 = vector.extract_strided_slice %67 {offsets = [0, 49], sizes = [6, 92], strides = [1, 1]} : vector<6x144xf32> to vector<6x92xf32>
    %c126 = arith.constant 126 : index
    %c0_63 = arith.constant 0 : index
    %111 = vector.load %arg15[%c126, %c0_63] : memref<150x92xf32, #tpu.memory_space<vmem>>, vector<6x92xf32>
    tpu.vector_store %arg15[%c126, %c0_63], %110 {strides = array<i32>} : memref<150x92xf32, #tpu.memory_space<vmem>>, vector<6x92xf32>,
    %112 = vector.extract_strided_slice %67 {offsets = [0, 50], sizes = [6, 92], strides = [1, 1]} : vector<6x144xf32> to vector<6x92xf32>
    %c132 = arith.constant 132 : index
    %c0_64 = arith.constant 0 : index
    %113 = vector.load %arg15[%c132, %c0_64] : memref<150x92xf32, #tpu.memory_space<vmem>>, vector<6x92xf32>
    tpu.vector_store %arg15[%c132, %c0_64], %112 {strides = array<i32>} : memref<150x92xf32, #tpu.memory_space<vmem>>, vector<6x92xf32>,
    %114 = vector.extract_strided_slice %67 {offsets = [0, 51], sizes = [6, 92], strides = [1, 1]} : vector<6x144xf32> to vector<6x92xf32>
    %c138 = arith.constant 138 : index
    %c0_65 = arith.constant 0 : index
    %115 = vector.load %arg15[%c138, %c0_65] : memref<150x92xf32, #tpu.memory_space<vmem>>, vector<6x92xf32>
    tpu.vector_store %arg15[%c138, %c0_65], %114 {strides = array<i32>} : memref<150x92xf32, #tpu.memory_space<vmem>>, vector<6x92xf32>,
    %116 = vector.extract_strided_slice %67 {offsets = [0, 52], sizes = [6, 92], strides = [1, 1]} : vector<6x144xf32> to vector<6x92xf32>
    %c144 = arith.constant 144 : index
    %c0_66 = arith.constant 0 : index
    %117 = vector.load %arg15[%c144, %c0_66] : memref<150x92xf32, #tpu.memory_space<vmem>>, vector<6x92xf32>
    tpu.vector_store %arg15[%c144, %c0_66], %116 {strides = array<i32>} : memref<150x92xf32, #tpu.memory_space<vmem>>, vector<6x92xf32>,
    %c0_67 = arith.constant 0 : index
    %c0_68 = arith.constant 0 : index
    %118 = vector.load %arg4[%c0_67, %c0_68] : memref<16x150xf32, #tpu.memory_space<vmem>>, vector<16x150xf32>
    %c0_69 = arith.constant 0 : index
    %c0_70 = arith.constant 0 : index
    %119 = vector.load %arg15[%c0_69, %c0_70] : memref<150x92xf32, #tpu.memory_space<vmem>>, vector<150x92xf32>
    %cst_71 = arith.constant dense<0.000000e+00> : vector<16x92xf32>
    %120 = tpu.matmul %118, %119, %cst_71 {dimension_numbers = #tpu.dot_dimension_numbers<[1], [0], [0], [1], [0, 0, 1, 1], [], []>} : vector<16x150xf32>, vector<150x92xf32>, vector<16x92xf32> -> vector<16x92xf32>
    %c0_72 = arith.constant 0 : index
    %c0_73 = arith.constant 0 : index
    %121 = vector.load %arg5[%c0_72, %c0_73] : memref<16x1xf32, #tpu.memory_space<vmem>>, vector<16x1xf32>
    %122 = vector.broadcast %121 : vector<16x1xf32> to vector<16x92xf32>
    %123 = arith.addf %120, %122 : vector<16x92xf32>
    %cst_74 = arith.constant 0.000000e+00 : f32
    %124 = vector.broadcast %cst_74 : f32 to vector<16x92xf32>
    %125 = arith.maximumf %123, %124 : vector<16x92xf32>
    %126 = vector.extract_strided_slice %125 {offsets = [0, 0], sizes = [16, 79], strides = [1, 1]} : vector<16x92xf32> to vector<16x79xf32>
    %127 = vector.extract_strided_slice %125 {offsets = [0, 1], sizes = [16, 79], strides = [1, 1]} : vector<16x92xf32> to vector<16x79xf32>
    %128 = arith.maximumf %126, %127 : vector<16x79xf32>
    %129 = vector.extract_strided_slice %125 {offsets = [0, 12], sizes = [16, 79], strides = [1, 1]} : vector<16x92xf32> to vector<16x79xf32>
    %130 = vector.extract_strided_slice %125 {offsets = [0, 13], sizes = [16, 79], strides = [1, 1]} : vector<16x92xf32> to vector<16x79xf32>
    %131 = arith.maximumf %129, %130 : vector<16x79xf32>
    %132 = arith.maximumf %128, %131 : vector<16x79xf32>
    %c0_75 = arith.constant 0 : index
    %c0_76 = arith.constant 0 : index
    %133 = vector.load %arg6[%c0_75, %c0_76] : memref<79x16xf32, #tpu.memory_space<vmem>>, vector<79x16xf32>
    %cst_77 = arith.constant dense<0.000000e+00> : vector<16x16xf32>
    %134 = tpu.matmul %132, %133, %cst_77 {dimension_numbers = #tpu.dot_dimension_numbers<[1], [0], [0], [1], [0, 0, 1, 1], [], []>} : vector<16x79xf32>, vector<79x16xf32>, vector<16x16xf32> -> vector<16x16xf32>
    %c0_78 = arith.constant 0 : index
    %c0_79 = arith.constant 0 : index
    %135 = vector.load %arg8[%c0_78, %c0_79] : memref<1x120xf32, #tpu.memory_space<vmem>>, vector<1x120xf32>
    %136 = vector.extract_strided_slice %134 {offsets = [0, 0], sizes = [1, 16], strides = [1, 1]} : vector<16x16xf32> to vector<1x16xf32>
    %c0_80 = arith.constant 0 : index
    %c0_81 = arith.constant 0 : index
    %c0_82 = arith.constant 0 : index
    %137 = vector.load %arg7[%c0_80, %c0_81, %c0_82] : memref<16x16x120xf32, #tpu.memory_space<vmem>>, vector<1x16x120xf32>
    %138 = vector.shape_cast %137 : vector<1x16x120xf32> to vector<16x120xf32>
    %cst_83 = arith.constant dense<0.000000e+00> : vector<1x120xf32>
    %139 = tpu.matmul %136, %138, %cst_83 {dimension_numbers = #tpu.dot_dimension_numbers<[1], [0], [0], [1], [0, 0, 1, 1], [], []>} : vector<1x16xf32>, vector<16x120xf32>, vector<1x120xf32> -> vector<1x120xf32>
    %140 = arith.addf %135, %139 : vector<1x120xf32>
    %141 = vector.extract_strided_slice %134 {offsets = [1, 0], sizes = [1, 16], strides = [1, 1]} : vector<16x16xf32> to vector<1x16xf32>
    %c1_84 = arith.constant 1 : index
    %c0_85 = arith.constant 0 : index
    %c0_86 = arith.constant 0 : index
    %142 = vector.load %arg7[%c1_84, %c0_85, %c0_86] : memref<16x16x120xf32, #tpu.memory_space<vmem>>, vector<1x16x120xf32>
    %143 = vector.shape_cast %142 : vector<1x16x120xf32> to vector<16x120xf32>
    %cst_87 = arith.constant dense<0.000000e+00> : vector<1x120xf32>
    %144 = tpu.matmul %141, %143, %cst_87 {dimension_numbers = #tpu.dot_dimension_numbers<[1], [0], [0], [1], [0, 0, 1, 1], [], []>} : vector<1x16xf32>, vector<16x120xf32>, vector<1x120xf32> -> vector<1x120xf32>
    %145 = arith.addf %140, %144 : vector<1x120xf32>
    %146 = vector.extract_strided_slice %134 {offsets = [2, 0], sizes = [1, 16], strides = [1, 1]} : vector<16x16xf32> to vector<1x16xf32>
    %c2_88 = arith.constant 2 : index
    %c0_89 = arith.constant 0 : index
    %c0_90 = arith.constant 0 : index
    %147 = vector.load %arg7[%c2_88, %c0_89, %c0_90] : memref<16x16x120xf32, #tpu.memory_space<vmem>>, vector<1x16x120xf32>
    %148 = vector.shape_cast %147 : vector<1x16x120xf32> to vector<16x120xf32>
    %cst_91 = arith.constant dense<0.000000e+00> : vector<1x120xf32>
    %149 = tpu.matmul %146, %148, %cst_91 {dimension_numbers = #tpu.dot_dimension_numbers<[1], [0], [0], [1], [0, 0, 1, 1], [], []>} : vector<1x16xf32>, vector<16x120xf32>, vector<1x120xf32> -> vector<1x120xf32>
    %150 = arith.addf %145, %149 : vector<1x120xf32>
    %151 = vector.extract_strided_slice %134 {offsets = [3, 0], sizes = [1, 16], strides = [1, 1]} : vector<16x16xf32> to vector<1x16xf32>
    %c3_92 = arith.constant 3 : index
    %c0_93 = arith.constant 0 : index
    %c0_94 = arith.constant 0 : index
    %152 = vector.load %arg7[%c3_92, %c0_93, %c0_94] : memref<16x16x120xf32, #tpu.memory_space<vmem>>, vector<1x16x120xf32>
    %153 = vector.shape_cast %152 : vector<1x16x120xf32> to vector<16x120xf32>
    %cst_95 = arith.constant dense<0.000000e+00> : vector<1x120xf32>
    %154 = tpu.matmul %151, %153, %cst_95 {dimension_numbers = #tpu.dot_dimension_numbers<[1], [0], [0], [1], [0, 0, 1, 1], [], []>} : vector<1x16xf32>, vector<16x120xf32>, vector<1x120xf32> -> vector<1x120xf32>
    %155 = arith.addf %150, %154 : vector<1x120xf32>
    %156 = vector.extract_strided_slice %134 {offsets = [4, 0], sizes = [1, 16], strides = [1, 1]} : vector<16x16xf32> to vector<1x16xf32>
    %c4_96 = arith.constant 4 : index
    %c0_97 = arith.constant 0 : index
    %c0_98 = arith.constant 0 : index
    %157 = vector.load %arg7[%c4_96, %c0_97, %c0_98] : memref<16x16x120xf32, #tpu.memory_space<vmem>>, vector<1x16x120xf32>
    %158 = vector.shape_cast %157 : vector<1x16x120xf32> to vector<16x120xf32>
    %cst_99 = arith.constant dense<0.000000e+00> : vector<1x120xf32>
    %159 = tpu.matmul %156, %158, %cst_99 {dimension_numbers = #tpu.dot_dimension_numbers<[1], [0], [0], [1], [0, 0, 1, 1], [], []>} : vector<1x16xf32>, vector<16x120xf32>, vector<1x120xf32> -> vector<1x120xf32>
    %160 = arith.addf %155, %159 : vector<1x120xf32>
    %161 = vector.extract_strided_slice %134 {offsets = [5, 0], sizes = [1, 16], strides = [1, 1]} : vector<16x16xf32> to vector<1x16xf32>
    %c5_100 = arith.constant 5 : index
    %c0_101 = arith.constant 0 : index
    %c0_102 = arith.constant 0 : index
    %162 = vector.load %arg7[%c5_100, %c0_101, %c0_102] : memref<16x16x120xf32, #tpu.memory_space<vmem>>, vector<1x16x120xf32>
    %163 = vector.shape_cast %162 : vector<1x16x120xf32> to vector<16x120xf32>
    %cst_103 = arith.constant dense<0.000000e+00> : vector<1x120xf32>
    %164 = tpu.matmul %161, %163, %cst_103 {dimension_numbers = #tpu.dot_dimension_numbers<[1], [0], [0], [1], [0, 0, 1, 1], [], []>} : vector<1x16xf32>, vector<16x120xf32>, vector<1x120xf32> -> vector<1x120xf32>
    %165 = arith.addf %160, %164 : vector<1x120xf32>
    %166 = vector.extract_strided_slice %134 {offsets = [6, 0], sizes = [1, 16], strides = [1, 1]} : vector<16x16xf32> to vector<1x16xf32>
    %c6_104 = arith.constant 6 : index
    %c0_105 = arith.constant 0 : index
    %c0_106 = arith.constant 0 : index
    %167 = vector.load %arg7[%c6_104, %c0_105, %c0_106] : memref<16x16x120xf32, #tpu.memory_space<vmem>>, vector<1x16x120xf32>
    %168 = vector.shape_cast %167 : vector<1x16x120xf32> to vector<16x120xf32>
    %cst_107 = arith.constant dense<0.000000e+00> : vector<1x120xf32>
    %169 = tpu.matmul %166, %168, %cst_107 {dimension_numbers = #tpu.dot_dimension_numbers<[1], [0], [0], [1], [0, 0, 1, 1], [], []>} : vector<1x16xf32>, vector<16x120xf32>, vector<1x120xf32> -> vector<1x120xf32>
    %170 = arith.addf %165, %169 : vector<1x120xf32>
    %171 = vector.extract_strided_slice %134 {offsets = [7, 0], sizes = [1, 16], strides = [1, 1]} : vector<16x16xf32> to vector<1x16xf32>
    %c7_108 = arith.constant 7 : index
    %c0_109 = arith.constant 0 : index
    %c0_110 = arith.constant 0 : index
    %172 = vector.load %arg7[%c7_108, %c0_109, %c0_110] : memref<16x16x120xf32, #tpu.memory_space<vmem>>, vector<1x16x120xf32>
    %173 = vector.shape_cast %172 : vector<1x16x120xf32> to vector<16x120xf32>
    %cst_111 = arith.constant dense<0.000000e+00> : vector<1x120xf32>
    %174 = tpu.matmul %171, %173, %cst_111 {dimension_numbers = #tpu.dot_dimension_numbers<[1], [0], [0], [1], [0, 0, 1, 1], [], []>} : vector<1x16xf32>, vector<16x120xf32>, vector<1x120xf32> -> vector<1x120xf32>
    %175 = arith.addf %170, %174 : vector<1x120xf32>
    %176 = vector.extract_strided_slice %134 {offsets = [8, 0], sizes = [1, 16], strides = [1, 1]} : vector<16x16xf32> to vector<1x16xf32>
    %c8_112 = arith.constant 8 : index
    %c0_113 = arith.constant 0 : index
    %c0_114 = arith.constant 0 : index
    %177 = vector.load %arg7[%c8_112, %c0_113, %c0_114] : memref<16x16x120xf32, #tpu.memory_space<vmem>>, vector<1x16x120xf32>
    %178 = vector.shape_cast %177 : vector<1x16x120xf32> to vector<16x120xf32>
    %cst_115 = arith.constant dense<0.000000e+00> : vector<1x120xf32>
    %179 = tpu.matmul %176, %178, %cst_115 {dimension_numbers = #tpu.dot_dimension_numbers<[1], [0], [0], [1], [0, 0, 1, 1], [], []>} : vector<1x16xf32>, vector<16x120xf32>, vector<1x120xf32> -> vector<1x120xf32>
    %180 = arith.addf %175, %179 : vector<1x120xf32>
    %181 = vector.extract_strided_slice %134 {offsets = [9, 0], sizes = [1, 16], strides = [1, 1]} : vector<16x16xf32> to vector<1x16xf32>
    %c9_116 = arith.constant 9 : index
    %c0_117 = arith.constant 0 : index
    %c0_118 = arith.constant 0 : index
    %182 = vector.load %arg7[%c9_116, %c0_117, %c0_118] : memref<16x16x120xf32, #tpu.memory_space<vmem>>, vector<1x16x120xf32>
    %183 = vector.shape_cast %182 : vector<1x16x120xf32> to vector<16x120xf32>
    %cst_119 = arith.constant dense<0.000000e+00> : vector<1x120xf32>
    %184 = tpu.matmul %181, %183, %cst_119 {dimension_numbers = #tpu.dot_dimension_numbers<[1], [0], [0], [1], [0, 0, 1, 1], [], []>} : vector<1x16xf32>, vector<16x120xf32>, vector<1x120xf32> -> vector<1x120xf32>
    %185 = arith.addf %180, %184 : vector<1x120xf32>
    %186 = vector.extract_strided_slice %134 {offsets = [10, 0], sizes = [1, 16], strides = [1, 1]} : vector<16x16xf32> to vector<1x16xf32>
    %c10_120 = arith.constant 10 : index
    %c0_121 = arith.constant 0 : index
    %c0_122 = arith.constant 0 : index
    %187 = vector.load %arg7[%c10_120, %c0_121, %c0_122] : memref<16x16x120xf32, #tpu.memory_space<vmem>>, vector<1x16x120xf32>
    %188 = vector.shape_cast %187 : vector<1x16x120xf32> to vector<16x120xf32>
    %cst_123 = arith.constant dense<0.000000e+00> : vector<1x120xf32>
    %189 = tpu.matmul %186, %188, %cst_123 {dimension_numbers = #tpu.dot_dimension_numbers<[1], [0], [0], [1], [0, 0, 1, 1], [], []>} : vector<1x16xf32>, vector<16x120xf32>, vector<1x120xf32> -> vector<1x120xf32>
    %190 = arith.addf %185, %189 : vector<1x120xf32>
    %191 = vector.extract_strided_slice %134 {offsets = [11, 0], sizes = [1, 16], strides = [1, 1]} : vector<16x16xf32> to vector<1x16xf32>
    %c11_124 = arith.constant 11 : index
    %c0_125 = arith.constant 0 : index
    %c0_126 = arith.constant 0 : index
    %192 = vector.load %arg7[%c11_124, %c0_125, %c0_126] : memref<16x16x120xf32, #tpu.memory_space<vmem>>, vector<1x16x120xf32>
    %193 = vector.shape_cast %192 : vector<1x16x120xf32> to vector<16x120xf32>
    %cst_127 = arith.constant dense<0.000000e+00> : vector<1x120xf32>
    %194 = tpu.matmul %191, %193, %cst_127 {dimension_numbers = #tpu.dot_dimension_numbers<[1], [0], [0], [1], [0, 0, 1, 1], [], []>} : vector<1x16xf32>, vector<16x120xf32>, vector<1x120xf32> -> vector<1x120xf32>
    %195 = arith.addf %190, %194 : vector<1x120xf32>
    %196 = vector.extract_strided_slice %134 {offsets = [12, 0], sizes = [1, 16], strides = [1, 1]} : vector<16x16xf32> to vector<1x16xf32>
    %c12_128 = arith.constant 12 : index
    %c0_129 = arith.constant 0 : index
    %c0_130 = arith.constant 0 : index
    %197 = vector.load %arg7[%c12_128, %c0_129, %c0_130] : memref<16x16x120xf32, #tpu.memory_space<vmem>>, vector<1x16x120xf32>
    %198 = vector.shape_cast %197 : vector<1x16x120xf32> to vector<16x120xf32>
    %cst_131 = arith.constant dense<0.000000e+00> : vector<1x120xf32>
    %199 = tpu.matmul %196, %198, %cst_131 {dimension_numbers = #tpu.dot_dimension_numbers<[1], [0], [0], [1], [0, 0, 1, 1], [], []>} : vector<1x16xf32>, vector<16x120xf32>, vector<1x120xf32> -> vector<1x120xf32>
    %200 = arith.addf %195, %199 : vector<1x120xf32>
    %201 = vector.extract_strided_slice %134 {offsets = [13, 0], sizes = [1, 16], strides = [1, 1]} : vector<16x16xf32> to vector<1x16xf32>
    %c13_132 = arith.constant 13 : index
    %c0_133 = arith.constant 0 : index
    %c0_134 = arith.constant 0 : index
    %202 = vector.load %arg7[%c13_132, %c0_133, %c0_134] : memref<16x16x120xf32, #tpu.memory_space<vmem>>, vector<1x16x120xf32>
    %203 = vector.shape_cast %202 : vector<1x16x120xf32> to vector<16x120xf32>
    %cst_135 = arith.constant dense<0.000000e+00> : vector<1x120xf32>
    %204 = tpu.matmul %201, %203, %cst_135 {dimension_numbers = #tpu.dot_dimension_numbers<[1], [0], [0], [1], [0, 0, 1, 1], [], []>} : vector<1x16xf32>, vector<16x120xf32>, vector<1x120xf32> -> vector<1x120xf32>
    %205 = arith.addf %200, %204 : vector<1x120xf32>
    %206 = vector.extract_strided_slice %134 {offsets = [14, 0], sizes = [1, 16], strides = [1, 1]} : vector<16x16xf32> to vector<1x16xf32>
    %c14_136 = arith.constant 14 : index
    %c0_137 = arith.constant 0 : index
    %c0_138 = arith.constant 0 : index
    %207 = vector.load %arg7[%c14_136, %c0_137, %c0_138] : memref<16x16x120xf32, #tpu.memory_space<vmem>>, vector<1x16x120xf32>
    %208 = vector.shape_cast %207 : vector<1x16x120xf32> to vector<16x120xf32>
    %cst_139 = arith.constant dense<0.000000e+00> : vector<1x120xf32>
    %209 = tpu.matmul %206, %208, %cst_139 {dimension_numbers = #tpu.dot_dimension_numbers<[1], [0], [0], [1], [0, 0, 1, 1], [], []>} : vector<1x16xf32>, vector<16x120xf32>, vector<1x120xf32> -> vector<1x120xf32>
    %210 = arith.addf %205, %209 : vector<1x120xf32>
    %211 = vector.extract_strided_slice %134 {offsets = [15, 0], sizes = [1, 16], strides = [1, 1]} : vector<16x16xf32> to vector<1x16xf32>
    %c15_140 = arith.constant 15 : index
    %c0_141 = arith.constant 0 : index
    %c0_142 = arith.constant 0 : index
    %212 = vector.load %arg7[%c15_140, %c0_141, %c0_142] : memref<16x16x120xf32, #tpu.memory_space<vmem>>, vector<1x16x120xf32>
    %213 = vector.shape_cast %212 : vector<1x16x120xf32> to vector<16x120xf32>
    %cst_143 = arith.constant dense<0.000000e+00> : vector<1x120xf32>
    %214 = tpu.matmul %211, %213, %cst_143 {dimension_numbers = #tpu.dot_dimension_numbers<[1], [0], [0], [1], [0, 0, 1, 1], [], []>} : vector<1x16xf32>, vector<16x120xf32>, vector<1x120xf32> -> vector<1x120xf32>
    %215 = arith.addf %210, %214 : vector<1x120xf32>
    %cst_144 = arith.constant 0.000000e+00 : f32
    %216 = vector.broadcast %cst_144 : f32 to vector<1x120xf32>
    %217 = arith.maximumf %215, %216 : vector<1x120xf32>
    %c0_145 = arith.constant 0 : index
    %c0_146 = arith.constant 0 : index
    %218 = vector.load %arg9[%c0_145, %c0_146] : memref<120x84xf32, #tpu.memory_space<vmem>>, vector<120x84xf32>
    %cst_147 = arith.constant dense<0.000000e+00> : vector<1x84xf32>
    %219 = tpu.matmul %217, %218, %cst_147 {dimension_numbers = #tpu.dot_dimension_numbers<[1], [0], [0], [1], [0, 0, 1, 1], [], []>} : vector<1x120xf32>, vector<120x84xf32>, vector<1x84xf32> -> vector<1x84xf32>
    %c0_148 = arith.constant 0 : index
    %c0_149 = arith.constant 0 : index
    %220 = vector.load %arg10[%c0_148, %c0_149] : memref<1x84xf32, #tpu.memory_space<vmem>>, vector<1x84xf32>
    %221 = arith.addf %219, %220 : vector<1x84xf32>
    %cst_150 = arith.constant 0.000000e+00 : f32
    %222 = vector.broadcast %cst_150 : f32 to vector<1x84xf32>
    %223 = arith.maximumf %221, %222 : vector<1x84xf32>
    %c0_151 = arith.constant 0 : index
    %c0_152 = arith.constant 0 : index
    %224 = vector.load %arg11[%c0_151, %c0_152] : memref<84x10xf32, #tpu.memory_space<vmem>>, vector<84x10xf32>
    %cst_153 = arith.constant dense<0.000000e+00> : vector<1x10xf32>
    %225 = tpu.matmul %223, %224, %cst_153 {dimension_numbers = #tpu.dot_dimension_numbers<[1], [0], [0], [1], [0, 0, 1, 1], [], []>} : vector<1x84xf32>, vector<84x10xf32>, vector<1x10xf32> -> vector<1x10xf32>
    %c0_154 = arith.constant 0 : index
    %c0_155 = arith.constant 0 : index
    %226 = vector.load %arg12[%c0_154, %c0_155] : memref<1x10xf32, #tpu.memory_space<vmem>>, vector<1x10xf32>
    %227 = arith.addf %225, %226 : vector<1x10xf32>
    %c0_156 = arith.constant 0 : index
    %c0_157 = arith.constant 0 : index
    %228 = vector.load %arg13[%c0_156, %c0_157] : memref<2x10xf32, #tpu.memory_space<vmem>>, vector<1x10xf32>
    tpu.vector_store %arg13[%c0_156, %c0_157], %227 {strides = array<i32>} : memref<2x10xf32, #tpu.memory_space<vmem>>, vector<1x10xf32>,
    %c1_158 = arith.constant 1 : index
    %c0_159 = arith.constant 0 : index
    %229 = vector.load %arg0[%c1_158, %c0_159] : memref<2x784xf32, #tpu.memory_space<vmem>>, vector<1x784xf32>
    %230 = vector.extract_strided_slice %229 {offsets = [0, 0], sizes = [1, 668], strides = [1, 1]} : vector<1x784xf32> to vector<1x668xf32>
    %c0_160 = arith.constant 0 : index
    %c0_161 = arith.constant 0 : index
    %231 = vector.load %arg14[%c0_160, %c0_161] : memref<25x668xf32, #tpu.memory_space<vmem>>, vector<1x668xf32>
    tpu.vector_store %arg14[%c0_160, %c0_161], %230 {strides = array<i32>} : memref<25x668xf32, #tpu.memory_space<vmem>>, vector<1x668xf32>,
    %232 = vector.extract_strided_slice %229 {offsets = [0, 1], sizes = [1, 668], strides = [1, 1]} : vector<1x784xf32> to vector<1x668xf32>
    %c1_162 = arith.constant 1 : index
    %c0_163 = arith.constant 0 : index
    %233 = vector.load %arg14[%c1_162, %c0_163] : memref<25x668xf32, #tpu.memory_space<vmem>>, vector<1x668xf32>
    tpu.vector_store %arg14[%c1_162, %c0_163], %232 {strides = array<i32>} : memref<25x668xf32, #tpu.memory_space<vmem>>, vector<1x668xf32>,
    %234 = vector.extract_strided_slice %229 {offsets = [0, 2], sizes = [1, 668], strides = [1, 1]} : vector<1x784xf32> to vector<1x668xf32>
    %c2_164 = arith.constant 2 : index
    %c0_165 = arith.constant 0 : index
    %235 = vector.load %arg14[%c2_164, %c0_165] : memref<25x668xf32, #tpu.memory_space<vmem>>, vector<1x668xf32>
    tpu.vector_store %arg14[%c2_164, %c0_165], %234 {strides = array<i32>} : memref<25x668xf32, #tpu.memory_space<vmem>>, vector<1x668xf32>,
    %236 = vector.extract_strided_slice %229 {offsets = [0, 3], sizes = [1, 668], strides = [1, 1]} : vector<1x784xf32> to vector<1x668xf32>
    %c3_166 = arith.constant 3 : index
    %c0_167 = arith.constant 0 : index
    %237 = vector.load %arg14[%c3_166, %c0_167] : memref<25x668xf32, #tpu.memory_space<vmem>>, vector<1x668xf32>
    tpu.vector_store %arg14[%c3_166, %c0_167], %236 {strides = array<i32>} : memref<25x668xf32, #tpu.memory_space<vmem>>, vector<1x668xf32>,
    %238 = vector.extract_strided_slice %229 {offsets = [0, 4], sizes = [1, 668], strides = [1, 1]} : vector<1x784xf32> to vector<1x668xf32>
    %c4_168 = arith.constant 4 : index
    %c0_169 = arith.constant 0 : index
    %239 = vector.load %arg14[%c4_168, %c0_169] : memref<25x668xf32, #tpu.memory_space<vmem>>, vector<1x668xf32>
    tpu.vector_store %arg14[%c4_168, %c0_169], %238 {strides = array<i32>} : memref<25x668xf32, #tpu.memory_space<vmem>>, vector<1x668xf32>,
    %240 = vector.extract_strided_slice %229 {offsets = [0, 28], sizes = [1, 668], strides = [1, 1]} : vector<1x784xf32> to vector<1x668xf32>
    %c5_170 = arith.constant 5 : index
    %c0_171 = arith.constant 0 : index
    %241 = vector.load %arg14[%c5_170, %c0_171] : memref<25x668xf32, #tpu.memory_space<vmem>>, vector<1x668xf32>
    tpu.vector_store %arg14[%c5_170, %c0_171], %240 {strides = array<i32>} : memref<25x668xf32, #tpu.memory_space<vmem>>, vector<1x668xf32>,
    %242 = vector.extract_strided_slice %229 {offsets = [0, 29], sizes = [1, 668], strides = [1, 1]} : vector<1x784xf32> to vector<1x668xf32>
    %c6_172 = arith.constant 6 : index
    %c0_173 = arith.constant 0 : index
    %243 = vector.load %arg14[%c6_172, %c0_173] : memref<25x668xf32, #tpu.memory_space<vmem>>, vector<1x668xf32>
    tpu.vector_store %arg14[%c6_172, %c0_173], %242 {strides = array<i32>} : memref<25x668xf32, #tpu.memory_space<vmem>>, vector<1x668xf32>,
    %244 = vector.extract_strided_slice %229 {offsets = [0, 30], sizes = [1, 668], strides = [1, 1]} : vector<1x784xf32> to vector<1x668xf32>
    %c7_174 = arith.constant 7 : index
    %c0_175 = arith.constant 0 : index
    %245 = vector.load %arg14[%c7_174, %c0_175] : memref<25x668xf32, #tpu.memory_space<vmem>>, vector<1x668xf32>
    tpu.vector_store %arg14[%c7_174, %c0_175], %244 {strides = array<i32>} : memref<25x668xf32, #tpu.memory_space<vmem>>, vector<1x668xf32>,
    %246 = vector.extract_strided_slice %229 {offsets = [0, 31], sizes = [1, 668], strides = [1, 1]} : vector<1x784xf32> to vector<1x668xf32>
    %c8_176 = arith.constant 8 : index
    %c0_177 = arith.constant 0 : index
    %247 = vector.load %arg14[%c8_176, %c0_177] : memref<25x668xf32, #tpu.memory_space<vmem>>, vector<1x668xf32>
    tpu.vector_store %arg14[%c8_176, %c0_177], %246 {strides = array<i32>} : memref<25x668xf32, #tpu.memory_space<vmem>>, vector<1x668xf32>,
    %248 = vector.extract_strided_slice %229 {offsets = [0, 32], sizes = [1, 668], strides = [1, 1]} : vector<1x784xf32> to vector<1x668xf32>
    %c9_178 = arith.constant 9 : index
    %c0_179 = arith.constant 0 : index
    %249 = vector.load %arg14[%c9_178, %c0_179] : memref<25x668xf32, #tpu.memory_space<vmem>>, vector<1x668xf32>
    tpu.vector_store %arg14[%c9_178, %c0_179], %248 {strides = array<i32>} : memref<25x668xf32, #tpu.memory_space<vmem>>, vector<1x668xf32>,
    %250 = vector.extract_strided_slice %229 {offsets = [0, 56], sizes = [1, 668], strides = [1, 1]} : vector<1x784xf32> to vector<1x668xf32>
    %c10_180 = arith.constant 10 : index
    %c0_181 = arith.constant 0 : index
    %251 = vector.load %arg14[%c10_180, %c0_181] : memref<25x668xf32, #tpu.memory_space<vmem>>, vector<1x668xf32>
    tpu.vector_store %arg14[%c10_180, %c0_181], %250 {strides = array<i32>} : memref<25x668xf32, #tpu.memory_space<vmem>>, vector<1x668xf32>,
    %252 = vector.extract_strided_slice %229 {offsets = [0, 57], sizes = [1, 668], strides = [1, 1]} : vector<1x784xf32> to vector<1x668xf32>
    %c11_182 = arith.constant 11 : index
    %c0_183 = arith.constant 0 : index
    %253 = vector.load %arg14[%c11_182, %c0_183] : memref<25x668xf32, #tpu.memory_space<vmem>>, vector<1x668xf32>
    tpu.vector_store %arg14[%c11_182, %c0_183], %252 {strides = array<i32>} : memref<25x668xf32, #tpu.memory_space<vmem>>, vector<1x668xf32>,
    %254 = vector.extract_strided_slice %229 {offsets = [0, 58], sizes = [1, 668], strides = [1, 1]} : vector<1x784xf32> to vector<1x668xf32>
    %c12_184 = arith.constant 12 : index
    %c0_185 = arith.constant 0 : index
    %255 = vector.load %arg14[%c12_184, %c0_185] : memref<25x668xf32, #tpu.memory_space<vmem>>, vector<1x668xf32>
    tpu.vector_store %arg14[%c12_184, %c0_185], %254 {strides = array<i32>} : memref<25x668xf32, #tpu.memory_space<vmem>>, vector<1x668xf32>,
    %256 = vector.extract_strided_slice %229 {offsets = [0, 59], sizes = [1, 668], strides = [1, 1]} : vector<1x784xf32> to vector<1x668xf32>
    %c13_186 = arith.constant 13 : index
    %c0_187 = arith.constant 0 : index
    %257 = vector.load %arg14[%c13_186, %c0_187] : memref<25x668xf32, #tpu.memory_space<vmem>>, vector<1x668xf32>
    tpu.vector_store %arg14[%c13_186, %c0_187], %256 {strides = array<i32>} : memref<25x668xf32, #tpu.memory_space<vmem>>, vector<1x668xf32>,
    %258 = vector.extract_strided_slice %229 {offsets = [0, 60], sizes = [1, 668], strides = [1, 1]} : vector<1x784xf32> to vector<1x668xf32>
    %c14_188 = arith.constant 14 : index
    %c0_189 = arith.constant 0 : index
    %259 = vector.load %arg14[%c14_188, %c0_189] : memref<25x668xf32, #tpu.memory_space<vmem>>, vector<1x668xf32>
    tpu.vector_store %arg14[%c14_188, %c0_189], %258 {strides = array<i32>} : memref<25x668xf32, #tpu.memory_space<vmem>>, vector<1x668xf32>,
    %260 = vector.extract_strided_slice %229 {offsets = [0, 84], sizes = [1, 668], strides = [1, 1]} : vector<1x784xf32> to vector<1x668xf32>
    %c15_190 = arith.constant 15 : index
    %c0_191 = arith.constant 0 : index
    %261 = vector.load %arg14[%c15_190, %c0_191] : memref<25x668xf32, #tpu.memory_space<vmem>>, vector<1x668xf32>
    tpu.vector_store %arg14[%c15_190, %c0_191], %260 {strides = array<i32>} : memref<25x668xf32, #tpu.memory_space<vmem>>, vector<1x668xf32>,
    %262 = vector.extract_strided_slice %229 {offsets = [0, 85], sizes = [1, 668], strides = [1, 1]} : vector<1x784xf32> to vector<1x668xf32>
    %c16_192 = arith.constant 16 : index
    %c0_193 = arith.constant 0 : index
    %263 = vector.load %arg14[%c16_192, %c0_193] : memref<25x668xf32, #tpu.memory_space<vmem>>, vector<1x668xf32>
    tpu.vector_store %arg14[%c16_192, %c0_193], %262 {strides = array<i32>} : memref<25x668xf32, #tpu.memory_space<vmem>>, vector<1x668xf32>,
    %264 = vector.extract_strided_slice %229 {offsets = [0, 86], sizes = [1, 668], strides = [1, 1]} : vector<1x784xf32> to vector<1x668xf32>
    %c17_194 = arith.constant 17 : index
    %c0_195 = arith.constant 0 : index
    %265 = vector.load %arg14[%c17_194, %c0_195] : memref<25x668xf32, #tpu.memory_space<vmem>>, vector<1x668xf32>
    tpu.vector_store %arg14[%c17_194, %c0_195], %264 {strides = array<i32>} : memref<25x668xf32, #tpu.memory_space<vmem>>, vector<1x668xf32>,
    %266 = vector.extract_strided_slice %229 {offsets = [0, 87], sizes = [1, 668], strides = [1, 1]} : vector<1x784xf32> to vector<1x668xf32>
    %c18_196 = arith.constant 18 : index
    %c0_197 = arith.constant 0 : index
    %267 = vector.load %arg14[%c18_196, %c0_197] : memref<25x668xf32, #tpu.memory_space<vmem>>, vector<1x668xf32>
    tpu.vector_store %arg14[%c18_196, %c0_197], %266 {strides = array<i32>} : memref<25x668xf32, #tpu.memory_space<vmem>>, vector<1x668xf32>,
    %268 = vector.extract_strided_slice %229 {offsets = [0, 88], sizes = [1, 668], strides = [1, 1]} : vector<1x784xf32> to vector<1x668xf32>
    %c19_198 = arith.constant 19 : index
    %c0_199 = arith.constant 0 : index
    %269 = vector.load %arg14[%c19_198, %c0_199] : memref<25x668xf32, #tpu.memory_space<vmem>>, vector<1x668xf32>
    tpu.vector_store %arg14[%c19_198, %c0_199], %268 {strides = array<i32>} : memref<25x668xf32, #tpu.memory_space<vmem>>, vector<1x668xf32>,
    %270 = vector.extract_strided_slice %229 {offsets = [0, 112], sizes = [1, 668], strides = [1, 1]} : vector<1x784xf32> to vector<1x668xf32>
    %c20_200 = arith.constant 20 : index
    %c0_201 = arith.constant 0 : index
    %271 = vector.load %arg14[%c20_200, %c0_201] : memref<25x668xf32, #tpu.memory_space<vmem>>, vector<1x668xf32>
    tpu.vector_store %arg14[%c20_200, %c0_201], %270 {strides = array<i32>} : memref<25x668xf32, #tpu.memory_space<vmem>>, vector<1x668xf32>,
    %272 = vector.extract_strided_slice %229 {offsets = [0, 113], sizes = [1, 668], strides = [1, 1]} : vector<1x784xf32> to vector<1x668xf32>
    %c21_202 = arith.constant 21 : index
    %c0_203 = arith.constant 0 : index
    %273 = vector.load %arg14[%c21_202, %c0_203] : memref<25x668xf32, #tpu.memory_space<vmem>>, vector<1x668xf32>
    tpu.vector_store %arg14[%c21_202, %c0_203], %272 {strides = array<i32>} : memref<25x668xf32, #tpu.memory_space<vmem>>, vector<1x668xf32>,
    %274 = vector.extract_strided_slice %229 {offsets = [0, 114], sizes = [1, 668], strides = [1, 1]} : vector<1x784xf32> to vector<1x668xf32>
    %c22_204 = arith.constant 22 : index
    %c0_205 = arith.constant 0 : index
    %275 = vector.load %arg14[%c22_204, %c0_205] : memref<25x668xf32, #tpu.memory_space<vmem>>, vector<1x668xf32>
    tpu.vector_store %arg14[%c22_204, %c0_205], %274 {strides = array<i32>} : memref<25x668xf32, #tpu.memory_space<vmem>>, vector<1x668xf32>,
    %276 = vector.extract_strided_slice %229 {offsets = [0, 115], sizes = [1, 668], strides = [1, 1]} : vector<1x784xf32> to vector<1x668xf32>
    %c23_206 = arith.constant 23 : index
    %c0_207 = arith.constant 0 : index
    %277 = vector.load %arg14[%c23_206, %c0_207] : memref<25x668xf32, #tpu.memory_space<vmem>>, vector<1x668xf32>
    tpu.vector_store %arg14[%c23_206, %c0_207], %276 {strides = array<i32>} : memref<25x668xf32, #tpu.memory_space<vmem>>, vector<1x668xf32>,
    %278 = vector.extract_strided_slice %229 {offsets = [0, 116], sizes = [1, 668], strides = [1, 1]} : vector<1x784xf32> to vector<1x668xf32>
    %c24_208 = arith.constant 24 : index
    %c0_209 = arith.constant 0 : index
    %279 = vector.load %arg14[%c24_208, %c0_209] : memref<25x668xf32, #tpu.memory_space<vmem>>, vector<1x668xf32>
    tpu.vector_store %arg14[%c24_208, %c0_209], %278 {strides = array<i32>} : memref<25x668xf32, #tpu.memory_space<vmem>>, vector<1x668xf32>,
    %c0_210 = arith.constant 0 : index
    %c0_211 = arith.constant 0 : index
    %280 = vector.load %arg1[%c0_210, %c0_211] : memref<6x25xf32, #tpu.memory_space<vmem>>, vector<6x25xf32>
    %c0_212 = arith.constant 0 : index
    %c0_213 = arith.constant 0 : index
    %281 = vector.load %arg14[%c0_212, %c0_213] : memref<25x668xf32, #tpu.memory_space<vmem>>, vector<25x668xf32>
    %cst_214 = arith.constant dense<0.000000e+00> : vector<6x668xf32>
    %282 = tpu.matmul %280, %281, %cst_214 {dimension_numbers = #tpu.dot_dimension_numbers<[1], [0], [0], [1], [0, 0, 1, 1], [], []>} : vector<6x25xf32>, vector<25x668xf32>, vector<6x668xf32> -> vector<6x668xf32>
    %c0_215 = arith.constant 0 : index
    %c0_216 = arith.constant 0 : index
    %283 = vector.load %arg2[%c0_215, %c0_216] : memref<6x1xf32, #tpu.memory_space<vmem>>, vector<6x1xf32>
    %284 = vector.broadcast %283 : vector<6x1xf32> to vector<6x668xf32>
    %285 = arith.addf %282, %284 : vector<6x668xf32>
    %cst_217 = arith.constant 0.000000e+00 : f32
    %286 = vector.broadcast %cst_217 : f32 to vector<6x668xf32>
    %287 = arith.maximumf %285, %286 : vector<6x668xf32>
    %288 = vector.extract_strided_slice %287 {offsets = [0, 0], sizes = [6, 639], strides = [1, 1]} : vector<6x668xf32> to vector<6x639xf32>
    %289 = vector.extract_strided_slice %287 {offsets = [0, 1], sizes = [6, 639], strides = [1, 1]} : vector<6x668xf32> to vector<6x639xf32>
    %290 = arith.maximumf %288, %289 : vector<6x639xf32>
    %291 = vector.extract_strided_slice %287 {offsets = [0, 28], sizes = [6, 639], strides = [1, 1]} : vector<6x668xf32> to vector<6x639xf32>
    %292 = vector.extract_strided_slice %287 {offsets = [0, 29], sizes = [6, 639], strides = [1, 1]} : vector<6x668xf32> to vector<6x639xf32>
    %293 = arith.maximumf %291, %292 : vector<6x639xf32>
    %294 = arith.maximumf %290, %293 : vector<6x639xf32>
    %c0_218 = arith.constant 0 : index
    %c0_219 = arith.constant 0 : index
    %295 = vector.load %arg3[%c0_218, %c0_219] : memref<639x144xf32, #tpu.memory_space<vmem>>, vector<639x144xf32>
    %cst_220 = arith.constant dense<0.000000e+00> : vector<6x144xf32>
    %296 = tpu.matmul %294, %295, %cst_220 {dimension_numbers = #tpu.dot_dimension_numbers<[1], [0], [0], [1], [0, 0, 1, 1], [], []>} : vector<6x639xf32>, vector<639x144xf32>, vector<6x144xf32> -> vector<6x144xf32>
    %297 = vector.extract_strided_slice %296 {offsets = [0, 0], sizes = [6, 92], strides = [1, 1]} : vector<6x144xf32> to vector<6x92xf32>
    %c0_221 = arith.constant 0 : index
    %c0_222 = arith.constant 0 : index
    %298 = vector.load %arg15[%c0_221, %c0_222] : memref<150x92xf32, #tpu.memory_space<vmem>>, vector<6x92xf32>
    tpu.vector_store %arg15[%c0_221, %c0_222], %297 {strides = array<i32>} : memref<150x92xf32, #tpu.memory_space<vmem>>, vector<6x92xf32>,
    %299 = vector.extract_strided_slice %296 {offsets = [0, 1], sizes = [6, 92], strides = [1, 1]} : vector<6x144xf32> to vector<6x92xf32>
    %c6_223 = arith.constant 6 : index
    %c0_224 = arith.constant 0 : index
    %300 = vector.load %arg15[%c6_223, %c0_224] : memref<150x92xf32, #tpu.memory_space<vmem>>, vector<6x92xf32>
    tpu.vector_store %arg15[%c6_223, %c0_224], %299 {strides = array<i32>} : memref<150x92xf32, #tpu.memory_space<vmem>>, vector<6x92xf32>,
    %301 = vector.extract_strided_slice %296 {offsets = [0, 2], sizes = [6, 92], strides = [1, 1]} : vector<6x144xf32> to vector<6x92xf32>
    %c12_225 = arith.constant 12 : index
    %c0_226 = arith.constant 0 : index
    %302 = vector.load %arg15[%c12_225, %c0_226] : memref<150x92xf32, #tpu.memory_space<vmem>>, vector<6x92xf32>
    tpu.vector_store %arg15[%c12_225, %c0_226], %301 {strides = array<i32>} : memref<150x92xf32, #tpu.memory_space<vmem>>, vector<6x92xf32>,
    %303 = vector.extract_strided_slice %296 {offsets = [0, 3], sizes = [6, 92], strides = [1, 1]} : vector<6x144xf32> to vector<6x92xf32>
    %c18_227 = arith.constant 18 : index
    %c0_228 = arith.constant 0 : index
    %304 = vector.load %arg15[%c18_227, %c0_228] : memref<150x92xf32, #tpu.memory_space<vmem>>, vector<6x92xf32>
    tpu.vector_store %arg15[%c18_227, %c0_228], %303 {strides = array<i32>} : memref<150x92xf32, #tpu.memory_space<vmem>>, vector<6x92xf32>,
    %305 = vector.extract_strided_slice %296 {offsets = [0, 4], sizes = [6, 92], strides = [1, 1]} : vector<6x144xf32> to vector<6x92xf32>
    %c24_229 = arith.constant 24 : index
    %c0_230 = arith.constant 0 : index
    %306 = vector.load %arg15[%c24_229, %c0_230] : memref<150x92xf32, #tpu.memory_space<vmem>>, vector<6x92xf32>
    tpu.vector_store %arg15[%c24_229, %c0_230], %305 {strides = array<i32>} : memref<150x92xf32, #tpu.memory_space<vmem>>, vector<6x92xf32>,
    %307 = vector.extract_strided_slice %296 {offsets = [0, 12], sizes = [6, 92], strides = [1, 1]} : vector<6x144xf32> to vector<6x92xf32>
    %c30_231 = arith.constant 30 : index
    %c0_232 = arith.constant 0 : index
    %308 = vector.load %arg15[%c30_231, %c0_232] : memref<150x92xf32, #tpu.memory_space<vmem>>, vector<6x92xf32>
    tpu.vector_store %arg15[%c30_231, %c0_232], %307 {strides = array<i32>} : memref<150x92xf32, #tpu.memory_space<vmem>>, vector<6x92xf32>,
    %309 = vector.extract_strided_slice %296 {offsets = [0, 13], sizes = [6, 92], strides = [1, 1]} : vector<6x144xf32> to vector<6x92xf32>
    %c36_233 = arith.constant 36 : index
    %c0_234 = arith.constant 0 : index
    %310 = vector.load %arg15[%c36_233, %c0_234] : memref<150x92xf32, #tpu.memory_space<vmem>>, vector<6x92xf32>
    tpu.vector_store %arg15[%c36_233, %c0_234], %309 {strides = array<i32>} : memref<150x92xf32, #tpu.memory_space<vmem>>, vector<6x92xf32>,
    %311 = vector.extract_strided_slice %296 {offsets = [0, 14], sizes = [6, 92], strides = [1, 1]} : vector<6x144xf32> to vector<6x92xf32>
    %c42_235 = arith.constant 42 : index
    %c0_236 = arith.constant 0 : index
    %312 = vector.load %arg15[%c42_235, %c0_236] : memref<150x92xf32, #tpu.memory_space<vmem>>, vector<6x92xf32>
    tpu.vector_store %arg15[%c42_235, %c0_236], %311 {strides = array<i32>} : memref<150x92xf32, #tpu.memory_space<vmem>>, vector<6x92xf32>,
    %313 = vector.extract_strided_slice %296 {offsets = [0, 15], sizes = [6, 92], strides = [1, 1]} : vector<6x144xf32> to vector<6x92xf32>
    %c48_237 = arith.constant 48 : index
    %c0_238 = arith.constant 0 : index
    %314 = vector.load %arg15[%c48_237, %c0_238] : memref<150x92xf32, #tpu.memory_space<vmem>>, vector<6x92xf32>
    tpu.vector_store %arg15[%c48_237, %c0_238], %313 {strides = array<i32>} : memref<150x92xf32, #tpu.memory_space<vmem>>, vector<6x92xf32>,
    %315 = vector.extract_strided_slice %296 {offsets = [0, 16], sizes = [6, 92], strides = [1, 1]} : vector<6x144xf32> to vector<6x92xf32>
    %c54_239 = arith.constant 54 : index
    %c0_240 = arith.constant 0 : index
    %316 = vector.load %arg15[%c54_239, %c0_240] : memref<150x92xf32, #tpu.memory_space<vmem>>, vector<6x92xf32>
    tpu.vector_store %arg15[%c54_239, %c0_240], %315 {strides = array<i32>} : memref<150x92xf32, #tpu.memory_space<vmem>>, vector<6x92xf32>,
    %317 = vector.extract_strided_slice %296 {offsets = [0, 24], sizes = [6, 92], strides = [1, 1]} : vector<6x144xf32> to vector<6x92xf32>
    %c60_241 = arith.constant 60 : index
    %c0_242 = arith.constant 0 : index
    %318 = vector.load %arg15[%c60_241, %c0_242] : memref<150x92xf32, #tpu.memory_space<vmem>>, vector<6x92xf32>
    tpu.vector_store %arg15[%c60_241, %c0_242], %317 {strides = array<i32>} : memref<150x92xf32, #tpu.memory_space<vmem>>, vector<6x92xf32>,
    %319 = vector.extract_strided_slice %296 {offsets = [0, 25], sizes = [6, 92], strides = [1, 1]} : vector<6x144xf32> to vector<6x92xf32>
    %c66_243 = arith.constant 66 : index
    %c0_244 = arith.constant 0 : index
    %320 = vector.load %arg15[%c66_243, %c0_244] : memref<150x92xf32, #tpu.memory_space<vmem>>, vector<6x92xf32>
    tpu.vector_store %arg15[%c66_243, %c0_244], %319 {strides = array<i32>} : memref<150x92xf32, #tpu.memory_space<vmem>>, vector<6x92xf32>,
    %321 = vector.extract_strided_slice %296 {offsets = [0, 26], sizes = [6, 92], strides = [1, 1]} : vector<6x144xf32> to vector<6x92xf32>
    %c72_245 = arith.constant 72 : index
    %c0_246 = arith.constant 0 : index
    %322 = vector.load %arg15[%c72_245, %c0_246] : memref<150x92xf32, #tpu.memory_space<vmem>>, vector<6x92xf32>
    tpu.vector_store %arg15[%c72_245, %c0_246], %321 {strides = array<i32>} : memref<150x92xf32, #tpu.memory_space<vmem>>, vector<6x92xf32>,
    %323 = vector.extract_strided_slice %296 {offsets = [0, 27], sizes = [6, 92], strides = [1, 1]} : vector<6x144xf32> to vector<6x92xf32>
    %c78_247 = arith.constant 78 : index
    %c0_248 = arith.constant 0 : index
    %324 = vector.load %arg15[%c78_247, %c0_248] : memref<150x92xf32, #tpu.memory_space<vmem>>, vector<6x92xf32>
    tpu.vector_store %arg15[%c78_247, %c0_248], %323 {strides = array<i32>} : memref<150x92xf32, #tpu.memory_space<vmem>>, vector<6x92xf32>,
    %325 = vector.extract_strided_slice %296 {offsets = [0, 28], sizes = [6, 92], strides = [1, 1]} : vector<6x144xf32> to vector<6x92xf32>
    %c84_249 = arith.constant 84 : index
    %c0_250 = arith.constant 0 : index
    %326 = vector.load %arg15[%c84_249, %c0_250] : memref<150x92xf32, #tpu.memory_space<vmem>>, vector<6x92xf32>
    tpu.vector_store %arg15[%c84_249, %c0_250], %325 {strides = array<i32>} : memref<150x92xf32, #tpu.memory_space<vmem>>, vector<6x92xf32>,
    %327 = vector.extract_strided_slice %296 {offsets = [0, 36], sizes = [6, 92], strides = [1, 1]} : vector<6x144xf32> to vector<6x92xf32>
    %c90_251 = arith.constant 90 : index
    %c0_252 = arith.constant 0 : index
    %328 = vector.load %arg15[%c90_251, %c0_252] : memref<150x92xf32, #tpu.memory_space<vmem>>, vector<6x92xf32>
    tpu.vector_store %arg15[%c90_251, %c0_252], %327 {strides = array<i32>} : memref<150x92xf32, #tpu.memory_space<vmem>>, vector<6x92xf32>,
    %329 = vector.extract_strided_slice %296 {offsets = [0, 37], sizes = [6, 92], strides = [1, 1]} : vector<6x144xf32> to vector<6x92xf32>
    %c96_253 = arith.constant 96 : index
    %c0_254 = arith.constant 0 : index
    %330 = vector.load %arg15[%c96_253, %c0_254] : memref<150x92xf32, #tpu.memory_space<vmem>>, vector<6x92xf32>
    tpu.vector_store %arg15[%c96_253, %c0_254], %329 {strides = array<i32>} : memref<150x92xf32, #tpu.memory_space<vmem>>, vector<6x92xf32>,
    %331 = vector.extract_strided_slice %296 {offsets = [0, 38], sizes = [6, 92], strides = [1, 1]} : vector<6x144xf32> to vector<6x92xf32>
    %c102_255 = arith.constant 102 : index
    %c0_256 = arith.constant 0 : index
    %332 = vector.load %arg15[%c102_255, %c0_256] : memref<150x92xf32, #tpu.memory_space<vmem>>, vector<6x92xf32>
    tpu.vector_store %arg15[%c102_255, %c0_256], %331 {strides = array<i32>} : memref<150x92xf32, #tpu.memory_space<vmem>>, vector<6x92xf32>,
    %333 = vector.extract_strided_slice %296 {offsets = [0, 39], sizes = [6, 92], strides = [1, 1]} : vector<6x144xf32> to vector<6x92xf32>
    %c108_257 = arith.constant 108 : index
    %c0_258 = arith.constant 0 : index
    %334 = vector.load %arg15[%c108_257, %c0_258] : memref<150x92xf32, #tpu.memory_space<vmem>>, vector<6x92xf32>
    tpu.vector_store %arg15[%c108_257, %c0_258], %333 {strides = array<i32>} : memref<150x92xf32, #tpu.memory_space<vmem>>, vector<6x92xf32>,
    %335 = vector.extract_strided_slice %296 {offsets = [0, 40], sizes = [6, 92], strides = [1, 1]} : vector<6x144xf32> to vector<6x92xf32>
    %c114_259 = arith.constant 114 : index
    %c0_260 = arith.constant 0 : index
    %336 = vector.load %arg15[%c114_259, %c0_260] : memref<150x92xf32, #tpu.memory_space<vmem>>, vector<6x92xf32>
    tpu.vector_store %arg15[%c114_259, %c0_260], %335 {strides = array<i32>} : memref<150x92xf32, #tpu.memory_space<vmem>>, vector<6x92xf32>,
    %337 = vector.extract_strided_slice %296 {offsets = [0, 48], sizes = [6, 92], strides = [1, 1]} : vector<6x144xf32> to vector<6x92xf32>
    %c120_261 = arith.constant 120 : index
    %c0_262 = arith.constant 0 : index
    %338 = vector.load %arg15[%c120_261, %c0_262] : memref<150x92xf32, #tpu.memory_space<vmem>>, vector<6x92xf32>
    tpu.vector_store %arg15[%c120_261, %c0_262], %337 {strides = array<i32>} : memref<150x92xf32, #tpu.memory_space<vmem>>, vector<6x92xf32>,
    %339 = vector.extract_strided_slice %296 {offsets = [0, 49], sizes = [6, 92], strides = [1, 1]} : vector<6x144xf32> to vector<6x92xf32>
    %c126_263 = arith.constant 126 : index
    %c0_264 = arith.constant 0 : index
    %340 = vector.load %arg15[%c126_263, %c0_264] : memref<150x92xf32, #tpu.memory_space<vmem>>, vector<6x92xf32>
    tpu.vector_store %arg15[%c126_263, %c0_264], %339 {strides = array<i32>} : memref<150x92xf32, #tpu.memory_space<vmem>>, vector<6x92xf32>,
    %341 = vector.extract_strided_slice %296 {offsets = [0, 50], sizes = [6, 92], strides = [1, 1]} : vector<6x144xf32> to vector<6x92xf32>
    %c132_265 = arith.constant 132 : index
    %c0_266 = arith.constant 0 : index
    %342 = vector.load %arg15[%c132_265, %c0_266] : memref<150x92xf32, #tpu.memory_space<vmem>>, vector<6x92xf32>
    tpu.vector_store %arg15[%c132_265, %c0_266], %341 {strides = array<i32>} : memref<150x92xf32, #tpu.memory_space<vmem>>, vector<6x92xf32>,
    %343 = vector.extract_strided_slice %296 {offsets = [0, 51], sizes = [6, 92], strides = [1, 1]} : vector<6x144xf32> to vector<6x92xf32>
    %c138_267 = arith.constant 138 : index
    %c0_268 = arith.constant 0 : index
    %344 = vector.load %arg15[%c138_267, %c0_268] : memref<150x92xf32, #tpu.memory_space<vmem>>, vector<6x92xf32>
    tpu.vector_store %arg15[%c138_267, %c0_268], %343 {strides = array<i32>} : memref<150x92xf32, #tpu.memory_space<vmem>>, vector<6x92xf32>,
    %345 = vector.extract_strided_slice %296 {offsets = [0, 52], sizes = [6, 92], strides = [1, 1]} : vector<6x144xf32> to vector<6x92xf32>
    %c144_269 = arith.constant 144 : index
    %c0_270 = arith.constant 0 : index
    %346 = vector.load %arg15[%c144_269, %c0_270] : memref<150x92xf32, #tpu.memory_space<vmem>>, vector<6x92xf32>
    tpu.vector_store %arg15[%c144_269, %c0_270], %345 {strides = array<i32>} : memref<150x92xf32, #tpu.memory_space<vmem>>, vector<6x92xf32>,
    %c0_271 = arith.constant 0 : index
    %c0_272 = arith.constant 0 : index
    %347 = vector.load %arg4[%c0_271, %c0_272] : memref<16x150xf32, #tpu.memory_space<vmem>>, vector<16x150xf32>
    %c0_273 = arith.constant 0 : index
    %c0_274 = arith.constant 0 : index
    %348 = vector.load %arg15[%c0_273, %c0_274] : memref<150x92xf32, #tpu.memory_space<vmem>>, vector<150x92xf32>
    %cst_275 = arith.constant dense<0.000000e+00> : vector<16x92xf32>
    %349 = tpu.matmul %347, %348, %cst_275 {dimension_numbers = #tpu.dot_dimension_numbers<[1], [0], [0], [1], [0, 0, 1, 1], [], []>} : vector<16x150xf32>, vector<150x92xf32>, vector<16x92xf32> -> vector<16x92xf32>
    %c0_276 = arith.constant 0 : index
    %c0_277 = arith.constant 0 : index
    %350 = vector.load %arg5[%c0_276, %c0_277] : memref<16x1xf32, #tpu.memory_space<vmem>>, vector<16x1xf32>
    %351 = vector.broadcast %350 : vector<16x1xf32> to vector<16x92xf32>
    %352 = arith.addf %349, %351 : vector<16x92xf32>
    %cst_278 = arith.constant 0.000000e+00 : f32
    %353 = vector.broadcast %cst_278 : f32 to vector<16x92xf32>
    %354 = arith.maximumf %352, %353 : vector<16x92xf32>
    %355 = vector.extract_strided_slice %354 {offsets = [0, 0], sizes = [16, 79], strides = [1, 1]} : vector<16x92xf32> to vector<16x79xf32>
    %356 = vector.extract_strided_slice %354 {offsets = [0, 1], sizes = [16, 79], strides = [1, 1]} : vector<16x92xf32> to vector<16x79xf32>
    %357 = arith.maximumf %355, %356 : vector<16x79xf32>
    %358 = vector.extract_strided_slice %354 {offsets = [0, 12], sizes = [16, 79], strides = [1, 1]} : vector<16x92xf32> to vector<16x79xf32>
    %359 = vector.extract_strided_slice %354 {offsets = [0, 13], sizes = [16, 79], strides = [1, 1]} : vector<16x92xf32> to vector<16x79xf32>
    %360 = arith.maximumf %358, %359 : vector<16x79xf32>
    %361 = arith.maximumf %357, %360 : vector<16x79xf32>
    %c0_279 = arith.constant 0 : index
    %c0_280 = arith.constant 0 : index
    %362 = vector.load %arg6[%c0_279, %c0_280] : memref<79x16xf32, #tpu.memory_space<vmem>>, vector<79x16xf32>
    %cst_281 = arith.constant dense<0.000000e+00> : vector<16x16xf32>
    %363 = tpu.matmul %361, %362, %cst_281 {dimension_numbers = #tpu.dot_dimension_numbers<[1], [0], [0], [1], [0, 0, 1, 1], [], []>} : vector<16x79xf32>, vector<79x16xf32>, vector<16x16xf32> -> vector<16x16xf32>
    %c0_282 = arith.constant 0 : index
    %c0_283 = arith.constant 0 : index
    %364 = vector.load %arg8[%c0_282, %c0_283] : memref<1x120xf32, #tpu.memory_space<vmem>>, vector<1x120xf32>
    %365 = vector.extract_strided_slice %363 {offsets = [0, 0], sizes = [1, 16], strides = [1, 1]} : vector<16x16xf32> to vector<1x16xf32>
    %c0_284 = arith.constant 0 : index
    %c0_285 = arith.constant 0 : index
    %c0_286 = arith.constant 0 : index
    %366 = vector.load %arg7[%c0_284, %c0_285, %c0_286] : memref<16x16x120xf32, #tpu.memory_space<vmem>>, vector<1x16x120xf32>
    %367 = vector.shape_cast %366 : vector<1x16x120xf32> to vector<16x120xf32>
    %cst_287 = arith.constant dense<0.000000e+00> : vector<1x120xf32>
    %368 = tpu.matmul %365, %367, %cst_287 {dimension_numbers = #tpu.dot_dimension_numbers<[1], [0], [0], [1], [0, 0, 1, 1], [], []>} : vector<1x16xf32>, vector<16x120xf32>, vector<1x120xf32> -> vector<1x120xf32>
    %369 = arith.addf %364, %368 : vector<1x120xf32>
    %370 = vector.extract_strided_slice %363 {offsets = [1, 0], sizes = [1, 16], strides = [1, 1]} : vector<16x16xf32> to vector<1x16xf32>
    %c1_288 = arith.constant 1 : index
    %c0_289 = arith.constant 0 : index
    %c0_290 = arith.constant 0 : index
    %371 = vector.load %arg7[%c1_288, %c0_289, %c0_290] : memref<16x16x120xf32, #tpu.memory_space<vmem>>, vector<1x16x120xf32>
    %372 = vector.shape_cast %371 : vector<1x16x120xf32> to vector<16x120xf32>
    %cst_291 = arith.constant dense<0.000000e+00> : vector<1x120xf32>
    %373 = tpu.matmul %370, %372, %cst_291 {dimension_numbers = #tpu.dot_dimension_numbers<[1], [0], [0], [1], [0, 0, 1, 1], [], []>} : vector<1x16xf32>, vector<16x120xf32>, vector<1x120xf32> -> vector<1x120xf32>
    %374 = arith.addf %369, %373 : vector<1x120xf32>
    %375 = vector.extract_strided_slice %363 {offsets = [2, 0], sizes = [1, 16], strides = [1, 1]} : vector<16x16xf32> to vector<1x16xf32>
    %c2_292 = arith.constant 2 : index
    %c0_293 = arith.constant 0 : index
    %c0_294 = arith.constant 0 : index
    %376 = vector.load %arg7[%c2_292, %c0_293, %c0_294] : memref<16x16x120xf32, #tpu.memory_space<vmem>>, vector<1x16x120xf32>
    %377 = vector.shape_cast %376 : vector<1x16x120xf32> to vector<16x120xf32>
    %cst_295 = arith.constant dense<0.000000e+00> : vector<1x120xf32>
    %378 = tpu.matmul %375, %377, %cst_295 {dimension_numbers = #tpu.dot_dimension_numbers<[1], [0], [0], [1], [0, 0, 1, 1], [], []>} : vector<1x16xf32>, vector<16x120xf32>, vector<1x120xf32> -> vector<1x120xf32>
    %379 = arith.addf %374, %378 : vector<1x120xf32>
    %380 = vector.extract_strided_slice %363 {offsets = [3, 0], sizes = [1, 16], strides = [1, 1]} : vector<16x16xf32> to vector<1x16xf32>
    %c3_296 = arith.constant 3 : index
    %c0_297 = arith.constant 0 : index
    %c0_298 = arith.constant 0 : index
    %381 = vector.load %arg7[%c3_296, %c0_297, %c0_298] : memref<16x16x120xf32, #tpu.memory_space<vmem>>, vector<1x16x120xf32>
    %382 = vector.shape_cast %381 : vector<1x16x120xf32> to vector<16x120xf32>
    %cst_299 = arith.constant dense<0.000000e+00> : vector<1x120xf32>
    %383 = tpu.matmul %380, %382, %cst_299 {dimension_numbers = #tpu.dot_dimension_numbers<[1], [0], [0], [1], [0, 0, 1, 1], [], []>} : vector<1x16xf32>, vector<16x120xf32>, vector<1x120xf32> -> vector<1x120xf32>
    %384 = arith.addf %379, %383 : vector<1x120xf32>
    %385 = vector.extract_strided_slice %363 {offsets = [4, 0], sizes = [1, 16], strides = [1, 1]} : vector<16x16xf32> to vector<1x16xf32>
    %c4_300 = arith.constant 4 : index
    %c0_301 = arith.constant 0 : index
    %c0_302 = arith.constant 0 : index
    %386 = vector.load %arg7[%c4_300, %c0_301, %c0_302] : memref<16x16x120xf32, #tpu.memory_space<vmem>>, vector<1x16x120xf32>
    %387 = vector.shape_cast %386 : vector<1x16x120xf32> to vector<16x120xf32>
    %cst_303 = arith.constant dense<0.000000e+00> : vector<1x120xf32>
    %388 = tpu.matmul %385, %387, %cst_303 {dimension_numbers = #tpu.dot_dimension_numbers<[1], [0], [0], [1], [0, 0, 1, 1], [], []>} : vector<1x16xf32>, vector<16x120xf32>, vector<1x120xf32> -> vector<1x120xf32>
    %389 = arith.addf %384, %388 : vector<1x120xf32>
    %390 = vector.extract_strided_slice %363 {offsets = [5, 0], sizes = [1, 16], strides = [1, 1]} : vector<16x16xf32> to vector<1x16xf32>
    %c5_304 = arith.constant 5 : index
    %c0_305 = arith.constant 0 : index
    %c0_306 = arith.constant 0 : index
    %391 = vector.load %arg7[%c5_304, %c0_305, %c0_306] : memref<16x16x120xf32, #tpu.memory_space<vmem>>, vector<1x16x120xf32>
    %392 = vector.shape_cast %391 : vector<1x16x120xf32> to vector<16x120xf32>
    %cst_307 = arith.constant dense<0.000000e+00> : vector<1x120xf32>
    %393 = tpu.matmul %390, %392, %cst_307 {dimension_numbers = #tpu.dot_dimension_numbers<[1], [0], [0], [1], [0, 0, 1, 1], [], []>} : vector<1x16xf32>, vector<16x120xf32>, vector<1x120xf32> -> vector<1x120xf32>
    %394 = arith.addf %389, %393 : vector<1x120xf32>
    %395 = vector.extract_strided_slice %363 {offsets = [6, 0], sizes = [1, 16], strides = [1, 1]} : vector<16x16xf32> to vector<1x16xf32>
    %c6_308 = arith.constant 6 : index
    %c0_309 = arith.constant 0 : index
    %c0_310 = arith.constant 0 : index
    %396 = vector.load %arg7[%c6_308, %c0_309, %c0_310] : memref<16x16x120xf32, #tpu.memory_space<vmem>>, vector<1x16x120xf32>
    %397 = vector.shape_cast %396 : vector<1x16x120xf32> to vector<16x120xf32>
    %cst_311 = arith.constant dense<0.000000e+00> : vector<1x120xf32>
    %398 = tpu.matmul %395, %397, %cst_311 {dimension_numbers = #tpu.dot_dimension_numbers<[1], [0], [0], [1], [0, 0, 1, 1], [], []>} : vector<1x16xf32>, vector<16x120xf32>, vector<1x120xf32> -> vector<1x120xf32>
    %399 = arith.addf %394, %398 : vector<1x120xf32>
    %400 = vector.extract_strided_slice %363 {offsets = [7, 0], sizes = [1, 16], strides = [1, 1]} : vector<16x16xf32> to vector<1x16xf32>
    %c7_312 = arith.constant 7 : index
    %c0_313 = arith.constant 0 : index
    %c0_314 = arith.constant 0 : index
    %401 = vector.load %arg7[%c7_312, %c0_313, %c0_314] : memref<16x16x120xf32, #tpu.memory_space<vmem>>, vector<1x16x120xf32>
    %402 = vector.shape_cast %401 : vector<1x16x120xf32> to vector<16x120xf32>
    %cst_315 = arith.constant dense<0.000000e+00> : vector<1x120xf32>
    %403 = tpu.matmul %400, %402, %cst_315 {dimension_numbers = #tpu.dot_dimension_numbers<[1], [0], [0], [1], [0, 0, 1, 1], [], []>} : vector<1x16xf32>, vector<16x120xf32>, vector<1x120xf32> -> vector<1x120xf32>
    %404 = arith.addf %399, %403 : vector<1x120xf32>
    %405 = vector.extract_strided_slice %363 {offsets = [8, 0], sizes = [1, 16], strides = [1, 1]} : vector<16x16xf32> to vector<1x16xf32>
    %c8_316 = arith.constant 8 : index
    %c0_317 = arith.constant 0 : index
    %c0_318 = arith.constant 0 : index
    %406 = vector.load %arg7[%c8_316, %c0_317, %c0_318] : memref<16x16x120xf32, #tpu.memory_space<vmem>>, vector<1x16x120xf32>
    %407 = vector.shape_cast %406 : vector<1x16x120xf32> to vector<16x120xf32>
    %cst_319 = arith.constant dense<0.000000e+00> : vector<1x120xf32>
    %408 = tpu.matmul %405, %407, %cst_319 {dimension_numbers = #tpu.dot_dimension_numbers<[1], [0], [0], [1], [0, 0, 1, 1], [], []>} : vector<1x16xf32>, vector<16x120xf32>, vector<1x120xf32> -> vector<1x120xf32>
    %409 = arith.addf %404, %408 : vector<1x120xf32>
    %410 = vector.extract_strided_slice %363 {offsets = [9, 0], sizes = [1, 16], strides = [1, 1]} : vector<16x16xf32> to vector<1x16xf32>
    %c9_320 = arith.constant 9 : index
    %c0_321 = arith.constant 0 : index
    %c0_322 = arith.constant 0 : index
    %411 = vector.load %arg7[%c9_320, %c0_321, %c0_322] : memref<16x16x120xf32, #tpu.memory_space<vmem>>, vector<1x16x120xf32>
    %412 = vector.shape_cast %411 : vector<1x16x120xf32> to vector<16x120xf32>
    %cst_323 = arith.constant dense<0.000000e+00> : vector<1x120xf32>
    %413 = tpu.matmul %410, %412, %cst_323 {dimension_numbers = #tpu.dot_dimension_numbers<[1], [0], [0], [1], [0, 0, 1, 1], [], []>} : vector<1x16xf32>, vector<16x120xf32>, vector<1x120xf32> -> vector<1x120xf32>
    %414 = arith.addf %409, %413 : vector<1x120xf32>
    %415 = vector.extract_strided_slice %363 {offsets = [10, 0], sizes = [1, 16], strides = [1, 1]} : vector<16x16xf32> to vector<1x16xf32>
    %c10_324 = arith.constant 10 : index
    %c0_325 = arith.constant 0 : index
    %c0_326 = arith.constant 0 : index
    %416 = vector.load %arg7[%c10_324, %c0_325, %c0_326] : memref<16x16x120xf32, #tpu.memory_space<vmem>>, vector<1x16x120xf32>
    %417 = vector.shape_cast %416 : vector<1x16x120xf32> to vector<16x120xf32>
    %cst_327 = arith.constant dense<0.000000e+00> : vector<1x120xf32>
    %418 = tpu.matmul %415, %417, %cst_327 {dimension_numbers = #tpu.dot_dimension_numbers<[1], [0], [0], [1], [0, 0, 1, 1], [], []>} : vector<1x16xf32>, vector<16x120xf32>, vector<1x120xf32> -> vector<1x120xf32>
    %419 = arith.addf %414, %418 : vector<1x120xf32>
    %420 = vector.extract_strided_slice %363 {offsets = [11, 0], sizes = [1, 16], strides = [1, 1]} : vector<16x16xf32> to vector<1x16xf32>
    %c11_328 = arith.constant 11 : index
    %c0_329 = arith.constant 0 : index
    %c0_330 = arith.constant 0 : index
    %421 = vector.load %arg7[%c11_328, %c0_329, %c0_330] : memref<16x16x120xf32, #tpu.memory_space<vmem>>, vector<1x16x120xf32>
    %422 = vector.shape_cast %421 : vector<1x16x120xf32> to vector<16x120xf32>
    %cst_331 = arith.constant dense<0.000000e+00> : vector<1x120xf32>
    %423 = tpu.matmul %420, %422, %cst_331 {dimension_numbers = #tpu.dot_dimension_numbers<[1], [0], [0], [1], [0, 0, 1, 1], [], []>} : vector<1x16xf32>, vector<16x120xf32>, vector<1x120xf32> -> vector<1x120xf32>
    %424 = arith.addf %419, %423 : vector<1x120xf32>
    %425 = vector.extract_strided_slice %363 {offsets = [12, 0], sizes = [1, 16], strides = [1, 1]} : vector<16x16xf32> to vector<1x16xf32>
    %c12_332 = arith.constant 12 : index
    %c0_333 = arith.constant 0 : index
    %c0_334 = arith.constant 0 : index
    %426 = vector.load %arg7[%c12_332, %c0_333, %c0_334] : memref<16x16x120xf32, #tpu.memory_space<vmem>>, vector<1x16x120xf32>
    %427 = vector.shape_cast %426 : vector<1x16x120xf32> to vector<16x120xf32>
    %cst_335 = arith.constant dense<0.000000e+00> : vector<1x120xf32>
    %428 = tpu.matmul %425, %427, %cst_335 {dimension_numbers = #tpu.dot_dimension_numbers<[1], [0], [0], [1], [0, 0, 1, 1], [], []>} : vector<1x16xf32>, vector<16x120xf32>, vector<1x120xf32> -> vector<1x120xf32>
    %429 = arith.addf %424, %428 : vector<1x120xf32>
    %430 = vector.extract_strided_slice %363 {offsets = [13, 0], sizes = [1, 16], strides = [1, 1]} : vector<16x16xf32> to vector<1x16xf32>
    %c13_336 = arith.constant 13 : index
    %c0_337 = arith.constant 0 : index
    %c0_338 = arith.constant 0 : index
    %431 = vector.load %arg7[%c13_336, %c0_337, %c0_338] : memref<16x16x120xf32, #tpu.memory_space<vmem>>, vector<1x16x120xf32>
    %432 = vector.shape_cast %431 : vector<1x16x120xf32> to vector<16x120xf32>
    %cst_339 = arith.constant dense<0.000000e+00> : vector<1x120xf32>
    %433 = tpu.matmul %430, %432, %cst_339 {dimension_numbers = #tpu.dot_dimension_numbers<[1], [0], [0], [1], [0, 0, 1, 1], [], []>} : vector<1x16xf32>, vector<16x120xf32>, vector<1x120xf32> -> vector<1x120xf32>
    %434 = arith.addf %429, %433 : vector<1x120xf32>
    %435 = vector.extract_strided_slice %363 {offsets = [14, 0], sizes = [1, 16], strides = [1, 1]} : vector<16x16xf32> to vector<1x16xf32>
    %c14_340 = arith.constant 14 : index
    %c0_341 = arith.constant 0 : index
    %c0_342 = arith.constant 0 : index
    %436 = vector.load %arg7[%c14_340, %c0_341, %c0_342] : memref<16x16x120xf32, #tpu.memory_space<vmem>>, vector<1x16x120xf32>
    %437 = vector.shape_cast %436 : vector<1x16x120xf32> to vector<16x120xf32>
    %cst_343 = arith.constant dense<0.000000e+00> : vector<1x120xf32>
    %438 = tpu.matmul %435, %437, %cst_343 {dimension_numbers = #tpu.dot_dimension_numbers<[1], [0], [0], [1], [0, 0, 1, 1], [], []>} : vector<1x16xf32>, vector<16x120xf32>, vector<1x120xf32> -> vector<1x120xf32>
    %439 = arith.addf %434, %438 : vector<1x120xf32>
    %440 = vector.extract_strided_slice %363 {offsets = [15, 0], sizes = [1, 16], strides = [1, 1]} : vector<16x16xf32> to vector<1x16xf32>
    %c15_344 = arith.constant 15 : index
    %c0_345 = arith.constant 0 : index
    %c0_346 = arith.constant 0 : index
    %441 = vector.load %arg7[%c15_344, %c0_345, %c0_346] : memref<16x16x120xf32, #tpu.memory_space<vmem>>, vector<1x16x120xf32>
    %442 = vector.shape_cast %441 : vector<1x16x120xf32> to vector<16x120xf32>
    %cst_347 = arith.constant dense<0.000000e+00> : vector<1x120xf32>
    %443 = tpu.matmul %440, %442, %cst_347 {dimension_numbers = #tpu.dot_dimension_numbers<[1], [0], [0], [1], [0, 0, 1, 1], [], []>} : vector<1x16xf32>, vector<16x120xf32>, vector<1x120xf32> -> vector<1x120xf32>
    %444 = arith.addf %439, %443 : vector<1x120xf32>
    %cst_348 = arith.constant 0.000000e+00 : f32
    %445 = vector.broadcast %cst_348 : f32 to vector<1x120xf32>
    %446 = arith.maximumf %444, %445 : vector<1x120xf32>
    %c0_349 = arith.constant 0 : index
    %c0_350 = arith.constant 0 : index
    %447 = vector.load %arg9[%c0_349, %c0_350] : memref<120x84xf32, #tpu.memory_space<vmem>>, vector<120x84xf32>
    %cst_351 = arith.constant dense<0.000000e+00> : vector<1x84xf32>
    %448 = tpu.matmul %446, %447, %cst_351 {dimension_numbers = #tpu.dot_dimension_numbers<[1], [0], [0], [1], [0, 0, 1, 1], [], []>} : vector<1x120xf32>, vector<120x84xf32>, vector<1x84xf32> -> vector<1x84xf32>
    %c0_352 = arith.constant 0 : index
    %c0_353 = arith.constant 0 : index
    %449 = vector.load %arg10[%c0_352, %c0_353] : memref<1x84xf32, #tpu.memory_space<vmem>>, vector<1x84xf32>
    %450 = arith.addf %448, %449 : vector<1x84xf32>
    %cst_354 = arith.constant 0.000000e+00 : f32
    %451 = vector.broadcast %cst_354 : f32 to vector<1x84xf32>
    %452 = arith.maximumf %450, %451 : vector<1x84xf32>
    %c0_355 = arith.constant 0 : index
    %c0_356 = arith.constant 0 : index
    %453 = vector.load %arg11[%c0_355, %c0_356] : memref<84x10xf32, #tpu.memory_space<vmem>>, vector<84x10xf32>
    %cst_357 = arith.constant dense<0.000000e+00> : vector<1x10xf32>
    %454 = tpu.matmul %452, %453, %cst_357 {dimension_numbers = #tpu.dot_dimension_numbers<[1], [0], [0], [1], [0, 0, 1, 1], [], []>} : vector<1x84xf32>, vector<84x10xf32>, vector<1x10xf32> -> vector<1x10xf32>
    %c0_358 = arith.constant 0 : index
    %c0_359 = arith.constant 0 : index
    %455 = vector.load %arg12[%c0_358, %c0_359] : memref<1x10xf32, #tpu.memory_space<vmem>>, vector<1x10xf32>
    %456 = arith.addf %454, %455 : vector<1x10xf32>
    %c1_360 = arith.constant 1 : index
    %c0_361 = arith.constant 0 : index
    %457 = vector.load %arg13[%c1_360, %c0_361] : memref<2x10xf32, #tpu.memory_space<vmem>>, vector<1x10xf32>
    tpu.vector_store %arg13[%c1_360, %c0_361], %456 {strides = array<i32>} : memref<2x10xf32, #tpu.memory_space<vmem>>, vector<1x10xf32>,
    return
  }
}

</mosaic_0001>

<bundles_post_ra>
// kernel: lenet5_forward.1
= control target key start
LH: loop header
LB: loop body
LE: loop exit
PB: predicated region body
PF: predicated region fallthrough
CT: control target
= control target key end

     0   :  { %18 = vsyncpa [#allocation5], 0  ;;  %s4913_s0 = inlined_call_operand.vmem [shape: f32[2,784], index: 0, kind: input, shape index: {}]   ;;  %s4914_s1 = inlined_call_operand.vmem [shape: f32[6,25], index: 1, kind: input, shape index: {}]   ;;  %s4915_s2 = inlined_call_operand.vmem [shape: f32[6,1], index: 2, kind: input, shape index: {}]   ;;  %s4916_s3 = inlined_call_operand.hbm [shape: f32[639,144], index: 3, kind: input, shape index: {}]   ;;  %s4917_s4 = inlined_call_operand.vmem [shape: f32[16,150], index: 4, kind: input, shape index: {}]   ;;  %s4918_s5 = inlined_call_operand.vmem [shape: f32[16,1], index: 5, kind: input, shape index: {}]   ;;  %s4919_s6 = inlined_call_operand.vmem [shape: f32[79,16], index: 6, kind: input, shape index: {}]   ;;  %s4920_s7 = inlined_call_operand.vmem [shape: f32[16,16,120], index: 7, kind: input, shape index: {}]   ;;  %s4921_s8 = inlined_call_operand.vmem [shape: f32[1,120], index: 8, kind: input, shape index: {}]   ;;  %s4922_s9 = inlined_call_operand.vmem [shape: f32[120,84], index: 9, kind: input, shape index: {}]   ;;  %s4923_s10 = inlined_call_operand.vmem [shape: f32[1,84], index: 10, kind: input, shape index: {}]   ;;  %s4924_s11 = inlined_call_operand.vmem [shape: f32[84,10], index: 11, kind: input, shape index: {}]   ;;  %s4925_s12 = inlined_call_operand.vmem [shape: f32[1,10], index: 12, kind: input, shape index: {}]   ;;  %s4926_s13 = inlined_call_operand.hbm [shape: f32[2,10], index: 13, kind: output, shape index: {}]  }
   0x1   :  { %19 = vsyncpa [#allocation6], 0  ;;  %s30_s27 = sshll.u32 %s4916_s3, 4  ;;  %s3567_s28 = smov [#allocation4]   ;;  %s31_s27 = int_to_ptr.hbm [resolvable:$true] %s30_s27 }
   0x2   :  { %s32_s29 = sshll.u32 %s3567_s28, 4  ;;  %s3568_s30 = smov 256   ;;  %s33_s29 = int_to_ptr.vmem [resolvable:$true] %s32_s29 }
   0x3   :  { %s4951_s14 = smov 16  }
   0x4   :  { %38 = dma.hbm_to_vmem [thread:$0]  %s31_s27, 20480, %s33_s29, [#allocation5], %s3568_s30, %s3568_s30, %s4951_s14  }
   0x5   :  { %3563 = dma.done.wait [#allocation5], 20480  }
   0x6   :  { %3564 = vsyncadd [#allocation5], 4294946816  ;;  %v61_v0 = vld [vmem:[%s4913_s0] ss:$2 sm:$0x7f]  ;;  %s4952_s17 = smov 42   ;;  %v62_v1 = vlaneseq }
   0x7   :  { %213 = vrot.lane.b32.xlu1 %v61_v0, %s4952_s17  ;;  %s3571_s18 = smov 12   ;;  %s4948_s3 = smov 40   ;;  %vm4938_vm1 = vcmask 326656   ;;  %vm4971_vm2 = vcmask 130048   ;;  %vm4945_vm3 = vcmask 105472   ;;  %vm216_vm4 = vcmask 343040  }
   0x8   :  { %276 = vrot.lane.b32.xlu0 %v61_v0, %s3571_s18  ;;  %231 = vrot.lane.b32.xlu2 %v61_v0, %s4948_s3  ;;  %s3573_s19 = smov 41   ;;  %s4950_s20 = smov 43   ;;  %vm3703_vm0 = vcmp.lt.s32.totalorder %v62_v1, 668  ;;  %vm279_vm5 = vcmask 97280   ;;  %vm4937_vm6 = vcmask 588800   ;;  %vm225_vm7 = vcmask 334848  }
   0x9   :  { %s4928_s21 = smov 14   ;;  %s4956_s22 = smov 15   ;;  %66 = vst.msk [vmem:[#allocation2] ss:$8 sm:$0xf] %vm3703_vm0, %v61_v0  ;;  %vm4970_vm8 = vcmask 351232  }
   0xa   :  { %s4949_s23 = smov 13   ;;  %s4927_s24 = smov 96   ;;  %67 = vst.msk [vmem:[#allocation2] ss:$8 sm:$0x30] %vm3703_vm0, %v61_v0  ;;  %vm4933_vm9 = vcmask 564224  }
   0xb   :  { %s4955_s25 = smov 97   ;;  %s4930_s26 = smov 72   ;;  %vm4947_vm10 = vcmask 1040384   ;;  %vm4935_vm11 = vcmask 113664   ;;  %vm252_vm12 = vcmask 121856   ;;  %vm4969_vm13 = vcmask 1039360  }
   0xc   :  { %s4929_s27 = smov 70   ;;  %s4954_s28 = smov 71   ;;  %vm4934_vm14 = vcmask 785408   ;;  %vm135_vm15 = vcmask 793600   ;;  %v3348_v2 = vld [vmem:[%s4920_s7 + $0xa8] sm:$0xff] }
   0xd   :  { %s4931_s29 = smov 69   ;;  %s4932_s30 = smov 44  }
   0xe   :  { %s4953_s15 = smov 68   ;;  %s3586_s16 = smov 127  }
   0xf   :  { %222 = vrot.lane.b32.xlu1 %v61_v0, %s3573_s19  ;;  %s3596_s3 = smov 80   ;;  %s4957_s17 = smov 92  }
  0x10   :  { %204 = vrot.lane.b32.xlu0 %v61_v0, %s4950_s20  ;;  %240 = vrot.lane.b32.xlu2 %v61_v0, %s4951_s14  ;;  %s4987_s20 = smov 90   ;;  %s4985_s14 = smov 88  }
  0x17   :  { %258 = vrot.lane.b32.xlu1 %v61_v0, %s4928_s21  ;;  %s3588_s21 = smov 126  }
  0x18   :  { %249 = vrot.lane.b32.xlu0 %v61_v0, %s4956_s22  ;;  %267 = vrot.lane.b32.xlu2 %v61_v0, %s4949_s23  ;;  %s3597_s23 = smov 91   ;;  %s4964_s22 = smov 102  }
  0x1f   :  { %141 = vrot.lane.b32.xlu1 %v61_v0, %s4927_s24  ;;  %s3587_s24 = smov 125  }
  0x20   :  { %132 = vrot.lane.b32.xlu0 %v61_v0, %s4955_s25  ;;  %150 = vrot.lane.b32.xlu2 %v61_v0, %s4930_s26  ;;  %s4941_s26 = smov 99   ;;  %s4965_s25 = smov 103  }
  0x27   :  { %168 = vrot.lane.b32.xlu1 %v61_v0, %s4929_s27  ;;  %s3589_s27 = smov 124  }
  0x28   :  { %159 = vrot.lane.b32.xlu0 %v61_v0, %s4954_s28  ;;  %177 = vrot.lane.b32.xlu2 %v61_v0, %s4931_s29  ;;  %s4959_s29 = smov 100   ;;  %s4967_s28 = smov 104  }
  0x2f   :  { %195 = vrot.lane.b32.xlu1 %v61_v0, %s4932_s30  ;;  %s4942_s30 = smov 98  }
  0x30   :  { %186 = vrot.lane.b32.xlu0 %v61_v0, %s4953_s15  ;;  %69 = vrot.lane.b32.xlu2 %v61_v0, %s3586_s16  ;;  %s4958_s15 = smov 101  }
  0x37   :  { %87 = vrot.lane.b32.xlu1 %v61_v0, %s3587_s24 }
  0x38   :  { %78 = vrot.lane.b32.xlu0 %v61_v0, %s3588_s21  ;;  %96 = vrot.lane.b32.xlu2 %v61_v0, %s3589_s27 }
  0x3f   :  { %114 = vrot.lane.b32.xlu1 %v61_v0, %s4941_s26  ;;  %s3594_s26 = smov 89  }
  0x40   :  { %105 = vrot.lane.b32.xlu0 %v61_v0, %s4959_s29  ;;  %123 = vrot.lane.b32.xlu2 %v61_v0, %s4942_s30  ;;  %s3595_s30 = smov 79  }
  0x62   :  { %v232_v3 = vpop.permute.xlu2 %231 }
  0x63   :  { %v233_v4 = vrot.slane %v232_v3, 1 }
  0x65   :  { %v235_v5 = vsel %vm4938_vm1, %v232_v3, %v233_v4  ;;  %vm189_vm1 = vcmask 556032  }
  0x66   :  { %238 = vst.msk [vmem:[#allocation2 + $0x63] ss:$8 sm:$0xf] %vm3703_vm0, %v235_v5 }
  0x67   :  { %239 = vst.msk [vmem:[#allocation2 + $0x63] ss:$8 sm:$0x30] %vm3703_vm0, %v235_v5 }
  0x6a   :  { %v241_v6 = vpop.permute.xlu2 %240 }
  0x6b   :  { %v242_v7 = vrot.slane %v241_v6, 1 }
  0x6d   :  { %v244_v8 = vsel %vm4971_vm2, %v241_v6, %v242_v7  ;;  %vm4974_vm2 = vcmask 728064  }
  0x6e   :  { %247 = vst.msk [vmem:[#allocation2 + $0x64] ss:$8 sm:$0xf] %vm3703_vm0, %v244_v8 }
  0x6f   :  { %248 = vst.msk [vmem:[#allocation2 + $0x64] ss:$8 sm:$0x30] %vm3703_vm0, %v244_v8 }
  0x72   :  { %v268_v9 = vpop.permute.xlu2 %267 }
  0x73   :  { %v269_v10 = vrot.slane %v268_v9, 1 }
  0x75   :  { %v271_v11 = vsel %vm4945_vm3, %v268_v9, %v269_v10  ;;  %v310_v10 = vld [vmem:[%s4915_s2] sm:$0x3f]  ;;  %vm4946_vm3 = vcmask 203776  }
  0x76   :  { %274 = vst.msk [vmem:[#allocation2 + $0x67] ss:$8 sm:$0xf] %vm3703_vm0, %v271_v11 }
  0x77   :  { %275 = vst.msk [vmem:[#allocation2 + $0x67] ss:$8 sm:$0x30] %vm3703_vm0, %v271_v11  ;;  %v3593_v11 = vmov 0  }
  0x78   :  { %3487 = vset.pattern.permute.xlu0 %v3593_v11  ;;  %3503 = vset.pattern.permute.xlu2 %v3593_v11 }
  0x79   :  { %v214_v12 = vpop.permute.xlu1 %213  ;;  %313 = vperm.xlu0 %3487, %v310_v10   ;;  %3514 = vset.pattern.permute.xlu1 %v3593_v11  ;;  %v557_v10 = vld [vmem:[#allocation4 + $0xb0] sm:$0xff] }
  0x7a   :  { %v277_v13 = vpop.permute.xlu0 %276  ;;  %v215_v14 = vrot.slane %v214_v12, 1  ;;  %v151_v16 = vpop.permute.xlu2 %150  ;;  %v589_v11 = vld [vmem:[#allocation4 + $0x1b0] sm:$0xff] }
  0x7b   :  { %v278_v15 = vrot.slane %v277_v13, 1  ;;  %v152_v17 = vrot.slane %v151_v16, 1 }
  0x7c   :  { %v217_v18 = vsel %vm216_vm4, %v214_v12, %v215_v14 }
  0x7d   :  { %v280_v19 = vsel %vm279_vm5, %v277_v13, %v278_v15  ;;  %220 = vst.msk [vmem:[#allocation2 + $0x61] ss:$8 sm:$0xf] %vm3703_vm0, %v217_v18  ;;  %v154_v20 = vsel %vm4937_vm6, %v151_v16, %v152_v17  ;;  %vm4944_vm6 = vcmask 359424  }
  0x7e   :  { %221 = vst.msk [vmem:[#allocation2 + $0x61] ss:$8 sm:$0x30] %vm3703_vm0, %v217_v18 }
  0x7f   :  { %283 = vst.msk [vmem:[#allocation2 + $0x90] ss:$8 sm:$0xf] %vm3703_vm0, %v280_v19 }
  0x80   :  { %284 = vst.msk [vmem:[#allocation2 + $0x90] ss:$8 sm:$0x30] %vm3703_vm0, %v280_v19 }
  0x81   :  { %v223_v21 = vpop.permute.xlu1 %222  ;;  %157 = vst.msk [vmem:[#allocation2 + $0x32] ss:$8 sm:$0xf] %vm3703_vm0, %v154_v20 }
  0x82   :  { %v205_v22 = vpop.permute.xlu0 %204  ;;  %v224_v23 = vrot.slane %v223_v21, 1  ;;  %158 = vst.msk [vmem:[#allocation2 + $0x32] ss:$8 sm:$0x30] %vm3703_vm0, %v154_v20  ;;  %v178_v25 = vpop.permute.xlu2 %177 }
  0x83   :  { %v206_v24 = vrot.slane %v205_v22, 1  ;;  %v179_v26 = vrot.slane %v178_v25, 1 }
  0x84   :  { %v226_v27 = vsel %vm225_vm7, %v223_v21, %v224_v23  ;;  %v285_v23 = vld [vmem:[%s4914_s1] sm:$0x3f] }
  0x85   :  { %v208_v28 = vsel %vm4970_vm8, %v205_v22, %v206_v24  ;;  %229 = vst.msk [vmem:[#allocation2 + $0x62] ss:$8 sm:$0xf] %vm3703_vm0, %v226_v27  ;;  %v181_v30 = vsel %vm4933_vm9, %v178_v25, %v179_v26  ;;  %vm4936_vm9 = vcmask 1014784   ;;  %vm4973_vm8 = vcmask 654336  }
  0x86   :  { %230 = vst.msk [vmem:[#allocation2 + $0x62] ss:$8 sm:$0x30] %vm3703_vm0, %v226_v27  ;;  %v304_v29 = vld [vmem:[#allocation2 + $0x90] sm:$0x1] }
  0x87   :  { %211 = vst.msk [vmem:[#allocation2 + $0x60] ss:$8 sm:$0xf] %vm3703_vm0, %v208_v28  ;;  %3297 = vmatpush.msk.msra.mxu0 %vm4947_vm10, %v304_v29  ;;  %v305_v31 = vld [vmem:[#allocation2 + $0x98] sm:$0x1] }
  0x88   :  { %212 = vst.msk [vmem:[#allocation2 + $0x60] ss:$8 sm:$0x30] %vm3703_vm0, %v208_v28  ;;  %3299 = vmatpush.msk.msra.mxu1 %vm4947_vm10, %v305_v31  ;;  %v307_v32 = vld [vmem:[#allocation2 + $0xa8] sm:$0x1] }
  0x89   :  { %3303 = vmatpush.msk.msra.mxu3 %vm4947_vm10, %v307_v32  ;;  %v259_v33 = vpop.permute.xlu1 %258  ;;  %184 = vst.msk [vmem:[#allocation2 + $0x35] ss:$8 sm:$0xf] %vm3703_vm0, %v181_v30  ;;  %v306_v27 = vld [vmem:[#allocation2 + $0xa0] sm:$0x1] }
  0x8a   :  { %v250_v34 = vpop.permute.xlu0 %249  ;;  %v260_v35 = vrot.slane %v259_v33, 1  ;;  %185 = vst.msk [vmem:[#allocation2 + $0x35] ss:$8 sm:$0x30] %vm3703_vm0, %v181_v30  ;;  %v70_v37 = vpop.permute.xlu2 %69  ;;  %v309_v28 = vld [vmem:[#allocation2 + $0xb8] sm:$0x1] }
  0x8b   :  { %v251_v36 = vrot.slane %v250_v34, 1  ;;  %v71_v38 = vrot.slane %v70_v37, 1 }
  0x8c   :  { %v262_v39 = vsel %vm4935_vm11, %v259_v33, %v260_v35  ;;  %vm162_vm11 = vcmask 580608   ;;  %v308_v35 = vld [vmem:[#allocation2 + $0xb0] sm:$0x1] }
  0x8d   :  { %v253_v40 = vsel %vm252_vm12, %v250_v34, %v251_v36  ;;  %265 = vst.msk [vmem:[#allocation2 + $0x66] ss:$8 sm:$0xf] %vm3703_vm0, %v262_v39  ;;  %v73_v41 = vsel %vm4969_vm13, %v70_v37, %v71_v38 }
  0x8e   :  { %266 = vst.msk [vmem:[#allocation2 + $0x66] ss:$8 sm:$0x30] %vm3703_vm0, %v262_v39 }
  0x8f   :  { %256 = vst.msk [vmem:[#allocation2 + $0x65] ss:$8 sm:$0xf] %vm3703_vm0, %v253_v40 }
  0x90   :  { %257 = vst.msk [vmem:[#allocation2 + $0x65] ss:$8 sm:$0x30] %vm3703_vm0, %v253_v40 }
  0x91   :  { %v142_v42 = vpop.permute.xlu1 %141  ;;  %76 = vst.msk [vmem:[#allocation2 + $0x1] ss:$8 sm:$0xf] %vm3703_vm0, %v73_v41 }
  0x92   :  { %v133_v43 = vpop.permute.xlu0 %132  ;;  %v143_v44 = vrot.slane %v142_v42, 1  ;;  %77 = vst.msk [vmem:[#allocation2 + $0x1] ss:$8 sm:$0x30] %vm3703_vm0, %v73_v41  ;;  %v97_v46 = vpop.permute.xlu2 %96 }
  0x93   :  { %v134_v45 = vrot.slane %v133_v43, 1  ;;  %v98_v47 = vrot.slane %v97_v46, 1 }
  0x94   :  { %v145_v48 = vsel %vm4934_vm14, %v142_v42, %v143_v44  ;;  %vm4940_vm14 = vcmask 572416  }
  0x95   :  { %v136_v49 = vsel %vm135_vm15, %v133_v43, %v134_v45  ;;  %148 = vst.msk [vmem:[#allocation2 + $0x31] ss:$8 sm:$0xf] %vm3703_vm0, %v145_v48  ;;  %v100_v53 = vsel %vm4936_vm9, %v97_v46, %v98_v47  ;;  %vm4939_vm9 = vcmask 801792  }
  0x96   :  { %149 = vst.msk [vmem:[#allocation2 + $0x31] ss:$8 sm:$0x30] %vm3703_vm0, %v145_v48  ;;  %v298_v50 = vld [vmem:[#allocation2 + $0x60] sm:$0xff]  ;;  %v299_v51 = vld [vmem:[#allocation2 + $0x68] sm:$0xff]  ;;  %v301_v52 = vld [vmem:[#allocation2 + $0x78] sm:$0xff] }
  0x97   :  { %139 = vst.msk [vmem:[#allocation2 + $0x30] ss:$8 sm:$0xf] %vm3703_vm0, %v136_v49  ;;  %352 = vmatpush.msra.mxu0 %v298_v50  ;;  %372 = vmatpush.msra.mxu1 %v299_v51  ;;  %v300_v29 = vld [vmem:[#allocation2 + $0x70] sm:$0xff]  ;;  %v303_v30 = vld [vmem:[#allocation2 + $0x88] sm:$0xff]  ;;  %v302_v36 = vld [vmem:[#allocation2 + $0x80] sm:$0xff] }
  0x98   :  { %140 = vst.msk [vmem:[#allocation2 + $0x30] ss:$8 sm:$0x30] %vm3703_vm0, %v136_v49  ;;  %412 = vmatpush.msra.mxu3 %v301_v52 }
  0x99   :  { %v169_v54 = vpop.permute.xlu1 %168  ;;  %103 = vst.msk [vmem:[#allocation2 + $0x4] ss:$8 sm:$0xf] %vm3703_vm0, %v100_v53 }
  0x9a   :  { %v160_v55 = vpop.permute.xlu0 %159  ;;  %v170_v56 = vrot.slane %v169_v54, 1  ;;  %104 = vst.msk [vmem:[#allocation2 + $0x4] ss:$8 sm:$0x30] %vm3703_vm0, %v100_v53  ;;  %v124_v58 = vpop.permute.xlu2 %123 }
  0x9b   :  { %v161_v57 = vrot.slane %v160_v55, 1  ;;  %v125_v59 = vrot.slane %v124_v58, 1 }
  0x9c   :  { %v172_v60 = vsel %vm4940_vm14, %v169_v54, %v170_v56  ;;  %vm81_vm14 = vcmask 1031168  }
  0x9d   :  { %v163_v61 = vsel %vm162_vm11, %v160_v55, %v161_v57  ;;  %175 = vst.msk [vmem:[#allocation2 + $0x34] ss:$8 sm:$0xf] %vm3703_vm0, %v172_v60  ;;  %v127_v62 = vsel %vm4939_vm9, %v124_v58, %v125_v59  ;;  %vm4943_vm9 = vcmask 1022976  }
  0x9e   :  { %176 = vst.msk [vmem:[#allocation2 + $0x34] ss:$8 sm:$0x30] %vm3703_vm0, %v172_v60 }
  0x9f   :  { %166 = vst.msk [vmem:[#allocation2 + $0x33] ss:$8 sm:$0xf] %vm3703_vm0, %v163_v61 }
  0xa0   :  { %167 = vst.msk [vmem:[#allocation2 + $0x33] ss:$8 sm:$0x30] %vm3703_vm0, %v163_v61 }
  0xa1   :  { %v196_v63 = vpop.permute.xlu1 %195  ;;  %130 = vst.msk [vmem:[#allocation2 + $0x7] ss:$8 sm:$0xf] %vm3703_vm0, %v127_v62 }
  0xa2   :  { %v187_v0 = vpop.permute.xlu0 %186  ;;  %v197_v1 = vrot.slane %v196_v63, 1  ;;  %131 = vst.msk [vmem:[#allocation2 + $0x7] ss:$8 sm:$0x30] %vm3703_vm0, %v127_v62 }
  0xa3   :  { %v188_v3 = vrot.slane %v187_v0, 1 }
  0xa4   :  { %v199_v4 = vsel %vm4944_vm6, %v196_v63, %v197_v1  ;;  %vm108_vm6 = vcmask 818176   ;;  %v565_v63 = vld [vmem:[#allocation4 + $0xf0] sm:$0xff]  ;;  %v563_v1 = vld [vmem:[#allocation4 + $0xe0] sm:$0xff] }
  0xa5   :  { %v190_v5 = vsel %vm189_vm1, %v187_v0, %v188_v3  ;;  %202 = vst.msk [vmem:[#allocation2 + $0x37] ss:$8 sm:$0xf] %vm3703_vm0, %v199_v4  ;;  %v597_v0 = vld [vmem:[#allocation4 + $0x1f0] sm:$0xff]  ;;  %705 = vmatpush.msra.mxu2 %v565_v63  ;;  %v571_v63 = vld [vmem:[#allocation4 + $0x120] sm:$0xff] }
  0xa6   :  { %203 = vst.msk [vmem:[#allocation2 + $0x37] ss:$8 sm:$0x30] %vm3703_vm0, %v199_v4  ;;  %v595_v4 = vld [vmem:[#allocation4 + $0x1e0] sm:$0xff] }
  0xa7   :  { %193 = vst.msk [vmem:[#allocation2 + $0x36] ss:$8 sm:$0xf] %vm3703_vm0, %v190_v5  ;;  %706 = vmatpush.msra.mxu2 %v563_v1  ;;  %v643_v1 = vld [vmem:[#allocation4 + $0x360] sm:$0xff] }
  0xa8   :  { %194 = vst.msk [vmem:[#allocation2 + $0x36] ss:$8 sm:$0x30] %vm3703_vm0, %v190_v5 }
  0xa9   :  { %v88_v6 = vpop.permute.xlu1 %87 }
  0xaa   :  { %v79_v7 = vpop.permute.xlu0 %78  ;;  %v89_v8 = vrot.slane %v88_v6, 1 }
  0xab   :  { %v80_v9 = vrot.slane %v79_v7, 1 }
  0xac   :  { %v91_v12 = vsel %vm4943_vm9, %v88_v6, %v89_v8  ;;  %vm4968_vm9 = vcmask 809984   ;;  %v561_v6 = vld [vmem:[#allocation4 + $0xd0] sm:$0xff]  ;;  %v559_v8 = vld [vmem:[#allocation4 + $0xc0] sm:$0xff] }
  0xad   :  { %v82_v13 = vsel %vm81_vm14, %v79_v7, %v80_v9  ;;  %94 = vst.msk [vmem:[#allocation2 + $0x3] ss:$8 sm:$0xf] %vm3703_vm0, %v91_v12  ;;  %v593_v7 = vld [vmem:[#allocation4 + $0x1d0] sm:$0xff]  ;;  %v591_v9 = vld [vmem:[#allocation4 + $0x1c0] sm:$0xff]  ;;  %707 = vmatpush.msra.mxu2 %v561_v6 }
  0xae   :  { %95 = vst.msk [vmem:[#allocation2 + $0x3] ss:$8 sm:$0x30] %vm3703_vm0, %v91_v12  ;;  %v292_v14 = vld [vmem:[#allocation2 + $0x30] sm:$0xff]  ;;  %v293_v15 = vld [vmem:[#allocation2 + $0x38] sm:$0xff]  ;;  %v295_v16 = vld [vmem:[#allocation2 + $0x48] sm:$0xff] }
  0xaf   :  { %85 = vst.msk [vmem:[#allocation2 + $0x2] ss:$8 sm:$0xf] %vm3703_vm0, %v82_v13  ;;  %353 = vmatpush.msra.mxu0 %v292_v14  ;;  %373 = vmatpush.msra.mxu1 %v293_v15  ;;  %v294_v31 = vld [vmem:[#allocation2 + $0x40] sm:$0xff]  ;;  %v297_v32 = vld [vmem:[#allocation2 + $0x58] sm:$0xff]  ;;  %v296_v37 = vld [vmem:[#allocation2 + $0x50] sm:$0xff] }
  0xb0   :  { %86 = vst.msk [vmem:[#allocation2 + $0x2] ss:$8 sm:$0x30] %vm3703_vm0, %v82_v13  ;;  %413 = vmatpush.msra.mxu3 %v295_v16  ;;  %v629_v12 = vld [vmem:[#allocation4 + $0x2f0] sm:$0xff]  ;;  %708 = vmatpush.msra.mxu2 %v559_v8  ;;  %v627_v14 = vld [vmem:[#allocation4 + $0x2e0] sm:$0xff] }
  0xb1   :  { %v115_v17 = vpop.permute.xlu1 %114  ;;  %v661_v13 = vld [vmem:[#allocation4 + $0x3f0] sm:$0xff]  ;;  %v659_v15 = vld [vmem:[#allocation4 + $0x3e0] sm:$0xff] }
  0xb2   :  { %v106_v18 = vpop.permute.xlu0 %105  ;;  %v116_v19 = vrot.slane %v115_v17, 1  ;;  %v555_v16 = vld [vmem:[#allocation4 + $0xa0] sm:$0xff]  ;;  %709 = vmatpush.msra.mxu2 %v557_v10  ;;  %v569_v6 = vld [vmem:[#allocation4 + $0x110] sm:$0xff] }
  0xb3   :  { %v107_v20 = vrot.slane %v106_v18, 1  ;;  %v535_v10 = vld [vmem:[#allocation4] sm:$0xff] }
  0xb4   :  { %v118_v21 = vsel %vm4968_vm9, %v115_v17, %v116_v19  ;;  %v587_v17 = vld [vmem:[#allocation4 + $0x1a0] sm:$0xff]  ;;  %v657_v19 = vld [vmem:[#allocation4 + $0x3d0] sm:$0xff]  ;;  %710 = vmatpush.msra.mxu2 %v555_v16  ;;  %vm1013_vm9 = vcmask 646144  }
  0xb5   :  { %v109_v22 = vsel %vm108_vm6, %v106_v18, %v107_v20  ;;  %121 = vst.msk [vmem:[#allocation2 + $0x6] ss:$8 sm:$0xf] %vm3703_vm0, %v118_v21  ;;  %v625_v18 = vld [vmem:[#allocation4 + $0x2d0] sm:$0xff]  ;;  %v691_v16 = vld [vmem:[#allocation4 + $0x4e0] sm:$0xff] }
  0xb6   :  { %122 = vst.msk [vmem:[#allocation2 + $0x6] ss:$8 sm:$0x30] %vm3703_vm0, %v118_v21  ;;  %v553_v20 = vld [vmem:[#allocation4 + $0x90] sm:$0xff] }
  0xb7   :  { %112 = vst.msk [vmem:[#allocation2 + $0x5] ss:$8 sm:$0xf] %vm3703_vm0, %v109_v22  ;;  %v585_v21 = vld [vmem:[#allocation4 + $0x190] sm:$0xff]  ;;  %711 = vmatpush.msra.mxu2 %v553_v20 }
  0xb8   :  { %113 = vst.msk [vmem:[#allocation2 + $0x5] ss:$8 sm:$0x30] %vm3703_vm0, %v109_v22  ;;  %v623_v22 = vld [vmem:[#allocation4 + $0x2c0] sm:$0xff]  ;;  %v685_v20 = vld [vmem:[#allocation4 + $0x4b0] sm:$0xff] }
  0xbe   :  { %v286_v24 = vld [vmem:[#allocation2] sm:$0xff]  ;;  %v287_v25 = vld [vmem:[#allocation2 + $0x8] sm:$0xff]  ;;  %v289_v26 = vld [vmem:[#allocation2 + $0x18] sm:$0xff] }
  0xbf   :  { %354 = vmatpush.msra.mxu0 %v286_v24  ;;  %374 = vmatpush.msra.mxu1 %v287_v25  ;;  %v288_v33 = vld [vmem:[#allocation2 + $0x10] sm:$0xff]  ;;  %v291_v34 = vld [vmem:[#allocation2 + $0x28] sm:$0xff]  ;;  %v290_v38 = vld [vmem:[#allocation2 + $0x20] sm:$0xff] }
  0xc0   :  { %414 = vmatpush.msra.mxu3 %v289_v26  ;;  %3298 = vmatmul.msk.f32.vlgmr.msra.gmra.mxu0 %vm4946_vm3, %v285_v23  ;;  %v551_v24 = vld [vmem:[#allocation4 + $0x80] sm:$0xff]  ;;  %v621_v26 = vld [vmem:[#allocation4 + $0x2b0] sm:$0xff] }
  0xc1   :  { %3300 = vmatmul.msk.f32.vlgmr.msra.gmra.mxu1 %vm4946_vm3, %v285_v23  ;;  %3301 = vmatpush.msk.msrb.mxu0 %vm4947_vm10, %v306_v27  ;;  %v583_v25 = vld [vmem:[#allocation4 + $0x180] sm:$0xff]  ;;  %v653_v27 = vld [vmem:[#allocation4 + $0x3b0] sm:$0xff] }
  0xc2   :  { %3304 = vmatmul.msk.f32.vlgmr.msra.gmra.mxu3 %vm4946_vm3, %v285_v23  ;;  %3307 = vmatpush.msk.msrb.mxu1 %vm4947_vm10, %v309_v28 }
  0xc3   :  { %392 = vmatpush.msrb.mxu0 %v300_v29  ;;  %725 = vmatpush.msrb.mxu3 %v597_v0  ;;  %v549_v29 = vld [vmem:[#allocation4 + $0x70] sm:$0xff] }
  0xc4   :  { %452 = vmatpush.msrb.mxu1 %v303_v30  ;;  %v581_v30 = vld [vmem:[#allocation4 + $0x170] sm:$0xff]  ;;  %712 = vmatpush.msra.mxu2 %v551_v24  ;;  %v683_v24 = vld [vmem:[#allocation4 + $0x4a0] sm:$0xff] }
  0xc5   :  { %393 = vmatpush.msrb.mxu0 %v294_v31  ;;  %726 = vmatpush.msrb.mxu3 %v595_v4  ;;  %v537_v4 = vld [vmem:[#allocation4 + $0x10] sm:$0xff] }
  0xc6   :  { %453 = vmatpush.msrb.mxu1 %v297_v32  ;;  %713 = vmatpush.msra.mxu2 %v549_v29  ;;  %v554_v29 = vld [vmem:[#allocation4 + $0x98] sm:$0xff] }
  0xc7   :  { %394 = vmatpush.msrb.mxu0 %v288_v33  ;;  %727 = vmatpush.msrb.mxu3 %v593_v7  ;;  %v619_v33 = vld [vmem:[#allocation4 + $0x2a0] sm:$0xff]  ;;  %v641_v7 = vld [vmem:[#allocation4 + $0x350] sm:$0xff] }
  0xc8   :  { %454 = vmatpush.msrb.mxu1 %v291_v34  ;;  %3302 = vmatmul.msk.f32.vlgmr.msrb.gmra.mxu0 %vm4946_vm3, %v285_v23  ;;  %v651_v34 = vld [vmem:[#allocation4 + $0x3a0] sm:$0xff] }
  0xc9   :  { %3305 = vmatpush.msk.msra.mxu0 %vm4947_vm10, %v308_v35  ;;  %3308 = vmatmul.msk.f32.vlgmr.msrb.gmra.mxu1 %vm4946_vm3, %v285_v23  ;;  %v547_v35 = vld [vmem:[#allocation4 + $0x60] sm:$0xff]  ;;  %vm905_vm10 = vcmask 750592  }
  0xca   :  { %728 = vmatpush.msrb.mxu3 %v591_v9  ;;  %765 = vmatpush.msra.mxu1 %v661_v13 }
  0xcb   :  { %432 = vmatpush.msra.mxu0 %v302_v36  ;;  %v579_v36 = vld [vmem:[#allocation4 + $0x160] sm:$0xff]  ;;  %714 = vmatpush.msra.mxu2 %v547_v35 }
  0xcc   :  { %729 = vmatpush.msrb.mxu3 %v589_v11  ;;  %766 = vmatpush.msra.mxu1 %v659_v15  ;;  %v567_v11 = vld [vmem:[#allocation4 + $0x100] sm:$0xff]  ;;  %v566_v15 = vld [vmem:[#allocation4 + $0xf8] sm:$0xff] }
  0xcd   :  { %433 = vmatpush.msra.mxu0 %v296_v37  ;;  %v631_v35 = vld [vmem:[#allocation4 + $0x300] sm:$0xff] }
  0xce   :  { %730 = vmatpush.msrb.mxu3 %v587_v17  ;;  %767 = vmatpush.msra.mxu1 %v657_v19  ;;  %v564_v17 = vld [vmem:[#allocation4 + $0xe8] sm:$0xff] }
  0xcf   :  { %434 = vmatpush.msra.mxu0 %v290_v38  ;;  %v560_v19 = vld [vmem:[#allocation4 + $0xc8] sm:$0xff] }
  0xd0   :  { %3306 = vmatmul.msk.f32.vlgmr.msra.gmra.mxu0 %vm4946_vm3, %v285_v23  ;;  %v655_v23 = vld [vmem:[#allocation4 + $0x3c0] sm:$0xff]  ;;  %731 = vmatpush.msrb.mxu3 %v585_v21  ;;  %vm698_vm3 = vcmask 1046528   ;;  %v558_v21 = vld [vmem:[#allocation4 + $0xb8] sm:$0xff] }
  0xd1   :  { %745 = vmatpush.msrb.mxu0 %v629_v12  ;;  %768 = vmatpush.msra.mxu1 %v655_v23  ;;  %v637_v23 = vld [vmem:[#allocation4 + $0x330] sm:$0xff] }
  0xd2   :  { %732 = vmatpush.msrb.mxu3 %v583_v25  ;;  %v556_v25 = vld [vmem:[#allocation4 + $0xa8] sm:$0xff] }
  0xd3   :  { %746 = vmatpush.msrb.mxu0 %v627_v14  ;;  %769 = vmatpush.msra.mxu1 %v653_v27  ;;  %v693_v14 = vld [vmem:[#allocation4 + $0x4f0] sm:$0x7f]  ;;  %v635_v27 = vld [vmem:[#allocation4 + $0x320] sm:$0xff] }
  0xd4   :  { %733 = vmatpush.msrb.mxu3 %v581_v30  ;;  %v601_v30 = vld [vmem:[#allocation4 + $0x210] sm:$0xff] }
  0xd5   :  { %747 = vmatpush.msrb.mxu0 %v625_v18  ;;  %770 = vmatpush.msra.mxu1 %v651_v34  ;;  %v687_v18 = vld [vmem:[#allocation4 + $0x4c0] sm:$0xff] }
  0xd6   :  { %734 = vmatpush.msrb.mxu3 %v579_v36  ;;  %v599_v34 = vld [vmem:[#allocation4 + $0x200] sm:$0xff]  ;;  %v677_v36 = vld [vmem:[#allocation4 + $0x470] sm:$0xff] }
  0xd7   :  { %748 = vmatpush.msrb.mxu0 %v623_v22  ;;  %v605_v22 = vld [vmem:[#allocation4 + $0x230] sm:$0xff] }
  0xd9   :  { %749 = vmatpush.msrb.mxu0 %v621_v26  ;;  %v603_v26 = vld [vmem:[#allocation4 + $0x220] sm:$0xff] }
  0xdb   :  { %750 = vmatpush.msrb.mxu0 %v619_v33  ;;  %v552_v33 = vld [vmem:[#allocation4 + $0x88] sm:$0xff] }
  0xeb   :  { %v314_v39 = vpop.permute.xlu0 %313 }
 0x13d   :  { %v356_v40 = vpop.f32.mrf.mxu0 }
 0x13e   :  { %v3861_v41 = vadd.f32 %v356_v40, %v314_v39  ;;  %v376_v42 = vpop.f32.mrf.mxu1  ;;  %v649_v40 = vld [vmem:[#allocation4 + $0x390] sm:$0xff] }
 0x13f   :  { %v3863_v43 = vadd.f32 %v376_v42, %v314_v39  ;;  %771 = vmatpush.msra.mxu1 %v649_v40  ;;  %v675_v40 = vld [vmem:[#allocation4 + $0x460] sm:$0xff] }
 0x140   :  { %v459_v44 = vmax.f32 %v3861_v41, 0.0  ;;  %v647_v41 = vld [vmem:[#allocation4 + $0x380] sm:$0xff] }
 0x141   :  { %v460_v45 = vmax.f32 %v3863_v43, 0.0  ;;  %v613_v43 = vld [vmem:[#allocation4 + $0x270] sm:$0xff]  ;;  %772 = vmatpush.msra.mxu1 %v647_v41  ;;  %v626_v41 = vld [vmem:[#allocation4 + $0x2d8] sm:$0xff] }
 0x143   :  { %v3488_v46 = vpack.i.bf16 %v460_v45, %v459_v44 }
 0x145   :  { %v416_v47 = vpop.f32.mrf.mxu3  ;;  %3489 = vrot.lane.b32.xlu1 %v3488_v46, %s3586_s16  ;;  %v396_v49 = vpop.f32.mrf.mxu0 }
 0x146   :  { %v3872_v48 = vadd.f32 %v416_v47, %v314_v39  ;;  %v397_v50 = vadd.f32 %v396_v49, %v314_v39  ;;  %v456_v54 = vpop.f32.mrf.mxu1  ;;  %v545_v47 = vld [vmem:[#allocation4 + $0x50] sm:$0xff] }
 0x147   :  { %v3878_v56 = vadd.f32 %v456_v54, %v314_v39  ;;  %v577_v49 = vld [vmem:[#allocation4 + $0x150] sm:$0xff]  ;;  %v575_v54 = vld [vmem:[#allocation4 + $0x140] sm:$0xff]  ;;  %715 = vmatpush.msra.mxu2 %v545_v47  ;;  %v548_v47 = vld [vmem:[#allocation4 + $0x68] sm:$0xff] }
 0x148   :  { %v462_v51 = vmax.f32 %v3872_v48, 0.0  ;;  %v461_v52 = vmax.f32 %v397_v50, 0.0  ;;  %v615_v50 = vld [vmem:[#allocation4 + $0x280] sm:$0xff]  ;;  %735 = vmatpush.msrb.mxu3 %v577_v49  ;;  %v689_v48 = vld [vmem:[#allocation4 + $0x4d0] sm:$0xff]  ;;  %v596_v49 = vld [vmem:[#allocation4 + $0x1e8] sm:$0xff] }
 0x149   :  { %v464_v59 = vmax.f32 %v3878_v56, 0.0 }
 0x14a   :  { %v3493_v53 = vpack.i.bf16 %v462_v51, %v461_v52  ;;  %736 = vmatpush.msrb.mxu3 %v575_v54  ;;  %v594_v54 = vld [vmem:[#allocation4 + $0x1d8] sm:$0xff] }
 0x14c   :  { %3494 = vrot.lane.b32.xlu2 %v3493_v53, %s3586_s16  ;;  %v543_v53 = vld [vmem:[#allocation4 + $0x40] sm:$0xff] }
 0x14d   :  { %v436_v55 = vpop.f32.mrf.mxu0  ;;  %716 = vmatpush.msra.mxu2 %v543_v53  ;;  %v546_v53 = vld [vmem:[#allocation4 + $0x58] sm:$0xff] }
 0x14e   :  { %v437_v57 = vadd.f32 %v436_v55, %v314_v39  ;;  %v617_v39 = vld [vmem:[#allocation4 + $0x290] sm:$0xff] }
 0x14f   :  { %751 = vmatpush.msrb.mxu0 %v617_v39  ;;  %v645_v55 = vld [vmem:[#allocation4 + $0x370] sm:$0xff]  ;;  %v630_v39 = vld [vmem:[#allocation4 + $0x2f8] sm:$0xff] }
 0x150   :  { %v3880_v58 = vmax.f32 %v437_v57, 0.0  ;;  %v611_v57 = vld [vmem:[#allocation4 + $0x260] sm:$0xff]  ;;  %773 = vmatpush.msra.mxu1 %v645_v55  ;;  %v624_v55 = vld [vmem:[#allocation4 + $0x2c8] sm:$0xff] }
 0x151   :  { %752 = vmatpush.msrb.mxu0 %v615_v50  ;;  %v628_v50 = vld [vmem:[#allocation4 + $0x2e8] sm:$0xff] }
 0x152   :  { %478 = vrot.lane.b32.xlu1 %v3880_v58, %s3586_s16  ;;  %774 = vmatpush.msra.mxu1 %v643_v1  ;;  %v667_v1 = vld [vmem:[#allocation4 + $0x420] sm:$0xff] }
 0x153   :  { %753 = vmatpush.msrb.mxu0 %v613_v43  ;;  %v671_v43 = vld [vmem:[#allocation4 + $0x440] sm:$0xff] }
 0x154   :  { %495 = vrot.lane.b32.xlu2 %v464_v59, %s3586_s16  ;;  %775 = vmatpush.msra.mxu1 %v641_v7  ;;  %v665_v7 = vld [vmem:[#allocation4 + $0x410] sm:$0xff] }
 0x155   :  { %754 = vmatpush.msrb.mxu0 %v611_v57  ;;  %v669_v57 = vld [vmem:[#allocation4 + $0x430] sm:$0xff] }
 0x1a6   :  { %v3888_v60 = vpop.permute.xlu2 %3494 }
 0x1a7   :  { %v3497_v61 = vunpack.i.h.bf16 %v3888_v60  ;;  %v3496_v62 = vunpack.i.l.bf16 %v3888_v60  ;;  %v607_v60 = vld [vmem:[#allocation4 + $0x240] sm:$0xff] }
 0x1a9   :  { %v482_v3 = vsel %vm4969_vm13, %v3496_v62, %v3497_v61 }
 0x1aa   :  { %v3897_v5 = vmax.f32 %v461_v52, %v482_v3  ;;  %v609_v3 = vld [vmem:[#allocation4 + $0x250] sm:$0xff] }
 0x1ab   :  { %755 = vmatpush.msrb.mxu0 %v609_v3  ;;  %v540_v3 = vld [vmem:[#allocation4 + $0x28] sm:$0xff] }
 0x1ac   :  { %512 = vrot.lane.b32.xlu1 %v3897_v5, %s4959_s29 }
 0x1ad   :  { %756 = vmatpush.msrb.mxu0 %v607_v60  ;;  %v614_v60 = vld [vmem:[#allocation4 + $0x278] sm:$0xff] }
 0x1ae   :  { %v496_v0 = vpop.permute.xlu2 %495 }
 0x1af   :  { %v501_v8 = vmax.f32 %v464_v59, %v496_v0  ;;  %757 = vmatpush.msrb.mxu0 %v605_v22  ;;  %v604_v22 = vld [vmem:[#allocation4 + $0x228] sm:$0xff] }
 0x1b1   :  { %758 = vmatpush.msrb.mxu0 %v603_v26  ;;  %v600_v26 = vld [vmem:[#allocation4 + $0x208] sm:$0xff] }
 0x1b3   :  { %759 = vmatpush.msrb.mxu0 %v601_v30 }
 0x1b5   :  { %760 = vmatpush.msrb.mxu0 %v599_v34 }
 0x1b7   :  { %v3490_v28 = vpop.permute.xlu1 %3489 }
 0x1b8   :  { %v3492_v31 = vunpack.i.h.bf16 %v3490_v28  ;;  %v3491_v32 = vunpack.i.l.bf16 %v3490_v28  ;;  %v681_v28 = vld [vmem:[#allocation4 + $0x490] sm:$0xff] }
 0x1ba   :  { %v481_v37 = vsel %vm4969_vm13, %v3492_v31, %v3496_v62  ;;  %v480_v38 = vsel %vm4969_vm13, %v3491_v32, %v3492_v31  ;;  %v539_v62 = vld [vmem:[#allocation4 + $0x20] sm:$0xff]  ;;  %v633_v31 = vld [vmem:[#allocation4 + $0x310] sm:$0xff] }
 0x1bb   :  { %v3907_v42 = vmax.f32 %v459_v44, %v480_v38  ;;  %v3911_v46 = vmax.f32 %v460_v45, %v481_v37  ;;  %v541_v44 = vld [vmem:[#allocation4 + $0x30] sm:$0xff]  ;;  %v679_v32 = vld [vmem:[#allocation4 + $0x480] sm:$0xff]  ;;  %v550_v37 = vld [vmem:[#allocation4 + $0x78] sm:$0xff] }
 0x1bc   :  { %v573_v45 = vld [vmem:[#allocation4 + $0x130] sm:$0xff]  ;;  %717 = vmatpush.msra.mxu2 %v541_v44  ;;  %v598_v38 = vld [vmem:[#allocation4 + $0x1f8] sm:$0xff]  ;;  %v544_v44 = vld [vmem:[#allocation4 + $0x48] sm:$0xff] }
 0x1bd   :  { %v3498_v52 = vpack.i.bf16 %v3911_v46, %v3907_v42  ;;  %737 = vmatpush.msrb.mxu3 %v573_v45  ;;  %825 = vmatpush.msra.mxu0 %v598_v38  ;;  %v592_v45 = vld [vmem:[#allocation4 + $0x1c8] sm:$0xff] }
 0x1be   :  { %718 = vmatpush.msra.mxu2 %v539_v62  ;;  %v542_v62 = vld [vmem:[#allocation4 + $0x38] sm:$0xff]  ;;  %v692_v38 = vld [vmem:[#allocation4 + $0x4e8] sm:$0xff] }
 0x1bf   :  { %3499 = vrot.lane.b32.xlu0 %v3498_v52, %s4959_s29  ;;  %738 = vmatpush.msrb.mxu3 %v571_v63  ;;  %v673_v52 = vld [vmem:[#allocation4 + $0x450] sm:$0xff]  ;;  %v590_v63 = vld [vmem:[#allocation4 + $0x1b8] sm:$0xff] }
 0x1c0   :  { %719 = vmatpush.msra.mxu2 %v537_v4  ;;  %826 = vmatpush.msra.mxu0 %v596_v49  ;;  %v588_v4 = vld [vmem:[#allocation4 + $0x1a8] sm:$0xff] }
 0x1c1   :  { %739 = vmatpush.msrb.mxu3 %v569_v6  ;;  %v620_v6 = vld [vmem:[#allocation4 + $0x2a8] sm:$0xff] }
 0x1c2   :  { %720 = vmatpush.msra.mxu2 %v535_v10  ;;  %827 = vmatpush.msra.mxu0 %v594_v54  ;;  %v586_v10 = vld [vmem:[#allocation4 + $0x198] sm:$0xff] }
 0x1c3   :  { %740 = vmatpush.msrb.mxu3 %v567_v11  ;;  %v618_v11 = vld [vmem:[#allocation4 + $0x298] sm:$0xff] }
 0x1c4   :  { %v3918_v9 = vpop.permute.xlu1 %478  ;;  %3309 = vmatpush.msk.msrb.mxu2 %vm698_vm3, %v693_v14  ;;  %828 = vmatpush.msra.mxu0 %v592_v45  ;;  %v616_v14 = vld [vmem:[#allocation4 + $0x288] sm:$0xff] }
 0x1c5   :  { %v483_v12 = vsel %vm4969_vm13, %v3497_v61, %v3918_v9  ;;  %v497_v13 = vsel %vm4969_vm13, %v3918_v9, %v496_v0  ;;  %v639_v61 = vld [vmem:[#allocation4 + $0x340] sm:$0xff]  ;;  %805 = vmatpush.msra.mxu3 %v566_v15  ;;  %v622_v0 = vld [vmem:[#allocation4 + $0x2b8] sm:$0xff] }
 0x1c6   :  { %v500_v56 = vmax.f32 %v3880_v58, %v497_v13  ;;  %v3930_v59 = vmax.f32 %v462_v51, %v483_v12  ;;  %v562_v51 = vld [vmem:[#allocation4 + $0xd8] sm:$0xff]  ;;  %776 = vmatpush.msra.mxu1 %v639_v61  ;;  %786 = vmatpush.msrb.mxu2 %v691_v16  ;;  %v663_v12 = vld [vmem:[#allocation4 + $0x400] sm:$0xff]  ;;  %v536_v13 = vld [vmem:[#allocation4 + $0x8] sm:$0xff] }
 0x1c7   :  { %518 = vrot.lane.b32.xlu0 %v501_v8, %s4959_s29  ;;  %806 = vmatpush.msra.mxu3 %v564_v17  ;;  %v538_v8 = vld [vmem:[#allocation4 + $0x18] sm:$0xff]  ;;  %v580_v61 = vld [vmem:[#allocation4 + $0x168] sm:$0xff] }
 0x1c8   :  { %516 = vrot.lane.b32.xlu2 %v500_v56, %s4959_s29  ;;  %514 = vrot.lane.b32.xlu1 %v3930_v59, %s4959_s29  ;;  %v584_v56 = vld [vmem:[#allocation4 + $0x188] sm:$0xff]  ;;  %v582_v15 = vld [vmem:[#allocation4 + $0x178] sm:$0xff] }
 0x1c9   :  { %787 = vmatpush.msrb.mxu2 %v689_v48  ;;  %807 = vmatpush.msra.mxu3 %v562_v51  ;;  %v612_v16 = vld [vmem:[#allocation4 + $0x268] sm:$0xff]  ;;  %v578_v17 = vld [vmem:[#allocation4 + $0x158] sm:$0xff] }
 0x1ca   :  { %777 = vmatpush.msra.mxu1 %v637_v23  ;;  %829 = vmatpush.msra.mxu0 %v590_v63  ;;  %v610_v48 = vld [vmem:[#allocation4 + $0x258] sm:$0xff]  ;;  %v576_v51 = vld [vmem:[#allocation4 + $0x148] sm:$0xff] }
 0x1cb   :  { %788 = vmatpush.msrb.mxu2 %v687_v18  ;;  %808 = vmatpush.msra.mxu3 %v560_v19  ;;  %v608_v18 = vld [vmem:[#allocation4 + $0x248] sm:$0xff]  ;;  %v574_v19 = vld [vmem:[#allocation4 + $0x138] sm:$0xff] }
 0x1cc   :  { %778 = vmatpush.msra.mxu1 %v635_v27  ;;  %830 = vmatpush.msra.mxu0 %v588_v4  ;;  %v570_v23 = vld [vmem:[#allocation4 + $0x118] sm:$0xff]  ;;  %v676_v4 = vld [vmem:[#allocation4 + $0x468] sm:$0xff] }
 0x1cd   :  { %789 = vmatpush.msrb.mxu2 %v685_v20  ;;  %809 = vmatpush.msra.mxu3 %v558_v21  ;;  %v606_v20 = vld [vmem:[#allocation4 + $0x238] sm:$0xff]  ;;  %v572_v21 = vld [vmem:[#allocation4 + $0x128] sm:$0xff] }
 0x1ce   :  { %779 = vmatpush.msra.mxu1 %v633_v31  ;;  %831 = vmatpush.msra.mxu0 %v586_v10  ;;  %v682_v63 = vld [vmem:[#allocation4 + $0x498] sm:$0xff]  ;;  %v672_v10 = vld [vmem:[#allocation4 + $0x448] sm:$0xff] }
 0x1cf   :  { %790 = vmatpush.msrb.mxu2 %v683_v24  ;;  %810 = vmatpush.msra.mxu3 %v556_v25  ;;  %v602_v24 = vld [vmem:[#allocation4 + $0x218] sm:$0xff]  ;;  %v568_v25 = vld [vmem:[#allocation4 + $0x108] sm:$0xff] }
 0x1d0   :  { %780 = vmatpush.msra.mxu1 %v631_v35  ;;  %832 = vmatpush.msra.mxu0 %v584_v56  ;;  %v662_v35 = vld [vmem:[#allocation4 + $0x3f8] sm:$0xff]  ;;  %v668_v56 = vld [vmem:[#allocation4 + $0x428] sm:$0xff] }
 0x1d1   :  { %791 = vmatpush.msrb.mxu2 %v681_v28  ;;  %811 = vmatpush.msra.mxu3 %v554_v29 }
 0x1d2   :  { %845 = vmatpush.msrb.mxu1 %v630_v39  ;;  %833 = vmatpush.msra.mxu0 %v582_v15  ;;  %v666_v15 = vld [vmem:[#allocation4 + $0x418] sm:$0xff] }
 0x1d3   :  { %792 = vmatpush.msrb.mxu2 %v679_v32  ;;  %812 = vmatpush.msra.mxu3 %v552_v33 }
 0x1d4   :  { %846 = vmatpush.msrb.mxu1 %v628_v50  ;;  %834 = vmatpush.msra.mxu0 %v580_v61  ;;  %v664_v61 = vld [vmem:[#allocation4 + $0x408] sm:$0xff] }
 0x1d5   :  { %793 = vmatpush.msrb.mxu2 %v677_v36  ;;  %813 = vmatpush.msra.mxu3 %v550_v37  ;;  %v694_v36 = vld [vmem:[#allocation4 + $0x4f8] sm:$0x7f]  ;;  %v660_v37 = vld [vmem:[#allocation4 + $0x3e8] sm:$0xff] }
 0x1d6   :  { %847 = vmatpush.msrb.mxu1 %v626_v41  ;;  %835 = vmatpush.msra.mxu0 %v578_v17 }
 0x1d7   :  { %794 = vmatpush.msrb.mxu2 %v675_v40  ;;  %814 = vmatpush.msra.mxu3 %v548_v47  ;;  %v658_v40 = vld [vmem:[#allocation4 + $0x3d8] sm:$0xff] }
 0x1d8   :  { %848 = vmatpush.msrb.mxu1 %v624_v55  ;;  %836 = vmatpush.msra.mxu0 %v576_v51  ;;  %v690_v47 = vld [vmem:[#allocation4 + $0x4d8] sm:$0xff] }
 0x1d9   :  { %795 = vmatpush.msrb.mxu2 %v673_v52  ;;  %815 = vmatpush.msra.mxu3 %v546_v53  ;;  %v656_v52 = vld [vmem:[#allocation4 + $0x3c8] sm:$0xff]  ;;  %v493_v53 = vmax.f32 %v3880_v58, %v3918_v9  ;;  %v654_v55 = vld [vmem:[#allocation4 + $0x3b8] sm:$0xff] }
 0x1da   :  { %849 = vmatpush.msrb.mxu1 %v622_v0  ;;  %837 = vmatpush.msra.mxu0 %v574_v19  ;;  %v652_v58 = vld [vmem:[#allocation4 + $0x3a8] sm:$0xff]  ;;  %v646_v0 = vld [vmem:[#allocation4 + $0x378] sm:$0xff] }
 0x1db   :  { %796 = vmatpush.msrb.mxu2 %v671_v43  ;;  %816 = vmatpush.msra.mxu3 %v544_v44  ;;  %v684_v9 = vld [vmem:[#allocation4 + $0x4a8] sm:$0xff] }
 0x1dc   :  { %850 = vmatpush.msrb.mxu1 %v620_v6  ;;  %838 = vmatpush.msra.mxu0 %v572_v21  ;;  %v642_v6 = vld [vmem:[#allocation4 + $0x358] sm:$0xff] }
 0x1dd   :  { %797 = vmatpush.msrb.mxu2 %v669_v57  ;;  %817 = vmatpush.msra.mxu3 %v542_v62  ;;  %v686_v57 = vld [vmem:[#allocation4 + $0x4b8] sm:$0xff] }
 0x1de   :  { %851 = vmatpush.msrb.mxu1 %v618_v11  ;;  %839 = vmatpush.msra.mxu0 %v570_v23  ;;  %v650_v62 = vld [vmem:[#allocation4 + $0x398] sm:$0xff] }
 0x1df   :  { %798 = vmatpush.msrb.mxu2 %v667_v1  ;;  %818 = vmatpush.msra.mxu3 %v540_v3  ;;  %v678_v1 = vld [vmem:[#allocation4 + $0x478] sm:$0xff]  ;;  %v644_v3 = vld [vmem:[#allocation4 + $0x368] sm:$0xff] }
 0x1e0   :  { %852 = vmatpush.msrb.mxu1 %v616_v14  ;;  %840 = vmatpush.msra.mxu0 %v568_v25  ;;  %v638_v11 = vld [vmem:[#allocation4 + $0x338] sm:$0xff] }
 0x1e1   :  { %799 = vmatpush.msrb.mxu2 %v665_v7  ;;  %819 = vmatpush.msra.mxu3 %v538_v8  ;;  %v674_v7 = vld [vmem:[#allocation4 + $0x458] sm:$0xff]  ;;  %v640_v8 = vld [vmem:[#allocation4 + $0x348] sm:$0xff] }
 0x1e2   :  { %853 = vmatpush.msrb.mxu1 %v614_v60  ;;  %v634_v14 = vld [vmem:[#allocation4 + $0x318] sm:$0xff]  ;;  %v632_v60 = vld [vmem:[#allocation4 + $0x308] sm:$0xff] }
 0x1e3   :  { %800 = vmatpush.msrb.mxu2 %v663_v12  ;;  %820 = vmatpush.msra.mxu3 %v536_v13  ;;  %v670_v12 = vld [vmem:[#allocation4 + $0x438] sm:$0xff]  ;;  %v636_v13 = vld [vmem:[#allocation4 + $0x328] sm:$0xff] }
 0x1e4   :  { %854 = vmatpush.msrb.mxu1 %v612_v16 }
 0x1e6   :  { %855 = vmatpush.msrb.mxu1 %v610_v48 }
 0x1e8   :  { %856 = vmatpush.msrb.mxu1 %v608_v18 }
 0x1ea   :  { %857 = vmatpush.msrb.mxu1 %v606_v20 }
 0x1ec   :  { %858 = vmatpush.msrb.mxu1 %v604_v22 }
 0x1ee   :  { %859 = vmatpush.msrb.mxu1 %v602_v24 }
 0x1f0   :  { %860 = vmatpush.msrb.mxu1 %v600_v26 }
 0x21e   :  { %v513_v30 = vpop.permute.xlu1 %512 }
 0x222   :  { %v517_v49 = vpop.permute.xlu2 %516 }
 0x231   :  { %v3500_v27 = vpop.permute.xlu0 %3499 }
 0x232   :  { %v3502_v28 = vunpack.i.h.bf16 %v3500_v27  ;;  %v3501_v29 = vunpack.i.l.bf16 %v3500_v27 }
 0x234   :  { %v520_v31 = vsel %vm108_vm6, %v3501_v29, %v3502_v28  ;;  %v521_v32 = vsel %vm108_vm6, %v3502_v28, %v513_v30 }
 0x235   :  { %v530_v33 = vmax.f32 %v3907_v42, %v520_v31  ;;  %v531_v34 = vmax.f32 %v3911_v46, %v521_v32  ;;  %v688_v46 = vld [vmem:[#allocation4 + $0x4c8] sm:$0xff]  ;;  %v1065_v32 = vld [vmem:[%s4918_s5 + $0x8] sm:$0xff] }
 0x237   :  { %721 = vmatmul.f32.vlgmr.msra.gmra.mxu2 %v530_v33  ;;  %741 = vmatmul.f32.vlgmr.msrb.gmra.mxu3 %v531_v34 }
 0x238   :  { %865 = vmatpush.msra.mxu2 %v662_v35  ;;  %3311 = vmatpush.msk.msrb.mxu3 %vm698_vm3, %v694_v36 }
 0x239   :  { %v519_v39 = vpop.permute.xlu0 %518 }
 0x23a   :  { %866 = vmatpush.msra.mxu2 %v660_v37  ;;  %886 = vmatpush.msrb.mxu3 %v692_v38  ;;  %v524_v50 = vsel %vm108_vm6, %v517_v49, %v519_v39  ;;  %v515_v42 = vpop.permute.xlu1 %514 }
 0x23b   :  { %v522_v54 = vsel %vm108_vm6, %v513_v30, %v515_v42  ;;  %v523_v41 = vsel %vm108_vm6, %v515_v42, %v517_v49  ;;  %v534_v45 = vmax.f32 %v493_v53, %v524_v50 }
 0x23c   :  { %867 = vmatpush.msra.mxu2 %v658_v40  ;;  %887 = vmatpush.msrb.mxu3 %v690_v47  ;;  %v532_v43 = vmax.f32 %v3897_v5, %v522_v54  ;;  %v533_v44 = vmax.f32 %v3930_v59, %v523_v41  ;;  %v648_v5 = vld [vmem:[#allocation4 + $0x388] sm:$0xff] }
 0x23d   :  { %v680_v59 = vld [vmem:[#allocation4 + $0x488] sm:$0xff] }
 0x23e   :  { %868 = vmatpush.msra.mxu2 %v656_v52  ;;  %888 = vmatpush.msrb.mxu3 %v688_v46 }
 0x23f   :  { %761 = vmatmul.f32.vlgmr.msrb.gmra.mxu0 %v532_v43  ;;  %781 = vmatmul.f32.vlgmr.msra.gmra.mxu1 %v533_v44 }
 0x240   :  { %3310 = vmatmul.msk.f32.vlgmr.msrb.gmra.mxu2 %vm4969_vm13, %v534_v45  ;;  %821 = vmatmul.f32.vlgmr.msra.gmra.mxu3 %v530_v33 }
 0x241   :  { %869 = vmatpush.msra.mxu2 %v654_v55  ;;  %889 = vmatpush.msrb.mxu3 %v686_v57 }
 0x243   :  { %870 = vmatpush.msra.mxu2 %v652_v58  ;;  %890 = vmatpush.msrb.mxu3 %v684_v9 }
 0x245   :  { %871 = vmatpush.msra.mxu2 %v650_v62  ;;  %891 = vmatpush.msrb.mxu3 %v682_v63 }
 0x247   :  { %872 = vmatpush.msra.mxu2 %v648_v5  ;;  %892 = vmatpush.msrb.mxu3 %v680_v59 }
 0x248   :  { %841 = vmatmul.f32.vlgmr.msra.gmra.mxu0 %v531_v34  ;;  %861 = vmatmul.f32.vlgmr.msrb.gmra.mxu1 %v532_v43 }
 0x249   :  { %873 = vmatpush.msra.mxu2 %v646_v0  ;;  %893 = vmatpush.msrb.mxu3 %v678_v1 }
 0x24b   :  { %874 = vmatpush.msra.mxu2 %v644_v3  ;;  %894 = vmatpush.msrb.mxu3 %v676_v4 }
 0x24d   :  { %875 = vmatpush.msra.mxu2 %v642_v6  ;;  %895 = vmatpush.msrb.mxu3 %v674_v7 }
 0x24f   :  { %876 = vmatpush.msra.mxu2 %v640_v8  ;;  %896 = vmatpush.msrb.mxu3 %v672_v10 }
 0x251   :  { %877 = vmatpush.msra.mxu2 %v638_v11  ;;  %897 = vmatpush.msrb.mxu3 %v670_v12 }
 0x253   :  { %878 = vmatpush.msra.mxu2 %v636_v13  ;;  %898 = vmatpush.msrb.mxu3 %v668_v56 }
 0x255   :  { %879 = vmatpush.msra.mxu2 %v634_v14  ;;  %899 = vmatpush.msrb.mxu3 %v666_v15  ;;  %v1064_v15 = vld [vmem:[%s4918_s5] sm:$0xff] }
 0x257   :  { %880 = vmatpush.msra.mxu2 %v632_v60  ;;  %900 = vmatpush.msrb.mxu3 %v664_v61 }
 0x258   :  { %881 = vmatmul.f32.vlgmr.msra.gmra.mxu2 %v533_v44  ;;  %3312 = vmatmul.msk.f32.vlgmr.msrb.gmra.mxu3 %vm4969_vm13, %v534_v45  ;;  %vm4972_vm13 = vcmask 736256  }
 0x2ba   :  { %v722_v16 = vpop.f32.mrf.mxu2  ;;  %v742_v17 = vpop.f32.mrf.mxu3 }
 0x2bb   :  { %v743_v48 = vadd.f32 %v742_v17, %v722_v16 }
 0x2bc   :  { %v762_v51 = vpop.f32.mrf.mxu0  ;;  %v782_v19 = vpop.f32.mrf.mxu1 }
 0x2bd   :  { %v763_v18 = vadd.f32 %v762_v51, %v743_v48 }
 0x2bf   :  { %v783_v20 = vadd.f32 %v782_v19, %v763_v18 }
 0x2c3   :  { %v802_v21 = vpop.f32.mrf.mxu2  ;;  %v822_v24 = vpop.f32.mrf.mxu3 }
 0x2c4   :  { %v803_v22 = vadd.f32 %v802_v21, %v783_v20 }
 0x2c5   :  { %v842_v23 = vpop.f32.mrf.mxu0  ;;  %v862_v26 = vpop.f32.mrf.mxu1 }
 0x2c6   :  { %985 = vrot.lane.b32.xlu0 %v803_v22, %s3594_s26  ;;  %1009 = vrot.lane.b32.xlu1 %v803_v22, %s3595_s30  ;;  %906 = vst.msk [vmem:[#allocation3] sm:$0x3f] %vm905_vm10, %v803_v22  ;;  %v843_v25 = vadd.f32 %v842_v23, %v822_v24 }
 0x2c7   :  { %1001 = vrot.lane.b32.xlu2 %v803_v22, %s3596_s3 }
 0x2c8   :  { %v863_v28 = vadd.f32 %v862_v26, %v843_v25 }
 0x2ce   :  { %969 = vrot.lane.b32.xlu0 %v803_v22, %s3597_s23  ;;  %977 = vrot.lane.b32.xlu1 %v803_v22, %s4987_s20 }
 0x2cf   :  { %993 = vrot.lane.b32.xlu2 %v803_v22, %s4985_s14 }
 0x2d6   :  { %964 = vrot.lane.b32.xlu0 %v803_v22, %s4957_s17  ;;  %956 = vrot.lane.b32.xlu1 %v803_v22, %s4958_s15  ;;  %s4961_s17 = smov 113   ;;  %s4962_s15 = smov 115  }
 0x2d7   :  { %960 = vrot.lane.b32.xlu2 %v803_v22, %s4959_s29  ;;  %s4963_s29 = smov 112  }
 0x2db   :  { %v882_v27 = vpop.f32.mrf.mxu2  ;;  %v902_v30 = vpop.f32.mrf.mxu3 }
 0x2dc   :  { %v883_v29 = vadd.f32 %v882_v27, %v863_v28 }
 0x2de   :  { %944 = vrot.lane.b32.xlu0 %v803_v22, %s4967_s28  ;;  %948 = vrot.lane.b32.xlu1 %v803_v22, %s4965_s25  ;;  %v903_v31 = vadd.f32 %v902_v30, %v883_v29  ;;  %s4978_s25 = smov 77   ;;  %v1041_v29 = vld [vmem:[%s4917_s4] sm:$0xff]  ;;  %s4996_s28 = smov 42  }
 0x2df   :  { %952 = vrot.lane.b32.xlu2 %v803_v22, %s4964_s22  ;;  %s4980_s22 = smov 78  }
 0x2e6   :  { %936 = vrot.lane.b32.xlu0 %v803_v22, %s4961_s17  ;;  %928 = vrot.lane.b32.xlu1 %v803_v22, %s4962_s15  ;;  %s3608_s17 = smov 116   ;;  %s4966_s15 = smov 114  }
 0x2e7   :  { %940 = vrot.lane.b32.xlu2 %v803_v22, %s4963_s29  ;;  %s4983_s29 = smov 76  }
 0x2ee   :  { %1003 = vrot.lane.b32.xlu0 %v903_v31, %s3596_s3  ;;  %987 = vrot.lane.b32.xlu1 %v903_v31, %s3594_s26 }
 0x2ef   :  { %1011 = vrot.lane.b32.xlu2 %v903_v31, %s3595_s30 }
 0x2f6   :  { %995 = vrot.lane.b32.xlu0 %v903_v31, %s4985_s14  ;;  %920 = vrot.lane.b32.xlu1 %v803_v22, %s3589_s27  ;;  %s4992_s14 = smov 97  }
 0x2f7   :  { %979 = vrot.lane.b32.xlu2 %v903_v31, %s4987_s20  ;;  %s4993_s20 = smov 71  }
 0x2fe   :  { %924 = vrot.lane.b32.xlu0 %v803_v22, %s3608_s17  ;;  %971 = vrot.lane.b32.xlu1 %v903_v31, %s3597_s23 }
 0x2ff   :  { %932 = vrot.lane.b32.xlu2 %v803_v22, %s4966_s15  ;;  %s4998_s15 = smov 43  }
 0x306   :  { %916 = vrot.lane.b32.xlu0 %v803_v22, %s3587_s24  ;;  %1033 = vrot.lane.b32.xlu1 %v803_v22, %s4983_s29 }
 0x307   :  { %912 = vrot.lane.b32.xlu2 %v803_v22, %s3588_s21 }
 0x30e   :  { %908 = vrot.lane.b32.xlu0 %v803_v22, %s3586_s16  ;;  %1017 = vrot.lane.b32.xlu1 %v803_v22, %s4980_s22 }
 0x30f   :  { %1035 = vrot.lane.b32.xlu2 %v903_v31, %s4983_s29  ;;  %s4995_s29 = smov 100  }
 0x316   :  { %1025 = vrot.lane.b32.xlu0 %v803_v22, %s4978_s25  ;;  %1027 = vrot.lane.b32.xlu1 %v903_v31, %s4978_s25  ;;  %s4994_s25 = smov 68  }
 0x317   :  { %1019 = vrot.lane.b32.xlu2 %v903_v31, %s4980_s22  ;;  %s4999_s22 = smov 13  }
 0x31e   :  { %1073 = vperm.xlu0 %3487, %v1065_v32   ;;  %v1042_v32 = vld [vmem:[%s4917_s4 + $0x8] sm:$0xff] }
 0x31f   :  { %1068 = vperm.xlu2 %3503, %v1064_v15  }
 0x321   :  { %v1002_v33 = vpop.permute.xlu2 %1001 }
 0x329   :  { %v994_v34 = vpop.permute.xlu2 %993 }
 0x331   :  { %v961_v35 = vpop.permute.xlu2 %960 }
 0x332   :  { %963 = vst.msk [vmem:[#allocation3 + $0x54] sm:$0x3f] %vm905_vm10, %v961_v35  ;;  %v1044_v35 = vld [vmem:[%s4917_s4 + $0x18] sm:$0xff] }
 0x338   :  { %v986_v36 = vpop.permute.xlu0 %985  ;;  %v1010_v37 = vpop.permute.xlu1 %1009 }
 0x339   :  { %v953_v38 = vpop.permute.xlu2 %952 }
 0x33a   :  { %955 = vst.msk [vmem:[#allocation3 + $0x48] sm:$0x3f] %vm905_vm10, %v953_v38 }
 0x340   :  { %v970_v39 = vpop.permute.xlu0 %969  ;;  %v978_v40 = vpop.permute.xlu1 %977 }
 0x341   :  { %v941_v47 = vpop.permute.xlu2 %940 }
 0x342   :  { %943 = vst.msk [vmem:[#allocation3 + $0x36] sm:$0x3f] %vm905_vm10, %v941_v47 }
 0x348   :  { %v965_v49 = vpop.permute.xlu0 %964  ;;  %v957_v50 = vpop.permute.xlu1 %956 }
 0x349   :  { %967 = vst.msk [vmem:[#allocation3 + $0x5a] sm:$0x3f] %vm905_vm10, %v965_v49  ;;  %v1012_v42 = vpop.permute.xlu2 %1011 }
 0x34a   :  { %959 = vst.msk [vmem:[#allocation3 + $0x4e] sm:$0x3f] %vm905_vm10, %v957_v50  ;;  %v1014_v52 = vsel %vm1013_vm9, %v1010_v37, %v1012_v42 }
 0x34b   :  { %1016 = vst.msk [vmem:[#allocation3 + $0x7e] sm:$0x3f] %vm905_vm10, %v1014_v52 }
 0x350   :  { %v945_v46 = vpop.permute.xlu0 %944  ;;  %v949_v53 = vpop.permute.xlu1 %948  ;;  %v1056_v56 = vld [vmem:[#allocation3 + $0x58] sm:$0xff] }
 0x351   :  { %947 = vst.msk [vmem:[#allocation3 + $0x3c] sm:$0x3f] %vm905_vm10, %v945_v46  ;;  %v980_v54 = vpop.permute.xlu2 %979  ;;  %v1055_v14 = vld [vmem:[#allocation3 + $0x50] sm:$0xff]  ;;  %v1054_v61 = vld [vmem:[#allocation3 + $0x48] sm:$0xff] }
 0x352   :  { %951 = vst.msk [vmem:[#allocation3 + $0x42] sm:$0x3f] %vm905_vm10, %v949_v53  ;;  %v982_v41 = vsel %vm4972_vm13, %v978_v40, %v980_v54  ;;  %vm4976_vm13 = vcmask 719872  }
 0x353   :  { %984 = vst.msk [vmem:[#allocation3 + $0x66] sm:$0x3f] %vm905_vm10, %v982_v41  ;;  %v1911_v41 = vld [vmem:[%s4915_s2] sm:$0x3f]  ;;  %s4997_s2 = smov 16  }
 0x358   :  { %v937_v43 = vpop.permute.xlu0 %936  ;;  %v929_v44 = vpop.permute.xlu1 %928  ;;  %v1052_v19 = vld [vmem:[#allocation3 + $0x38] sm:$0xff] }
 0x359   :  { %939 = vst.msk [vmem:[#allocation3 + $0x30] sm:$0x3f] %vm905_vm10, %v937_v43  ;;  %v933_v45 = vpop.permute.xlu2 %932  ;;  %v1053_v51 = vld [vmem:[#allocation3 + $0x40] sm:$0xff] }
 0x35a   :  { %931 = vst.msk [vmem:[#allocation3 + $0x24] sm:$0x3f] %vm905_vm10, %v929_v44 }
 0x35b   :  { %935 = vst.msk [vmem:[#allocation3 + $0x2a] sm:$0x3f] %vm905_vm10, %v933_v45 }
 0x360   :  { %v1004_v55 = vpop.permute.xlu0 %1003  ;;  %v988_v57 = vpop.permute.xlu1 %987  ;;  %v1051_v20 = vld [vmem:[#allocation3 + $0x30] sm:$0xff] }
 0x361   :  { %v1006_v58 = vsel %vm4973_vm8, %v1002_v33, %v1004_v55  ;;  %v990_v9 = vsel %vm4974_vm2, %v986_v36, %v988_v57  ;;  %v913_v62 = vpop.permute.xlu2 %912  ;;  %vm4975_vm8 = vcmask 744448   ;;  %vm4977_vm2 = vcmask 621568   ;;  %v4041_v36 = vld [vmem:[%s4913_s0 + $0x1] ss:$2 sm:$0x7f]  ;;  %s4991_s0 = smov 15  }
 0x362   :  { %1008 = vst.msk [vmem:[#allocation3 + $0x78] sm:$0x3f] %vm905_vm10, %v1006_v58  ;;  %v1050_v21 = vld [vmem:[#allocation3 + $0x28] sm:$0xff] }
 0x363   :  { %992 = vst.msk [vmem:[#allocation3 + $0x6c] sm:$0x3f] %vm905_vm10, %v990_v9 }
 0x364   :  { %915 = vst.msk [vmem:[#allocation3 + $0xc] sm:$0x3f] %vm905_vm10, %v913_v62 }
 0x365   :  { %1715 = vst.msk [vmem:[#allocation2] ss:$8 sm:$0xf] %vm3703_vm0, %v4041_v36 }
 0x366   :  { %1716 = vst.msk [vmem:[#allocation2] ss:$8 sm:$0x30] %vm3703_vm0, %v4041_v36 }
 0x368   :  { %v996_v63 = vpop.permute.xlu0 %995  ;;  %v921_v5 = vpop.permute.xlu1 %920 }
 0x369   :  { %v998_v59 = vsel %vm4976_vm13, %v994_v34, %v996_v63  ;;  %923 = vst.msk [vmem:[#allocation3 + $0x18] sm:$0x3f] %vm905_vm10, %v921_v5  ;;  %v1060_v0 = vld [vmem:[#allocation3 + $0x78] sm:$0xff]  ;;  %v1036_v8 = vpop.permute.xlu2 %1035  ;;  %vm4982_vm13 = vcmask 1045504   ;;  %v1043_v34 = vld [vmem:[%s4917_s4 + $0x10] sm:$0xff] }
 0x36a   :  { %1000 = vst.msk [vmem:[#allocation3 + $0x72] sm:$0x3f] %vm905_vm10, %v998_v59  ;;  %1087 = vmatpush.msrb.mxu0 %v1060_v0  ;;  %v1058_v7 = vld [vmem:[#allocation3 + $0x68] sm:$0xff] }
 0x370   :  { %v925_v1 = vpop.permute.xlu0 %924  ;;  %v972_v3 = vpop.permute.xlu1 %971 }
 0x371   :  { %927 = vst.msk [vmem:[#allocation3 + $0x1e] sm:$0x3f] %vm905_vm10, %v925_v1  ;;  %v974_v4 = vsel %vm4975_vm8, %v970_v39, %v972_v3  ;;  %v1059_v6 = vld [vmem:[#allocation3 + $0x70] sm:$0xff]  ;;  %vm1021_vm8 = vcmask 637952   ;;  %v1020_v60 = vpop.permute.xlu2 %1019 }
 0x372   :  { %976 = vst.msk [vmem:[#allocation3 + $0x60] sm:$0x3f] %vm905_vm10, %v974_v4  ;;  %1088 = vmatpush.msrb.mxu0 %v1059_v6 }
 0x374   :  { %1089 = vmatpush.msrb.mxu0 %v1058_v7 }
 0x378   :  { %v917_v10 = vpop.permute.xlu0 %916  ;;  %v1034_v11 = vpop.permute.xlu1 %1033  ;;  %v1049_v25 = vld [vmem:[#allocation3 + $0x20] sm:$0xff]  ;;  %v1048_v26 = vld [vmem:[#allocation3 + $0x18] sm:$0xff] }
 0x379   :  { %919 = vst.msk [vmem:[#allocation3 + $0x12] sm:$0x3f] %vm905_vm10, %v917_v10  ;;  %v1038_v12 = vsel %vm4977_vm2, %v1034_v11, %v1036_v8  ;;  %v1057_v13 = vld [vmem:[#allocation3 + $0x60] sm:$0xff]  ;;  %vm1029_vm2 = vcmask 629760   ;;  %v1069_v37 = vpop.permute.xlu2 %1068  ;;  %v1164_v8 = vld [vmem:[%s4919_s6 + $0x48] sm:$0x7f] }
 0x37a   :  { %1040 = vst.msk [vmem:[#allocation3 + $0x90] sm:$0x3f] %vm905_vm10, %v1038_v12  ;;  %1090 = vmatpush.msrb.mxu0 %v1057_v13 }
 0x37c   :  { %1091 = vmatpush.msrb.mxu0 %v1056_v56 }
 0x37e   :  { %1092 = vmatpush.msrb.mxu0 %v1055_v14 }
 0x380   :  { %v909_v16 = vpop.permute.xlu0 %908  ;;  %v1018_v17 = vpop.permute.xlu1 %1017  ;;  %1093 = vmatpush.msrb.mxu0 %v1054_v61  ;;  %v1047_v27 = vld [vmem:[#allocation3 + $0x10] sm:$0xff] }
 0x381   :  { %911 = vst.msk [vmem:[#allocation3 + $0x6] sm:$0x3f] %vm905_vm10, %v909_v16  ;;  %v1022_v48 = vsel %vm1021_vm8, %v1018_v17, %v1020_v60  ;;  %v1063_v18 = vld [vmem:[#allocation3 + $0x90] sm:$0x3f] }
 0x382   :  { %1024 = vst.msk [vmem:[#allocation3 + $0x84] sm:$0x3f] %vm905_vm10, %v1022_v48  ;;  %1094 = vmatpush.msrb.mxu0 %v1053_v51  ;;  %3313 = vmatpush.msk.msra.mxu1 %vm4982_vm13, %v1063_v18  ;;  %vm1076_vm13 = vcmask 179200   ;;  %v1163_v48 = vld [vmem:[%s4919_s6 + $0x40] sm:$0xff]  ;;  %v1162_v51 = vld [vmem:[%s4919_s6 + $0x38] sm:$0xff]  ;;  %v1161_v18 = vld [vmem:[%s4919_s6 + $0x30] sm:$0xff] }
 0x384   :  { %1095 = vmatpush.msrb.mxu0 %v1052_v19  ;;  %v1160_v19 = vld [vmem:[%s4919_s6 + $0x28] sm:$0xff] }
 0x386   :  { %1096 = vmatpush.msrb.mxu0 %v1051_v20  ;;  %v1159_v20 = vld [vmem:[%s4919_s6 + $0x20] sm:$0xff] }
 0x388   :  { %v1026_v22 = vpop.permute.xlu0 %1025  ;;  %v1028_v23 = vpop.permute.xlu1 %1027  ;;  %1097 = vmatpush.msrb.mxu0 %v1050_v21  ;;  %v1046_v28 = vld [vmem:[#allocation3 + $0x8] sm:$0xff]  ;;  %v1045_v30 = vld [vmem:[#allocation3] sm:$0xff]  ;;  %v1158_v21 = vld [vmem:[%s4919_s6 + $0x18] sm:$0xff] }
 0x389   :  { %v1030_v24 = vsel %vm1029_vm2, %v1026_v22, %v1028_v23  ;;  %v1061_v33 = vld [vmem:[#allocation3 + $0x80] sm:$0xff]  ;;  %v1157_v22 = vld [vmem:[%s4919_s6 + $0x10] sm:$0xff]  ;;  %v1156_v23 = vld [vmem:[%s4919_s6 + $0x8] sm:$0xff] }
 0x38a   :  { %1032 = vst.msk [vmem:[#allocation3 + $0x8a] sm:$0x3f] %vm905_vm10, %v1030_v24  ;;  %1098 = vmatpush.msrb.mxu0 %v1049_v25  ;;  %v1155_v24 = vld [vmem:[%s4919_s6] sm:$0xff] }
 0x38c   :  { %1099 = vmatpush.msrb.mxu0 %v1048_v26 }
 0x38e   :  { %1100 = vmatpush.msrb.mxu0 %v1047_v27 }
 0x390   :  { %1101 = vmatpush.msrb.mxu0 %v1046_v28  ;;  %v1074_v50 = vpop.permute.xlu0 %1073 }
 0x391   :  { %v1062_v31 = vld [vmem:[#allocation3 + $0x88] sm:$0xff] }
 0x392   :  { %1102 = vmatpush.msrb.mxu0 %v1045_v30  ;;  %1124 = vmatpush.msra.mxu1 %v1062_v31 }
 0x393   :  { %1103 = vmatmul.f32.vlgmr.msrb.gmra.mxu0 %v1041_v29 }
 0x394   :  { %1125 = vmatpush.msra.mxu1 %v1061_v33 }
 0x395   :  { %3314 = vmatmul.msk.f32.vlgmr.msra.gmra.mxu1 %vm1076_vm13, %v1042_v32 }
 0x396   :  { %3316 = vmatpush.msk.msrb.mxu1 %vm698_vm3, %v1164_v8 }
 0x398   :  { %1181 = vmatpush.msrb.mxu1 %v1163_v48 }
 0x39a   :  { %1182 = vmatpush.msrb.mxu1 %v1162_v51 }
 0x39b   :  { %1106 = vmatmul.f32.gmra.mxu0 %v1043_v34 }
 0x39c   :  { %1183 = vmatpush.msrb.mxu1 %v1161_v18  ;;  %v3327_v18 = vld [vmem:[%s4920_s7 + $0x38] sm:$0xff] }
 0x39d   :  { %3315 = vmatmul.msk.f32.gmra.mxu1 %vm1076_vm13, %v1044_v35 }
 0x39e   :  { %1184 = vmatpush.msrb.mxu1 %v1160_v19  ;;  %v3336_v19 = vld [vmem:[%s4920_s7 + $0x68] sm:$0xff] }
 0x3a0   :  { %1185 = vmatpush.msrb.mxu1 %v1159_v20  ;;  %v3330_v20 = vld [vmem:[%s4920_s7 + $0x48] sm:$0xff] }
 0x3a2   :  { %1186 = vmatpush.msrb.mxu1 %v1158_v21 }
 0x3a4   :  { %1187 = vmatpush.msrb.mxu1 %v1157_v22 }
 0x3a6   :  { %1188 = vmatpush.msrb.mxu1 %v1156_v23 }
 0x3a8   :  { %1189 = vmatpush.msrb.mxu1 %v1155_v24 }
 0x410   :  { %v1104_v38 = vpop.f32.mrf.mxu0 }
 0x411   :  { %v1105_v39 = vadd.f32 %v1104_v38, %v1069_v37 }
 0x412   :  { %v1127_v40 = vpop.f32.mrf.mxu1 }
 0x413   :  { %v1128_v47 = vadd.f32 %v1127_v40, %v1105_v39 }
 0x415   :  { %v1133_v49 = vmax.f32 %v1128_v47, 0.0 }
 0x417   :  { %1137 = vrot.lane.b32.xlu1 %v1133_v49, %s3586_s16 }
 0x418   :  { %v1107_v42 = vpop.f32.mrf.mxu0 }
 0x419   :  { %v1108_v52 = vadd.f32 %v1107_v42, %v1074_v50 }
 0x41a   :  { %v1130_v46 = vpop.f32.mrf.mxu1 }
 0x41b   :  { %v1131_v53 = vadd.f32 %v1130_v46, %v1108_v52 }
 0x41d   :  { %v1134_v54 = vmax.f32 %v1131_v53, 0.0 }
 0x41f   :  { %1139 = vrot.lane.b32.xlu2 %v1134_v54, %s3586_s16 }
 0x427   :  { %1879 = vrot.lane.b32.xlu2 %v4041_v36, %s3571_s18  ;;  %s5002_s18 = smov 14  }
 0x42f   :  { %1837 = vrot.lane.b32.xlu2 %v4041_v36, %s3573_s19  ;;  %s5003_s19 = smov 69  }
 0x437   :  { %1858 = vrot.lane.b32.xlu2 %v4041_v36, %s4991_s0  ;;  %s5000_s0 = smov 40  }
 0x43f   :  { %1767 = vrot.lane.b32.xlu2 %v4041_v36, %s4992_s14  ;;  %s5001_s14 = smov 72  }
 0x447   :  { %1788 = vrot.lane.b32.xlu2 %v4041_v36, %s4993_s20  ;;  %s5062_s20 = smov 103  }
 0x44f   :  { %1809 = vrot.lane.b32.xlu2 %v4041_v36, %s4994_s25  ;;  %s5063_s25 = smov 102  }
 0x457   :  { %1725 = vrot.lane.b32.xlu2 %v4041_v36, %s3588_s21 }
 0x45f   :  { %1746 = vrot.lane.b32.xlu2 %v4041_v36, %s4995_s29 }
 0x467   :  { %1914 = vperm.xlu2 %3503, %v1911_v41  }
 0x479   :  { %v1140_v43 = vpop.permute.xlu2 %1139 }
 0x47a   :  { %v4070_v44 = vmax.f32 %v1134_v54, %v1140_v43 }
 0x47c   :  { %1149 = vrot.lane.b32.xlu1 %v4070_v44, %s3608_s17 }
 0x481   :  { %v1880_v45 = vpop.permute.xlu2 %1879 }
 0x482   :  { %v1881_v55 = vrot.slane %v1880_v45, 1 }
 0x484   :  { %v1882_v57 = vsel %vm279_vm5, %v1880_v45, %v1881_v55  ;;  %1830 = vrot.lane.b32.xlu1 %v4041_v36, %s4996_s28  ;;  %s5004_s28 = smov 96   ;;  %vm5011_vm5 = vcmask 105472   ;;  %v3321_v55 = vld [vmem:[%s4920_s7 + $0x18] sm:$0xff] }
 0x485   :  { %1884 = vst.msk [vmem:[#allocation2 + $0x90] ss:$8 sm:$0xf] %vm3703_vm0, %v1882_v57  ;;  %1244 = vmatpush.msra.mxu3 %v3321_v55 }
 0x486   :  { %1885 = vst.msk [vmem:[#allocation2 + $0x90] ss:$8 sm:$0x30] %vm3703_vm0, %v1882_v57  ;;  %v3324_v57 = vld [vmem:[%s4920_s7 + $0x28] sm:$0xff] }
 0x487   :  { %1271 = vmatpush.msrb.mxu2 %v3324_v57 }
 0x489   :  { %v1838_v58 = vpop.permute.xlu2 %1837  ;;  %v1138_v9 = vpop.permute.xlu1 %1137 }
 0x48a   :  { %v1839_v62 = vrot.slane %v1838_v58, 1  ;;  %v4081_v63 = vmax.f32 %v1133_v49, %v1138_v9 }
 0x48c   :  { %v1840_v5 = vsel %vm225_vm7, %v1838_v58, %v1839_v62  ;;  %1147 = vrot.lane.b32.xlu0 %v4081_v63, %s3608_s17  ;;  %1851 = vrot.lane.b32.xlu1 %v4041_v36, %s4997_s2  ;;  %s5005_s2 = smov 70   ;;  %vm5012_vm7 = vcmask 326656   ;;  %v1199_v58 = vld [vmem:[%s4920_s7 + $0x8] sm:$0xff] }
 0x48d   :  { %1842 = vst.msk [vmem:[#allocation2 + $0x62] ss:$8 sm:$0xf] %vm3703_vm0, %v1840_v5  ;;  %1217 = vmatpush.msra.mxu1 %v1199_v58  ;;  %v3363_v58 = vld [vmem:[%s4920_s7 + $0xf8] sm:$0xff] }
 0x48e   :  { %1843 = vst.msk [vmem:[#allocation2 + $0x62] ss:$8 sm:$0x30] %vm3703_vm0, %v1840_v5 }
 0x491   :  { %v1859_v59 = vpop.permute.xlu2 %1858 }
 0x492   :  { %v1860_v0 = vrot.slane %v1859_v59, 1 }
 0x494   :  { %v1861_v1 = vsel %vm252_vm12, %v1859_v59, %v1860_v0  ;;  %1823 = vrot.lane.b32.xlu0 %v4041_v36, %s4998_s15  ;;  %1872 = vrot.lane.b32.xlu1 %v4041_v36, %s4999_s22  ;;  %s5006_s15 = smov 44   ;;  %s5007_s22 = smov 98   ;;  %vm5014_vm12 = vcmask 113664  }
 0x495   :  { %1863 = vst.msk [vmem:[#allocation2 + $0x65] ss:$8 sm:$0xf] %vm3703_vm0, %v1861_v1 }
 0x496   :  { %1864 = vst.msk [vmem:[#allocation2 + $0x65] ss:$8 sm:$0x30] %vm3703_vm0, %v1861_v1 }
 0x499   :  { %v1768_v3 = vpop.permute.xlu2 %1767 }
 0x49a   :  { %v1769_v4 = vrot.slane %v1768_v3, 1 }
 0x49c   :  { %v1770_v6 = vsel %vm135_vm15, %v1768_v3, %v1769_v4  ;;  %1844 = vrot.lane.b32.xlu0 %v4041_v36, %s5000_s0  ;;  %1781 = vrot.lane.b32.xlu1 %v4041_v36, %s5001_s14  ;;  %s5008_s0 = smov 99   ;;  %vm5016_vm15 = vcmask 785408   ;;  %s5061_s14 = smov 104  }
 0x49d   :  { %1772 = vst.msk [vmem:[#allocation2 + $0x30] ss:$8 sm:$0xf] %vm3703_vm0, %v1770_v6 }
 0x49e   :  { %1773 = vst.msk [vmem:[#allocation2 + $0x30] ss:$8 sm:$0x30] %vm3703_vm0, %v1770_v6 }
 0x4a1   :  { %v1789_v7 = vpop.permute.xlu2 %1788 }
 0x4a2   :  { %v1790_v10 = vrot.slane %v1789_v7, 1 }
 0x4a4   :  { %v1791_v11 = vsel %vm162_vm11, %v1789_v7, %v1790_v10  ;;  %1865 = vrot.lane.b32.xlu0 %v4041_v36, %s5002_s18  ;;  %1802 = vrot.lane.b32.xlu1 %v4041_v36, %s5003_s19  ;;  %vm5013_vm11 = vcmask 588800   ;;  %s5064_s18 = smov 112  }
 0x4a5   :  { %1793 = vst.msk [vmem:[#allocation2 + $0x33] ss:$8 sm:$0xf] %vm3703_vm0, %v1791_v11 }
 0x4a6   :  { %1794 = vst.msk [vmem:[#allocation2 + $0x33] ss:$8 sm:$0x30] %vm3703_vm0, %v1791_v11 }
 0x4a9   :  { %v1810_v12 = vpop.permute.xlu2 %1809 }
 0x4aa   :  { %v1811_v13 = vrot.slane %v1810_v12, 1 }
 0x4ac   :  { %v1812_v56 = vsel %vm189_vm1, %v1810_v12, %v1811_v13  ;;  %1774 = vrot.lane.b32.xlu0 %v4041_v36, %s5004_s28  ;;  %1718 = vrot.lane.b32.xlu1 %v4041_v36, %s3586_s16  ;;  %vm5009_vm1 = vcmask 130048  }
 0x4ad   :  { %1814 = vst.msk [vmem:[#allocation2 + $0x36] ss:$8 sm:$0xf] %vm3703_vm0, %v1812_v56 }
 0x4ae   :  { %1815 = vst.msk [vmem:[#allocation2 + $0x36] ss:$8 sm:$0x30] %vm3703_vm0, %v1812_v56 }
 0x4b1   :  { %v1726_v14 = vpop.permute.xlu2 %1725 }
 0x4b2   :  { %v1727_v15 = vrot.slane %v1726_v14, 1 }
 0x4b4   :  { %v1728_v60 = vsel %vm81_vm14, %v1726_v14, %v1727_v15  ;;  %1795 = vrot.lane.b32.xlu0 %v4041_v36, %s5005_s2  ;;  %1739 = vrot.lane.b32.xlu1 %v4041_v36, %s3589_s27  ;;  %vm5015_vm14 = vcmask 564224   ;;  %v1198_v15 = vld [vmem:[%s4920_s7] sm:$0xff]  ;;  %s5057_s2 = smov 90  }
 0x4b5   :  { %1730 = vst.msk [vmem:[#allocation2 + $0x2] ss:$8 sm:$0xf] %vm3703_vm0, %v1728_v60  ;;  %1218 = vmatpush.msra.mxu1 %v1198_v15  ;;  %v1908_v15 = vld [vmem:[#allocation2 + $0xa8] sm:$0x1] }
 0x4b6   :  { %1731 = vst.msk [vmem:[#allocation2 + $0x2] ss:$8 sm:$0x30] %vm3703_vm0, %v1728_v60  ;;  %v3333_v60 = vld [vmem:[%s4920_s7 + $0x58] sm:$0xff] }
 0x4b7   :  { %1352 = vmatpush.msra.mxu0 %v3333_v60  ;;  %v1909_v60 = vld [vmem:[#allocation2 + $0xb0] sm:$0x1] }
 0x4b9   :  { %v1747_v61 = vpop.permute.xlu2 %1746 }
 0x4ba   :  { %v1748_v16 = vrot.slane %v1747_v61, 1 }
 0x4bc   :  { %v1749_v17 = vsel %vm108_vm6, %v1747_v61, %v1748_v16  ;;  %1816 = vrot.lane.b32.xlu0 %v4041_v36, %s5006_s15  ;;  %1760 = vrot.lane.b32.xlu1 %v4041_v36, %s5007_s22  ;;  %v3320_v61 = vld [vmem:[%s4920_s7 + $0x10] sm:$0xff]  ;;  %v3323_v16 = vld [vmem:[%s4920_s7 + $0x20] sm:$0xff]  ;;  %s5058_s15 = smov 88   ;;  %s5059_s22 = smov 92  }
 0x4bd   :  { %1751 = vst.msk [vmem:[#allocation2 + $0x5] ss:$8 sm:$0xf] %vm3703_vm0, %v1749_v17  ;;  %1245 = vmatpush.msra.mxu3 %v3320_v61  ;;  %1272 = vmatpush.msrb.mxu2 %v3323_v16 }
 0x4be   :  { %1752 = vst.msk [vmem:[#allocation2 + $0x5] ss:$8 sm:$0x30] %vm3703_vm0, %v1749_v17  ;;  %v3332_v17 = vld [vmem:[%s4920_s7 + $0x50] sm:$0xff] }
 0x4bf   :  { %1353 = vmatpush.msra.mxu0 %v3332_v17  ;;  %1298 = vmatpush.msrb.mxu3 %v3327_v18 }
 0x4c0   :  { %1379 = vmatpush.msra.mxu2 %v3336_v19  ;;  %v1910_v19 = vld [vmem:[#allocation2 + $0xb8] sm:$0x1] }
 0x4c4   :  { %1732 = vrot.lane.b32.xlu0 %v4041_v36, %s3587_s24 }
 0x4cc   :  { %1753 = vrot.lane.b32.xlu0 %v4041_v36, %s5008_s0  ;;  %s5060_s0 = smov 101  }
 0x4ee   :  { %v1150_v25 = vpop.permute.xlu1 %1149 }
 0x4ef   :  { %v1154_v36 = vmax.f32 %v4070_v44, %v1150_v25  ;;  %v3329_v25 = vld [vmem:[%s4920_s7 + $0x40] sm:$0xff] }
 0x4f6   :  { %v1831_v26 = vpop.permute.xlu1 %1830 }
 0x4f7   :  { %v1832_v27 = vrot.slane %v1831_v26, 1 }
 0x4f9   :  { %v1833_v28 = vsel %vm216_vm4, %v1831_v26, %v1832_v27  ;;  %vm5010_vm4 = vcmask 351232   ;;  %v3345_v26 = vld [vmem:[%s4920_s7 + $0x98] sm:$0xff]  ;;  %v3326_v27 = vld [vmem:[%s4920_s7 + $0x30] sm:$0xff] }
 0x4fa   :  { %1835 = vst.msk [vmem:[#allocation2 + $0x61] ss:$8 sm:$0xf] %vm3703_vm0, %v1833_v28  ;;  %1460 = vmatpush.msrb.mxu0 %v3345_v26  ;;  %1299 = vmatpush.msrb.mxu3 %v3326_v27  ;;  %v1641_v26 = vld [vmem:[%s4922_s9 + $0x58] sm:$0xff]  ;;  %v1640_v27 = vld [vmem:[%s4922_s9 + $0x50] sm:$0xff] }
 0x4fb   :  { %1836 = vst.msk [vmem:[#allocation2 + $0x61] ss:$8 sm:$0x30] %vm3703_vm0, %v1833_v28  ;;  %v3335_v28 = vld [vmem:[%s4920_s7 + $0x60] sm:$0xff] }
 0x4fc   :  { %1380 = vmatpush.msra.mxu2 %v3335_v28  ;;  %v1639_v28 = vld [vmem:[%s4922_s9 + $0x48] sm:$0xff] }
 0x4fe   :  { %v1148_v29 = vpop.permute.xlu0 %1147  ;;  %v1852_v30 = vpop.permute.xlu1 %1851 }
 0x4ff   :  { %v1153_v31 = vmax.f32 %v4081_v63, %v1148_v29  ;;  %v1853_v32 = vrot.slane %v1852_v30, 1  ;;  %v3344_v29 = vld [vmem:[%s4920_s7 + $0x90] sm:$0xff] }
 0x500   :  { %1461 = vmatpush.msrb.mxu0 %v3344_v29  ;;  %v1638_v29 = vld [vmem:[%s4922_s9 + $0x40] sm:$0xff] }
 0x501   :  { %3317 = vmatmul.msk.f32.vlgmr.msrb.gmra.mxu1 %vm1013_vm9, %v1153_v31  ;;  %v1854_v33 = vsel %vm5009_vm1, %v1852_v30, %v1853_v32  ;;  %vm5017_vm1 = vcmask 1039360   ;;  %v3342_v30 = vld [vmem:[%s4920_s7 + $0x88] sm:$0xff] }
 0x502   :  { %1856 = vst.msk [vmem:[#allocation2 + $0x64] ss:$8 sm:$0xf] %vm3703_vm0, %v1854_v33  ;;  %1325 = vmatpush.msrb.mxu1 %v3330_v20 }
 0x503   :  { %1857 = vst.msk [vmem:[#allocation2 + $0x64] ss:$8 sm:$0x30] %vm3703_vm0, %v1854_v33 }
 0x504   :  { %1326 = vmatpush.msrb.mxu1 %v3329_v25  ;;  %v1642_v25 = vld [vmem:[%s4922_s9 + $0x60] sm:$0xff] }
 0x506   :  { %v1824_v34 = vpop.permute.xlu0 %1823  ;;  %v1873_v35 = vpop.permute.xlu1 %1872 }
 0x507   :  { %v1825_v37 = vrot.slane %v1824_v34, 1  ;;  %v1874_v38 = vrot.slane %v1873_v35, 1 }
 0x509   :  { %3318 = vmatmul.msk.f32.gmra.mxu1 %vm1013_vm9, %v1154_v36  ;;  %v1826_v39 = vsel %vm5010_vm4, %v1824_v34, %v1825_v37  ;;  %v1875_v40 = vsel %vm5011_vm5, %v1873_v35, %v1874_v38  ;;  %vm5018_vm4 = vcmask 572416   ;;  %vm5019_vm5 = vcmask 1014784   ;;  %v3339_v35 = vld [vmem:[%s4920_s7 + $0x78] sm:$0xff]  ;;  %v3341_v36 = vld [vmem:[%s4920_s7 + $0x80] sm:$0xff]  ;;  %v3338_v38 = vld [vmem:[%s4920_s7 + $0x70] sm:$0xff] }
 0x50a   :  { %1828 = vst.msk [vmem:[#allocation2 + $0x60] ss:$8 sm:$0xf] %vm3703_vm0, %v1826_v39  ;;  %v3357_v37 = vld [vmem:[%s4920_s7 + $0xd8] sm:$0xff] }
 0x50b   :  { %1829 = vst.msk [vmem:[#allocation2 + $0x60] ss:$8 sm:$0x30] %vm3703_vm0, %v1826_v39  ;;  %v3347_v39 = vld [vmem:[%s4920_s7 + $0xa0] sm:$0xff] }
 0x50c   :  { %1877 = vst.msk [vmem:[#allocation2 + $0x67] ss:$8 sm:$0xf] %vm3703_vm0, %v1875_v40 }
 0x50d   :  { %1878 = vst.msk [vmem:[#allocation2 + $0x67] ss:$8 sm:$0x30] %vm3703_vm0, %v1875_v40  ;;  %v3356_v40 = vld [vmem:[%s4920_s7 + $0xd0] sm:$0xff] }
 0x50e   :  { %v1845_v47 = vpop.permute.xlu0 %1844  ;;  %v1782_v49 = vpop.permute.xlu1 %1781 }
 0x50f   :  { %v1846_v50 = vrot.slane %v1845_v47, 1  ;;  %v1783_v42 = vrot.slane %v1782_v49, 1 }
 0x511   :  { %v1847_v52 = vsel %vm5012_vm7, %v1845_v47, %v1846_v50  ;;  %v1784_v46 = vsel %vm5013_vm11, %v1782_v49, %v1783_v42  ;;  %vm5020_vm7 = vcmask 359424   ;;  %vm5021_vm11 = vcmask 1022976   ;;  %v3354_v49 = vld [vmem:[%s4920_s7 + $0xc8] sm:$0xff] }
 0x512   :  { %1849 = vst.msk [vmem:[#allocation2 + $0x63] ss:$8 sm:$0xf] %vm3703_vm0, %v1847_v52 }
 0x513   :  { %1850 = vst.msk [vmem:[#allocation2 + $0x63] ss:$8 sm:$0x30] %vm3703_vm0, %v1847_v52 }
 0x514   :  { %1786 = vst.msk [vmem:[#allocation2 + $0x32] ss:$8 sm:$0xf] %vm3703_vm0, %v1784_v46 }
 0x515   :  { %1787 = vst.msk [vmem:[#allocation2 + $0x32] ss:$8 sm:$0x30] %vm3703_vm0, %v1784_v46 }
 0x516   :  { %v1866_v53 = vpop.permute.xlu0 %1865  ;;  %v1803_v54 = vpop.permute.xlu1 %1802 }
 0x517   :  { %v1867_v41 = vrot.slane %v1866_v53, 1  ;;  %v1804_v43 = vrot.slane %v1803_v54, 1 }
 0x519   :  { %v1868_v44 = vsel %vm5014_vm12, %v1866_v53, %v1867_v41  ;;  %v1805_v45 = vsel %vm5015_vm14, %v1803_v54, %v1804_v43  ;;  %vm5022_vm12 = vcmask 809984   ;;  %vm5023_vm14 = vcmask 801792   ;;  %v3360_v53 = vld [vmem:[%s4920_s7 + $0xe8] sm:$0xff]  ;;  %v3351_v54 = vld [vmem:[%s4920_s7 + $0xb8] sm:$0xff]  ;;  %v3353_v41 = vld [vmem:[%s4920_s7 + $0xc0] sm:$0xff] }
 0x51a   :  { %1870 = vst.msk [vmem:[#allocation2 + $0x66] ss:$8 sm:$0xf] %vm3703_vm0, %v1868_v44  ;;  %v3359_v43 = vld [vmem:[%s4920_s7 + $0xe0] sm:$0xff] }
 0x51b   :  { %1871 = vst.msk [vmem:[#allocation2 + $0x66] ss:$8 sm:$0x30] %vm3703_vm0, %v1868_v44  ;;  %v3350_v44 = vld [vmem:[%s4920_s7 + $0xb0] sm:$0xff] }
 0x51c   :  { %1807 = vst.msk [vmem:[#allocation2 + $0x35] ss:$8 sm:$0xf] %vm3703_vm0, %v1805_v45 }
 0x51d   :  { %1808 = vst.msk [vmem:[#allocation2 + $0x35] ss:$8 sm:$0x30] %vm3703_vm0, %v1805_v45 }
 0x51e   :  { %v1775_v9 = vpop.permute.xlu0 %1774  ;;  %v1719_v62 = vpop.permute.xlu1 %1718 }
 0x51f   :  { %v1776_v63 = vrot.slane %v1775_v9, 1  ;;  %v1720_v5 = vrot.slane %v1719_v62, 1 }
 0x521   :  { %v1777_v59 = vsel %vm5016_vm15, %v1775_v9, %v1776_v63  ;;  %v1721_v0 = vsel %vm5017_vm1, %v1719_v62, %v1720_v5  ;;  %vm5024_vm15 = vcmask 130048   ;;  %v1905_v9 = vld [vmem:[#allocation2 + $0x90] sm:$0x1]  ;;  %v1899_v63 = vld [vmem:[#allocation2 + $0x60] sm:$0xff]  ;;  %v1902_v61 = vld [vmem:[#allocation2 + $0x78] sm:$0xff] }
 0x522   :  { %1779 = vst.msk [vmem:[#allocation2 + $0x31] ss:$8 sm:$0xf] %vm3703_vm0, %v1777_v59  ;;  %v3362_v62 = vld [vmem:[%s4920_s7 + $0xf0] sm:$0xff]  ;;  %v1903_v16 = vld [vmem:[#allocation2 + $0x80] sm:$0xff]  ;;  %v1904_v20 = vld [vmem:[#allocation2 + $0x88] sm:$0xff] }
 0x523   :  { %1780 = vst.msk [vmem:[#allocation2 + $0x31] ss:$8 sm:$0x30] %vm3703_vm0, %v1777_v59 }
 0x524   :  { %1723 = vst.msk [vmem:[#allocation2 + $0x1] ss:$8 sm:$0xf] %vm3703_vm0, %v1721_v0 }
 0x525   :  { %1724 = vst.msk [vmem:[#allocation2 + $0x1] ss:$8 sm:$0x30] %vm3703_vm0, %v1721_v0 }
 0x526   :  { %v1796_v1 = vpop.permute.xlu0 %1795  ;;  %v1740_v3 = vpop.permute.xlu1 %1739 }
 0x527   :  { %v1797_v4 = vrot.slane %v1796_v1, 1  ;;  %v1741_v6 = vrot.slane %v1740_v3, 1 }
 0x529   :  { %v1798_v7 = vsel %vm5018_vm4, %v1796_v1, %v1797_v4  ;;  %v1742_v8 = vsel %vm5019_vm5, %v1740_v3, %v1741_v6  ;;  %v1906_v4 = vld [vmem:[#allocation2 + $0x98] sm:$0x1]  ;;  %v1907_v6 = vld [vmem:[#allocation2 + $0xa0] sm:$0x1] }
 0x52a   :  { %1800 = vst.msk [vmem:[#allocation2 + $0x34] ss:$8 sm:$0xf] %vm3703_vm0, %v1798_v7 }
 0x52b   :  { %1801 = vst.msk [vmem:[#allocation2 + $0x34] ss:$8 sm:$0x30] %vm3703_vm0, %v1798_v7  ;;  %v1900_v7 = vld [vmem:[#allocation2 + $0x68] sm:$0xff] }
 0x52c   :  { %1744 = vst.msk [vmem:[#allocation2 + $0x4] ss:$8 sm:$0xf] %vm3703_vm0, %v1742_v8 }
 0x52d   :  { %1745 = vst.msk [vmem:[#allocation2 + $0x4] ss:$8 sm:$0x30] %vm3703_vm0, %v1742_v8  ;;  %v1901_v8 = vld [vmem:[#allocation2 + $0x70] sm:$0xff] }
 0x52e   :  { %v1817_v10 = vpop.permute.xlu0 %1816  ;;  %v1761_v51 = vpop.permute.xlu1 %1760 }
 0x52f   :  { %v1818_v11 = vrot.slane %v1817_v10, 1  ;;  %v1762_v22 = vrot.slane %v1761_v51, 1 }
 0x531   :  { %v1819_v12 = vsel %vm5020_vm7, %v1817_v10, %v1818_v11  ;;  %v1763_v24 = vsel %vm5023_vm14, %v1761_v51, %v1762_v22 }
 0x532   :  { %1821 = vst.msk [vmem:[#allocation2 + $0x37] ss:$8 sm:$0xf] %vm3703_vm0, %v1819_v12 }
 0x533   :  { %1822 = vst.msk [vmem:[#allocation2 + $0x37] ss:$8 sm:$0x30] %vm3703_vm0, %v1819_v12  ;;  %v1886_v12 = vld [vmem:[%s4914_s1] sm:$0x3f]  ;;  %s5066_s1 = smov 113  }
 0x534   :  { %1765 = vst.msk [vmem:[#allocation2 + $0x7] ss:$8 sm:$0xf] %vm3703_vm0, %v1763_v24 }
 0x535   :  { %1766 = vst.msk [vmem:[#allocation2 + $0x7] ss:$8 sm:$0x30] %vm3703_vm0, %v1763_v24  ;;  %v1643_v24 = vld [vmem:[%s4922_s9 + $0x68] sm:$0xff] }
 0x536   :  { %v1733_v13 = vpop.permute.xlu0 %1732 }
 0x537   :  { %v1734_v56 = vrot.slane %v1733_v13, 1 }
 0x539   :  { %v1735_v14 = vsel %vm5021_vm11, %v1733_v13, %v1734_v56  ;;  %v1893_v5 = vld [vmem:[#allocation2 + $0x30] sm:$0xff]  ;;  %v1894_v10 = vld [vmem:[#allocation2 + $0x38] sm:$0xff]  ;;  %v1895_v11 = vld [vmem:[#allocation2 + $0x40] sm:$0xff] }
 0x53a   :  { %1737 = vst.msk [vmem:[#allocation2 + $0x3] ss:$8 sm:$0xf] %vm3703_vm0, %v1735_v14  ;;  %v1896_v17 = vld [vmem:[#allocation2 + $0x48] sm:$0xff] }
 0x53b   :  { %1738 = vst.msk [vmem:[#allocation2 + $0x3] ss:$8 sm:$0x30] %vm3703_vm0, %v1735_v14 }
 0x53e   :  { %v1754_v48 = vpop.permute.xlu0 %1753 }
 0x53f   :  { %v1755_v21 = vrot.slane %v1754_v48, 1 }
 0x541   :  { %v1756_v23 = vsel %vm5022_vm12, %v1754_v48, %v1755_v21  ;;  %v1897_v48 = vld [vmem:[#allocation2 + $0x50] sm:$0xff]  ;;  %v1898_v21 = vld [vmem:[#allocation2 + $0x58] sm:$0xff] }
 0x542   :  { %1758 = vst.msk [vmem:[#allocation2 + $0x6] ss:$8 sm:$0xf] %vm3703_vm0, %v1756_v23 }
 0x543   :  { %1759 = vst.msk [vmem:[#allocation2 + $0x6] ss:$8 sm:$0x30] %vm3703_vm0, %v1756_v23  ;;  %vm5025_vm0 = vmmov %vm5024_vm15  ;;  %v1644_v23 = vld [vmem:[%s4922_s9 + $0x70] sm:$0xff] }
 0x544   :  { %vm5026_vm1 = vmmov %vm5025_vm0 }
 0x545   :  { %vm5027_vm4 = vmmov %vm5025_vm0 }
 0x546   :  { %vm5028_vm5 = vmmov %vm5025_vm0 }
 0x547   :  { %vm5029_vm7 = vmmov %vm5025_vm0 }
 0x548   :  { %vm5030_vm11 = vmmov %vm5025_vm0 }
 0x549   :  { %vm5031_vm12 = vmmov %vm5025_vm0  ;;  %v1887_v0 = vld [vmem:[#allocation2] sm:$0xff]  ;;  %v1888_v13 = vld [vmem:[#allocation2 + $0x8] sm:$0xff] }
 0x54a   :  { %vm5032_vm14 = vmmov %vm5025_vm0  ;;  %v1889_v56 = vld [vmem:[#allocation2 + $0x10] sm:$0xff]  ;;  %v1890_v51 = vld [vmem:[#allocation2 + $0x18] sm:$0xff] }
 0x54b   :  { %v1891_v18 = vld [vmem:[#allocation2 + $0x20] sm:$0xff]  ;;  %v1892_v22 = vld [vmem:[#allocation2 + $0x28] sm:$0xff] }
 0x57e   :  { %v1191_v31 = vpop.f32.mrf.mxu1 }
 0x57f   :  { %3319 = vmatmul.msk.f32.vlgmr.msra.gmra.mxu1 %vm5024_vm15, %v1191_v31  ;;  %v1227_v32 = vrot.slane %v1191_v31, 1  ;;  %v1254_v33 = vrot.slane %v1191_v31, 2  ;;  %v1335_v34 = vrot.slane %v1191_v31, 5  ;;  %v1308_v47 = vrot.slane %v1191_v31, 4  ;;  %vm5033_vm15 = vmmov %vm5025_vm0 }
 0x580   :  { %1433 = vmatpush.msra.mxu1 %v3342_v30  ;;  %v1281_v42 = vrot.slane %v1191_v31, 3  ;;  %v1362_v52 = vrot.slane %v1191_v31, 6  ;;  %v1389_v45 = vrot.slane %v1191_v31, 7  ;;  %v1637_v30 = vld [vmem:[%s4922_s9 + $0x38] sm:$0xff]  ;;  %v1636_v31 = vld [vmem:[%s4922_s9 + $0x30] sm:$0xff] }
 0x581   :  { %3322 = vmatmul.msk.f32.vlgmr.msra.gmra.mxu3 %vm5025_vm0, %v1227_v32  ;;  %3325 = vmatmul.msk.f32.vlgmr.msrb.gmra.mxu2 %vm5026_vm1, %v1254_v33  ;;  %vm5034_vm1 = vmmov %vm5025_vm0  ;;  %v1635_v33 = vld [vmem:[%s4922_s9 + $0x28] sm:$0xff] }
 0x582   :  { %3334 = vmatmul.msk.f32.vlgmr.msra.gmra.mxu0 %vm5027_vm4, %v1335_v34  ;;  %1406 = vmatpush.msra.mxu3 %v3339_v35  ;;  %vm5035_vm4 = vcmask 1040384   ;;  %v1197_v34 = vld [vmem:[%s4921_s8] sm:$0x1] }
 0x583   :  { %1487 = vmatpush.msrb.mxu2 %v3348_v2  ;;  %1434 = vmatpush.msra.mxu1 %v3341_v36  ;;  %v1634_v35 = vld [vmem:[%s4922_s9 + $0x20] sm:$0xff]  ;;  %v1633_v2 = vld [vmem:[%s4922_s9 + $0x18] sm:$0xff] }
 0x584   :  { %1568 = vmatpush.msra.mxu0 %v3357_v37  ;;  %1407 = vmatpush.msra.mxu3 %v3338_v38 }
 0x585   :  { %1488 = vmatpush.msrb.mxu2 %v3347_v39  ;;  %v1632_v39 = vld [vmem:[%s4922_s9 + $0x10] sm:$0xff] }
 0x586   :  { %v4344_v50 = vpop.f32.mrf.mxu1  ;;  %1569 = vmatpush.msra.mxu0 %v3356_v40 }
 0x587   :  { %3331 = vmatmul.msk.f32.vlgmr.msrb.gmra.mxu1 %vm5028_vm5, %v1308_v47  ;;  %v1443_v46 = vrot.slane %v4344_v50, 1  ;;  %v1470_v55 = vrot.slane %v4344_v50, 2  ;;  %v1551_v57 = vrot.slane %v4344_v50, 5  ;;  %v1524_v59 = vrot.slane %v4344_v50, 4  ;;  %vm5036_vm5 = vmmov %vm5025_vm0  ;;  %v1631_v47 = vld [vmem:[%s4922_s9 + $0x8] sm:$0xff] }
 0x588   :  { %1541 = vmatpush.msrb.mxu1 %v3354_v49  ;;  %v1497_v1 = vrot.slane %v4344_v50, 3  ;;  %v1578_v3 = vrot.slane %v4344_v50, 6  ;;  %v1605_v14 = vrot.slane %v4344_v50, 7  ;;  %v1630_v49 = vld [vmem:[%s4922_s9] sm:$0xff] }
 0x589   :  { %3328 = vmatmul.msk.f32.vlgmr.msrb.gmra.mxu3 %vm5029_vm7, %v1281_v42  ;;  %3337 = vmatmul.msk.f32.vlgmr.msra.gmra.mxu2 %vm5030_vm11, %v1362_v52  ;;  %vm5037_vm7 = vmmov %vm5025_vm0 }
 0x58a   :  { %3346 = vmatmul.msk.f32.vlgmr.msrb.gmra.mxu0 %vm5031_vm12, %v1443_v46  ;;  %1595 = vmatpush.msra.mxu2 %v3360_v53  ;;  %vm5038_vm11 = vmmov %vm5025_vm0 }
 0x58b   :  { %1514 = vmatpush.msrb.mxu3 %v3351_v54  ;;  %1542 = vmatpush.msrb.mxu1 %v3353_v41  ;;  %vm5039_vm12 = vmmov %vm5035_vm4 }
 0x58c   :  { %1596 = vmatpush.msra.mxu2 %v3359_v43 }
 0x58d   :  { %1515 = vmatpush.msrb.mxu3 %v3350_v44 }
 0x58f   :  { %3343 = vmatmul.msk.f32.vlgmr.msra.gmra.mxu1 %vm5032_vm14, %v4344_v50  ;;  %vm5040_vm14 = vmmov %vm5035_vm4 }
 0x590   :  { %1651 = vmatpush.msra.mxu1 %v1644_v23 }
 0x591   :  { %3340 = vmatmul.msk.f32.vlgmr.msra.gmra.mxu3 %vm5033_vm15, %v1389_v45  ;;  %3349 = vmatmul.msk.f32.vlgmr.msrb.gmra.mxu2 %vm5025_vm0, %v1470_v55  ;;  %vm5041_vm15 = vmmov %vm5025_vm0  ;;  %vm5042_vm0 = vcmask 203776  }
 0x592   :  { %3358 = vmatmul.msk.f32.vlgmr.msra.gmra.mxu0 %vm5034_vm1, %v1551_v57  ;;  %3369 = vmatpush.msk.msrb.mxu2 %vm5035_vm4, %v1905_v9  ;;  %vm5043_vm1 = vmmov %vm5035_vm4 }
 0x593   :  { %1622 = vmatpush.msra.mxu3 %v3363_v58  ;;  %vm5044_vm4 = vmmov %vm5043_vm1  ;;  %1652 = vmatpush.msra.mxu1 %v1643_v24 }
 0x594   :  { %1951 = vmatpush.msrb.mxu2 %v1899_v63 }
 0x595   :  { %1623 = vmatpush.msra.mxu3 %v3362_v62  ;;  %1653 = vmatpush.msra.mxu1 %v1642_v25 }
 0x596   :  { %1952 = vmatpush.msrb.mxu2 %v1893_v5 }
 0x597   :  { %3355 = vmatmul.msk.f32.vlgmr.msrb.gmra.mxu1 %vm5036_vm5, %v1524_v59  ;;  %vm5045_vm5 = vmmov %vm5042_vm0 }
 0x598   :  { %1953 = vmatpush.msrb.mxu2 %v1887_v0  ;;  %1654 = vmatpush.msra.mxu1 %v1641_v26 }
 0x599   :  { %3352 = vmatmul.msk.f32.vlgmr.msrb.gmra.mxu3 %vm5037_vm7, %v1497_v1  ;;  %3361 = vmatmul.msk.f32.vlgmr.msra.gmra.mxu2 %vm5038_vm11, %v1578_v3  ;;  %vm5046_vm7 = vmmov %vm5042_vm0 }
 0x59a   :  { %3371 = vmatpush.msk.msrb.mxu3 %vm5039_vm12, %v1906_v4  ;;  %3373 = vmatpush.msk.msra.mxu2 %vm5040_vm14, %v1907_v6  ;;  %vm5047_vm11 = vmmov %vm5043_vm1 }
 0x59b   :  { %vm5048_vm12 = vmmov %vm5042_vm0  ;;  %1655 = vmatpush.msra.mxu1 %v1640_v27 }
 0x59c   :  { %1971 = vmatpush.msrb.mxu3 %v1900_v7  ;;  %1991 = vmatpush.msra.mxu2 %v1901_v8  ;;  %vm5049_vm14 = vmmov %vm5042_vm0  ;;  %v1915_v8 = vpop.permute.xlu2 %1914 }
 0x59d   :  { %1656 = vmatpush.msra.mxu1 %v1639_v28  ;;  %v1681_v28 = vld [vmem:[%s4924_s11 + $0x50] sm:$0xf] }
 0x59e   :  { %1972 = vmatpush.msrb.mxu3 %v1894_v10  ;;  %1992 = vmatpush.msra.mxu2 %v1895_v11 }
 0x59f   :  { %1657 = vmatpush.msra.mxu1 %v1638_v29  ;;  %v1680_v29 = vld [vmem:[%s4924_s11 + $0x48] sm:$0xff] }
 0x5a0   :  { %1973 = vmatpush.msrb.mxu3 %v1888_v13  ;;  %1993 = vmatpush.msra.mxu2 %v1889_v56 }
 0x5a1   :  { %3364 = vmatmul.msk.f32.vlgmr.msra.gmra.mxu3 %vm5041_vm15, %v1605_v14  ;;  %3370 = vmatmul.msk.f32.vlgmr.msrb.gmra.mxu2 %vm5042_vm0, %v1886_v12  ;;  %vm5050_vm15 = vmmov %vm5042_vm0  ;;  %vm1646_vm0 = vcmask 982016  }
 0x5a2   :  { %3375 = vmatpush.msk.msra.mxu3 %vm5043_vm1, %v1908_v15  ;;  %3377 = vmatpush.msk.msrb.mxu2 %vm5044_vm4, %v1909_v60  ;;  %vm1687_vm1 = vcmask 1043456   ;;  %vm1683_vm4 = vcmask 687104  }
 0x5a3   :  { %1658 = vmatpush.msra.mxu1 %v1637_v30  ;;  %3366 = vmatpush.msk.msrb.mxu0 %vm1687_vm1, %v1681_v28  ;;  %v1679_v30 = vld [vmem:[%s4924_s11 + $0x40] sm:$0xff]  ;;  %v2218_v28 = vld [vmem:[#allocation4 + $0x2a0] sm:$0xff] }
 0x5a4   :  { %2011 = vmatpush.msra.mxu3 %v1902_v61  ;;  %2031 = vmatpush.msrb.mxu2 %v1903_v16 }
 0x5a5   :  { %1659 = vmatpush.msra.mxu1 %v1636_v31  ;;  %1697 = vmatpush.msrb.mxu0 %v1680_v29  ;;  %v1678_v31 = vld [vmem:[%s4924_s11 + $0x38] sm:$0xff] }
 0x5a6   :  { %2012 = vmatpush.msra.mxu3 %v1896_v17  ;;  %2032 = vmatpush.msrb.mxu2 %v1897_v48  ;;  %v2250_v29 = vld [vmem:[#allocation4 + $0x3a0] sm:$0xff] }
 0x5a7   :  { %1660 = vmatpush.msra.mxu1 %v1635_v33  ;;  %1698 = vmatpush.msrb.mxu0 %v1679_v30  ;;  %v1676_v33 = vld [vmem:[%s4924_s11 + $0x28] sm:$0xff] }
 0x5a8   :  { %2013 = vmatpush.msra.mxu3 %v1890_v51  ;;  %2033 = vmatpush.msrb.mxu2 %v1891_v18 }
 0x5a9   :  { %3372 = vmatmul.msk.f32.vlgmr.msrb.gmra.mxu3 %vm5045_vm5, %v1886_v12  ;;  %3374 = vmatmul.msk.f32.vlgmr.msra.gmra.mxu2 %vm5046_vm7, %v1886_v12  ;;  %vm5051_vm5 = vcmask 1039360  }
 0x5aa   :  { %3379 = vmatpush.msk.msrb.mxu3 %vm5047_vm11, %v1910_v19  ;;  %1661 = vmatpush.msra.mxu1 %v1634_v35  ;;  %v1674_v35 = vld [vmem:[%s4924_s11 + $0x18] sm:$0xff]  ;;  %vm5052_vm7 = vmmov %vm5051_vm5 }
 0x5ab   :  { %1699 = vmatpush.msrb.mxu0 %v1678_v31  ;;  %vm5053_vm11 = vmmov %vm5051_vm5 }
 0x5ac   :  { %2051 = vmatpush.msrb.mxu3 %v1904_v20  ;;  %1662 = vmatpush.msra.mxu1 %v1633_v2  ;;  %v1673_v2 = vld [vmem:[%s4924_s11 + $0x10] sm:$0xff] }
 0x5ae   :  { %2052 = vmatpush.msrb.mxu3 %v1898_v21  ;;  %1663 = vmatpush.msra.mxu1 %v1632_v39  ;;  %v2194_v39 = vld [vmem:[#allocation4 + $0x1e0] sm:$0xff] }
 0x5b0   :  { %2053 = vmatpush.msrb.mxu3 %v1892_v22  ;;  %1664 = vmatpush.msra.mxu1 %v1631_v47  ;;  %v2164_v47 = vld [vmem:[#allocation4 + $0xf0] sm:$0xff] }
 0x5b1   :  { %3376 = vmatmul.msk.f32.vlgmr.msra.gmra.mxu3 %vm5048_vm12, %v1886_v12  ;;  %3378 = vmatmul.msk.f32.vlgmr.msrb.gmra.mxu2 %vm5049_vm14, %v1886_v12  ;;  %vm5054_vm12 = vmmov %vm5051_vm5 }
 0x5b2   :  { %1665 = vmatpush.msra.mxu1 %v1630_v49  ;;  %v2162_v49 = vld [vmem:[#allocation4 + $0xe0] sm:$0xff]  ;;  %vm5055_vm14 = vmmov %vm5051_vm5 }
 0x5b9   :  { %3380 = vmatmul.msk.f32.vlgmr.msrb.gmra.mxu3 %vm5050_vm15, %v1886_v12  ;;  %vm1711_vm15 = vcmask 73728  }
 0x5fc   :  { %v1220_v32 = vpop.f32.mrf.mxu1 }
 0x5fd   :  { %v1223_v38 = vadd.f32 %v1220_v32, %v1197_v34  ;;  %v1677_v32 = vld [vmem:[%s4924_s11 + $0x30] sm:$0xff]  ;;  %v1675_v34 = vld [vmem:[%s4924_s11 + $0x20] sm:$0xff] }
 0x5fe   :  { %1700 = vmatpush.msrb.mxu0 %v1677_v32 }
 0x5ff   :  { %v1355_v42 = vpop.f32.mrf.mxu0 }
 0x600   :  { %1701 = vmatpush.msrb.mxu0 %v1676_v33  ;;  %v2174_v33 = vld [vmem:[#allocation4 + $0x140] sm:$0xff] }
 0x602   :  { %1702 = vmatpush.msrb.mxu0 %v1675_v34  ;;  %v2144_v34 = vld [vmem:[#allocation4 + $0x50] sm:$0xff] }
 0x604   :  { %v1247_v36 = vpop.f32.mrf.mxu3  ;;  %v1274_v37 = vpop.f32.mrf.mxu2  ;;  %1703 = vmatpush.msrb.mxu0 %v1674_v35 }
 0x605   :  { %v1250_v40 = vadd.f32 %v1247_v36, %v1223_v38  ;;  %v1328_v50 = vpop.f32.mrf.mxu1  ;;  %v1672_v36 = vld [vmem:[%s4924_s11 + $0x8] sm:$0xff] }
 0x606   :  { %1704 = vmatpush.msrb.mxu0 %v1673_v2  ;;  %v2196_v38 = vld [vmem:[#allocation4 + $0x1f0] sm:$0xff] }
 0x607   :  { %v1277_v52 = vadd.f32 %v1274_v37, %v1250_v40  ;;  %v1463_v9 = vpop.f32.mrf.mxu0  ;;  %v1671_v37 = vld [vmem:[%s4924_s11] sm:$0xff]  ;;  %2323 = vmatpush.msra.mxu2 %v2196_v38  ;;  %v2192_v40 = vld [vmem:[#allocation4 + $0x1d0] sm:$0xff]  ;;  %v2246_v38 = vld [vmem:[#allocation4 + $0x380] sm:$0xff] }
 0x608   :  { %1705 = vmatpush.msrb.mxu0 %v1672_v36  ;;  %v2172_v2 = vld [vmem:[#allocation4 + $0x130] sm:$0xff] }
 0x609   :  { %2324 = vmatpush.msra.mxu2 %v2194_v39  ;;  %v2248_v36 = vld [vmem:[#allocation4 + $0x390] sm:$0xff] }
 0x60a   :  { %1706 = vmatpush.msrb.mxu0 %v1671_v37  ;;  %v2170_v37 = vld [vmem:[#allocation4 + $0x120] sm:$0xff] }
 0x60b   :  { %2325 = vmatpush.msra.mxu2 %v2192_v40  ;;  %v2168_v40 = vld [vmem:[#allocation4 + $0x110] sm:$0xff] }
 0x60c   :  { %v1301_v46 = vpop.f32.mrf.mxu3  ;;  %v1382_v53 = vpop.f32.mrf.mxu2  ;;  %2303 = vmatpush.msra.mxu0 %v2164_v47 }
 0x60d   :  { %v1304_v54 = vadd.f32 %v1301_v46, %v1277_v52  ;;  %v1436_v45 = vpop.f32.mrf.mxu1  ;;  %v2188_v52 = vld [vmem:[#allocation4 + $0x1b0] sm:$0xff]  ;;  %v2158_v46 = vld [vmem:[#allocation4 + $0xc0] sm:$0xff] }
 0x60e   :  { %2304 = vmatpush.msra.mxu0 %v2162_v49 }
 0x60f   :  { %v1331_v41 = vadd.f32 %v1328_v50, %v1304_v54  ;;  %v1571_v6 = vpop.f32.mrf.mxu0  ;;  %v2190_v50 = vld [vmem:[#allocation4 + $0x1c0] sm:$0xff]  ;;  %v2156_v54 = vld [vmem:[#allocation4 + $0xb0] sm:$0xff] }
 0x610   :  { %2326 = vmatpush.msra.mxu2 %v2190_v50  ;;  %v2138_v50 = vld [vmem:[#allocation4 + $0x20] sm:$0xff] }
 0x611   :  { %v1358_v43 = vadd.f32 %v1355_v42, %v1331_v41  ;;  %v2160_v42 = vld [vmem:[#allocation4 + $0xd0] sm:$0xff] }
 0x612   :  { %2305 = vmatpush.msra.mxu0 %v2160_v42  ;;  %v2228_v41 = vld [vmem:[#allocation4 + $0x2f0] sm:$0xff]  ;;  %2327 = vmatpush.msra.mxu2 %v2188_v52  ;;  %v2166_v52 = vld [vmem:[#allocation4 + $0x100] sm:$0xff] }
 0x613   :  { %v1385_v44 = vadd.f32 %v1382_v53, %v1358_v43  ;;  %v2186_v53 = vld [vmem:[#allocation4 + $0x1a0] sm:$0xff]  ;;  %v2260_v43 = vld [vmem:[#allocation4 + $0x3f0] sm:$0xff]  ;;  %2343 = vmatpush.msra.mxu3 %v2228_v41 }
 0x614   :  { %v1409_v55 = vpop.f32.mrf.mxu3  ;;  %v1490_v57 = vpop.f32.mrf.mxu2  ;;  %2306 = vmatpush.msra.mxu0 %v2158_v46  ;;  %2363 = vmatpush.msrb.mxu1 %v2260_v43  ;;  %v2212_v42 = vld [vmem:[#allocation4 + $0x270] sm:$0xff]  ;;  %v2210_v43 = vld [vmem:[#allocation4 + $0x260] sm:$0xff] }
 0x615   :  { %v1412_v58 = vadd.f32 %v1409_v55, %v1385_v44  ;;  %v1544_v3 = vpop.f32.mrf.mxu1  ;;  %v2226_v44 = vld [vmem:[#allocation4 + $0x2e0] sm:$0xff]  ;;  %v2184_v55 = vld [vmem:[#allocation4 + $0x190] sm:$0xff]  ;;  %2328 = vmatpush.msra.mxu2 %v2186_v53  ;;  %v2165_v53 = vld [vmem:[#allocation4 + $0xf8] sm:$0xff] }
 0x616   :  { %2307 = vmatpush.msra.mxu0 %v2156_v54  ;;  %2344 = vmatpush.msra.mxu3 %v2226_v44  ;;  %v2244_v46 = vld [vmem:[#allocation4 + $0x370] sm:$0xff]  ;;  %v2134_v44 = vld [vmem:[#allocation4] sm:$0xff] }
 0x617   :  { %v1439_v62 = vadd.f32 %v1436_v45, %v1412_v58  ;;  %v2258_v45 = vld [vmem:[#allocation4 + $0x3e0] sm:$0xff]  ;;  %v1645_v58 = vld [vmem:[%s4923_s10] sm:$0x1]  ;;  %2329 = vmatpush.msra.mxu2 %v2184_v55  ;;  %v2136_v41 = vld [vmem:[#allocation4 + $0x10] sm:$0xff] }
 0x618   :  { %2364 = vmatpush.msrb.mxu1 %v2258_v45  ;;  %v2208_v45 = vld [vmem:[#allocation4 + $0x250] sm:$0xff]  ;;  %v2161_v55 = vld [vmem:[#allocation4 + $0xd8] sm:$0xff] }
 0x619   :  { %v1466_v63 = vadd.f32 %v1463_v9, %v1439_v62  ;;  %v2224_v9 = vld [vmem:[#allocation4 + $0x2d0] sm:$0xff] }
 0x61a   :  { %v2256_v62 = vld [vmem:[#allocation4 + $0x3d0] sm:$0xff]  ;;  %2345 = vmatpush.msra.mxu3 %v2224_v9  ;;  %v2206_v9 = vld [vmem:[#allocation4 + $0x240] sm:$0xff] }
 0x61b   :  { %v1493_v5 = vadd.f32 %v1490_v57, %v1466_v63  ;;  %v2154_v57 = vld [vmem:[#allocation4 + $0xa0] sm:$0xff]  ;;  %2365 = vmatpush.msrb.mxu1 %v2256_v62  ;;  %v2159_v62 = vld [vmem:[#allocation4 + $0xc8] sm:$0xff] }
 0x61c   :  { %v1517_v59 = vpop.f32.mrf.mxu3  ;;  %v1598_v0 = vpop.f32.mrf.mxu2  ;;  %2308 = vmatpush.msra.mxu0 %v2154_v57  ;;  %v2292_v57 = vld [vmem:[#allocation4 + $0x4f0] sm:$0x7f] }
 0x61d   :  { %v1520_v1 = vadd.f32 %v1517_v59, %v1493_v5  ;;  %v2182_v5 = vld [vmem:[#allocation4 + $0x180] sm:$0xff]  ;;  %v2152_v59 = vld [vmem:[#allocation4 + $0x90] sm:$0xff] }
 0x61e   :  { %2330 = vmatpush.msra.mxu2 %v2182_v5  ;;  %2309 = vmatpush.msra.mxu0 %v2152_v59  ;;  %v2238_v5 = vld [vmem:[#allocation4 + $0x340] sm:$0xff]  ;;  %v2204_v59 = vld [vmem:[#allocation4 + $0x230] sm:$0xff] }
 0x61f   :  { %v1547_v4 = vadd.f32 %v1544_v3, %v1520_v1 }
 0x621   :  { %v1574_v7 = vadd.f32 %v1571_v6, %v1547_v4  ;;  %v2222_v4 = vld [vmem:[#allocation4 + $0x2c0] sm:$0xff] }
 0x622   :  { %v2254_v6 = vld [vmem:[#allocation4 + $0x3c0] sm:$0xff]  ;;  %2346 = vmatpush.msra.mxu3 %v2222_v4 }
 0x623   :  { %v1601_v10 = vadd.f32 %v1598_v0, %v1574_v7  ;;  %2366 = vmatpush.msrb.mxu1 %v2254_v6  ;;  %v2202_v4 = vld [vmem:[#allocation4 + $0x220] sm:$0xff]  ;;  %v2155_v6 = vld [vmem:[#allocation4 + $0xa8] sm:$0xff] }
 0x624   :  { %v1625_v11 = vpop.f32.mrf.mxu3  ;;  %v1955_v12 = vpop.f32.mrf.mxu2 }
 0x625   :  { %v1628_v13 = vadd.f32 %v1625_v11, %v1601_v10  ;;  %v4450_v56 = vadd.f32 %v1955_v12, %v1915_v8  ;;  %v2180_v10 = vld [vmem:[#allocation4 + $0x170] sm:$0xff]  ;;  %v2150_v11 = vld [vmem:[#allocation4 + $0x80] sm:$0xff] }
 0x626   :  { %2331 = vmatpush.msra.mxu2 %v2180_v10  ;;  %2310 = vmatpush.msra.mxu0 %v2150_v11  ;;  %v2153_v10 = vld [vmem:[#allocation4 + $0x98] sm:$0xff]  ;;  %v2284_v11 = vld [vmem:[#allocation4 + $0x4b0] sm:$0xff] }
 0x627   :  { %v1629_v14 = vmax.f32 %v1628_v13, 0.0  ;;  %v2058_v15 = vmax.f32 %v4450_v56, 0.0  ;;  %v2146_v56 = vld [vmem:[#allocation4 + $0x60] sm:$0xff] }
 0x629   :  { %3365 = vmatmul.msk.f32.vlgmr.msra.gmra.mxu1 %vm1646_vm0, %v1629_v14  ;;  %2069 = vrot.lane.b32.xlu2 %v2058_v15, %s3586_s16 }
 0x62c   :  { %v1975_v60 = vpop.f32.mrf.mxu3  ;;  %v1995_v61 = vpop.f32.mrf.mxu2 }
 0x62d   :  { %v4457_v16 = vadd.f32 %v1975_v60, %v1915_v8  ;;  %v4459_v17 = vadd.f32 %v1995_v61, %v1915_v8  ;;  %v2178_v60 = vld [vmem:[#allocation4 + $0x160] sm:$0xff]  ;;  %v2148_v61 = vld [vmem:[#allocation4 + $0x70] sm:$0xff] }
 0x62e   :  { %2332 = vmatpush.msra.mxu2 %v2178_v60  ;;  %2311 = vmatpush.msra.mxu0 %v2148_v61  ;;  %v2147_v60 = vld [vmem:[#allocation4 + $0x68] sm:$0xff]  ;;  %v2145_v61 = vld [vmem:[#allocation4 + $0x58] sm:$0xff] }
 0x62f   :  { %v2059_v48 = vmax.f32 %v4457_v16, 0.0  ;;  %v2060_v51 = vmax.f32 %v4459_v17, 0.0  ;;  %v2142_v16 = vld [vmem:[#allocation4 + $0x40] sm:$0xff] }
 0x630   :  { %2312 = vmatpush.msra.mxu0 %v2146_v56  ;;  %v2232_v56 = vld [vmem:[#allocation4 + $0x310] sm:$0xff] }
 0x631   :  { %v3504_v18 = vpack.i.bf16 %v2060_v51, %v2059_v48 }
 0x632   :  { %2313 = vmatpush.msra.mxu0 %v2144_v34  ;;  %v2278_v34 = vld [vmem:[#allocation4 + $0x480] sm:$0xff] }
 0x633   :  { %3505 = vrot.lane.b32.xlu0 %v3504_v18, %s3586_s16 }
 0x634   :  { %v2015_v19 = vpop.f32.mrf.mxu3  ;;  %v2035_v20 = vpop.f32.mrf.mxu2  ;;  %2314 = vmatpush.msra.mxu0 %v2142_v16  ;;  %v2276_v16 = vld [vmem:[#allocation4 + $0x470] sm:$0xff] }
 0x635   :  { %v4468_v21 = vadd.f32 %v2015_v19, %v1915_v8  ;;  %v2036_v22 = vadd.f32 %v2035_v20, %v1915_v8  ;;  %v2220_v19 = vld [vmem:[#allocation4 + $0x2b0] sm:$0xff] }
 0x636   :  { %v2252_v20 = vld [vmem:[#allocation4 + $0x3b0] sm:$0xff]  ;;  %2347 = vmatpush.msra.mxu3 %v2220_v19  ;;  %v2141_v19 = vld [vmem:[#allocation4 + $0x38] sm:$0xff] }
 0x637   :  { %v2061_v23 = vmax.f32 %v4468_v21, 0.0  ;;  %v4471_v24 = vmax.f32 %v2036_v22, 0.0  ;;  %2367 = vmatpush.msrb.mxu1 %v2252_v20  ;;  %v2140_v21 = vld [vmem:[#allocation4 + $0x30] sm:$0xff]  ;;  %v2282_v20 = vld [vmem:[#allocation4 + $0x4a0] sm:$0xff] }
 0x638   :  { %2348 = vmatpush.msra.mxu3 %v2218_v28  ;;  %2315 = vmatpush.msra.mxu0 %v2140_v21  ;;  %v2137_v28 = vld [vmem:[#allocation4 + $0x18] sm:$0xff] }
 0x639   :  { %2075 = vrot.lane.b32.xlu1 %v2061_v23, %s3586_s16  ;;  %2368 = vmatpush.msrb.mxu1 %v2250_v29  ;;  %v2198_v29 = vld [vmem:[#allocation4 + $0x200] sm:$0xff]  ;;  %v2193_v21 = vld [vmem:[#allocation4 + $0x1d8] sm:$0xff] }
 0x63a   :  { %2316 = vmatpush.msra.mxu0 %v2138_v50  ;;  %v2221_v50 = vld [vmem:[#allocation4 + $0x2b8] sm:$0xff] }
 0x63b   :  { %2077 = vrot.lane.b32.xlu0 %v4471_v24, %s3586_s16  ;;  %2369 = vmatpush.msrb.mxu1 %v2248_v36  ;;  %v2227_v36 = vld [vmem:[#allocation4 + $0x2e8] sm:$0xff] }
 0x63c   :  { %v2055_v25 = vpop.f32.mrf.mxu3  ;;  %2317 = vmatpush.msra.mxu0 %v2136_v41  ;;  %v2217_v41 = vld [vmem:[#allocation4 + $0x298] sm:$0xff] }
 0x63d   :  { %v4478_v26 = vadd.f32 %v2055_v25, %v1915_v8  ;;  %v2176_v25 = vld [vmem:[#allocation4 + $0x150] sm:$0xff]  ;;  %2370 = vmatpush.msrb.mxu1 %v2246_v38 }
 0x63e   :  { %2333 = vmatpush.msra.mxu2 %v2176_v25  ;;  %2318 = vmatpush.msra.mxu0 %v2134_v44  ;;  %v2200_v25 = vld [vmem:[#allocation4 + $0x210] sm:$0xff]  ;;  %v2262_v44 = vld [vmem:[#allocation4 + $0x400] sm:$0xff] }
 0x63f   :  { %v2063_v27 = vmax.f32 %v4478_v26, 0.0  ;;  %v2163_v26 = vld [vmem:[#allocation4 + $0xe8] sm:$0xff]  ;;  %2371 = vmatpush.msrb.mxu1 %v2244_v46  ;;  %v2272_v38 = vld [vmem:[#allocation4 + $0x450] sm:$0xff] }
 0x640   :  { %2334 = vmatpush.msra.mxu2 %v2174_v33  ;;  %v2230_v33 = vld [vmem:[#allocation4 + $0x300] sm:$0xff]  ;;  %v2219_v46 = vld [vmem:[#allocation4 + $0x2a8] sm:$0xff] }
 0x641   :  { %2094 = vrot.lane.b32.xlu1 %v2063_v27, %s3586_s16 }
 0x642   :  { %2335 = vmatpush.msra.mxu2 %v2172_v2  ;;  %v2229_v2 = vld [vmem:[#allocation4 + $0x2f8] sm:$0xff] }
 0x644   :  { %2336 = vmatpush.msra.mxu2 %v2170_v37  ;;  %v2274_v37 = vld [vmem:[#allocation4 + $0x460] sm:$0xff] }
 0x646   :  { %2337 = vmatpush.msra.mxu2 %v2168_v40  ;;  %v2223_v40 = vld [vmem:[#allocation4 + $0x2c8] sm:$0xff] }
 0x648   :  { %2338 = vmatpush.msra.mxu2 %v2166_v52  ;;  %v2187_v52 = vld [vmem:[#allocation4 + $0x1a8] sm:$0xff] }
 0x64a   :  { %2403 = vmatpush.msrb.mxu2 %v2165_v53  ;;  %v2266_v53 = vld [vmem:[#allocation4 + $0x420] sm:$0xff] }
 0x64c   :  { %2404 = vmatpush.msrb.mxu2 %v2163_v26  ;;  %v2183_v26 = vld [vmem:[#allocation4 + $0x188] sm:$0xff] }
 0x64e   :  { %2405 = vmatpush.msrb.mxu2 %v2161_v55  ;;  %v2213_v55 = vld [vmem:[#allocation4 + $0x278] sm:$0xff] }
 0x650   :  { %2406 = vmatpush.msrb.mxu2 %v2159_v62  ;;  %v2209_v62 = vld [vmem:[#allocation4 + $0x258] sm:$0xff] }
 0x683   :  { %v2070_v7 = vpop.permute.xlu2 %2069 }
 0x6a5   :  { %v3506_v63 = vpop.permute.xlu0 %3505 }
 0x6a6   :  { %v3508_v0 = vunpack.i.h.bf16 %v3506_v63  ;;  %v3507_v1 = vunpack.i.l.bf16 %v3506_v63  ;;  %v1667_v3 = vpop.f32.mrf.mxu1  ;;  %v2290_v63 = vld [vmem:[#allocation4 + $0x4e0] sm:$0xff] }
 0x6a7   :  { %v1668_v8 = vadd.f32 %v1667_v3, %v1645_v58  ;;  %v2240_v58 = vld [vmem:[#allocation4 + $0x350] sm:$0xff] }
 0x6a8   :  { %v2079_v12 = vsel %vm5051_vm5, %v2070_v7, %v3507_v1  ;;  %v2080_v18 = vsel %vm5052_vm7, %v3507_v1, %v3508_v0  ;;  %v2288_v1 = vld [vmem:[#allocation4 + $0x4d0] sm:$0xff]  ;;  %v2286_v7 = vld [vmem:[#allocation4 + $0x4c0] sm:$0xff]  ;;  %vm5071_vm7 = vcmask 654336  }
 0x6a9   :  { %v1670_v13 = vmax.f32 %v1668_v8, 0.0  ;;  %v4524_v14 = vmax.f32 %v2058_v15, %v2079_v12  ;;  %v4539_v32 = vmax.f32 %v2059_v48, %v2080_v18  ;;  %v2216_v48 = vld [vmem:[#allocation4 + $0x290] sm:$0xff]  ;;  %v2234_v8 = vld [vmem:[#allocation4 + $0x320] sm:$0xff]  ;;  %v2151_v12 = vld [vmem:[#allocation4 + $0x88] sm:$0xff] }
 0x6aa   :  { %2349 = vmatpush.msra.mxu3 %v2216_v48  ;;  %v2236_v3 = vld [vmem:[#allocation4 + $0x330] sm:$0xff]  ;;  %v2143_v18 = vld [vmem:[#allocation4 + $0x48] sm:$0xff] }
 0x6ab   :  { %3367 = vmatmul.msk.f32.vlgmr.msrb.gmra.mxu0 %vm1683_vm4, %v1670_v13  ;;  %v2076_v22 = vpop.permute.xlu1 %2075  ;;  %2107 = vrot.lane.b32.xlu0 %v4524_v14, %s4995_s29  ;;  %v2149_v13 = vld [vmem:[#allocation4 + $0x78] sm:$0xff]  ;;  %v2195_v48 = vld [vmem:[#allocation4 + $0x1e8] sm:$0xff] }
 0x6ac   :  { %v2081_v15 = vsel %vm5053_vm11, %v3508_v0, %v2076_v22  ;;  %3381 = vmatpush.msk.msrb.mxu0 %vm698_vm3, %v2292_v57  ;;  %v2157_v0 = vld [vmem:[#allocation4 + $0xb8] sm:$0xff]  ;;  %v2179_v57 = vld [vmem:[#allocation4 + $0x168] sm:$0xff]  ;;  %vm5072_vm11 = vcmask 719872  }
 0x6ad   :  { %v4533_v30 = vmax.f32 %v2060_v51, %v2081_v15  ;;  %v4535_v31 = vpop.permute.xlu0 %2077  ;;  %2407 = vmatpush.msrb.mxu2 %v2157_v0  ;;  %v2280_v15 = vld [vmem:[#allocation4 + $0x490] sm:$0xff]  ;;  %v2205_v0 = vld [vmem:[#allocation4 + $0x238] sm:$0xff] }
 0x6ae   :  { %v2082_v35 = vsel %vm5054_vm12, %v2076_v22, %v4535_v31  ;;  %2384 = vmatpush.msrb.mxu0 %v2290_v63  ;;  %v2139_v22 = vld [vmem:[#allocation4 + $0x28] sm:$0xff]  ;;  %vm5073_vm12 = vcmask 728064  }
 0x6af   :  { %v4545_v17 = vmax.f32 %v2061_v23, %v2082_v35  ;;  %v3509_v51 = vpack.i.bf16 %v4533_v30, %v4539_v32  ;;  %v2214_v23 = vld [vmem:[#allocation4 + $0x280] sm:$0xff]  ;;  %2408 = vmatpush.msrb.mxu2 %v2155_v6  ;;  %v2135_v35 = vld [vmem:[#allocation4 + $0x8] sm:$0xff] }
 0x6b0   :  { %2350 = vmatpush.msra.mxu3 %v2214_v23  ;;  %2385 = vmatpush.msrb.mxu0 %v2288_v1  ;;  %v2225_v23 = vld [vmem:[#allocation4 + $0x2d8] sm:$0xff]  ;;  %v2175_v63 = vld [vmem:[#allocation4 + $0x148] sm:$0xff] }
 0x6b1   :  { %2113 = vrot.lane.b32.xlu1 %v4545_v17, %s4995_s29  ;;  %3510 = vrot.lane.b32.xlu2 %v3509_v51, %s4995_s29  ;;  %v2197_v51 = vld [vmem:[#allocation4 + $0x1f8] sm:$0xff] }
 0x6b2   :  { %2351 = vmatpush.msra.mxu3 %v2212_v42  ;;  %2386 = vmatpush.msrb.mxu0 %v2286_v7  ;;  %v2268_v42 = vld [vmem:[#allocation4 + $0x430] sm:$0xff]  ;;  %v2203_v7 = vld [vmem:[#allocation4 + $0x228] sm:$0xff] }
 0x6b3   :  { %v2095_v39 = vpop.permute.xlu1 %2094  ;;  %2409 = vmatpush.msrb.mxu2 %v2153_v10  ;;  %v2201_v10 = vld [vmem:[#allocation4 + $0x218] sm:$0xff] }
 0x6b4   :  { %v2096_v47 = vsel %vm5055_vm14, %v4535_v31, %v2095_v39  ;;  %v2100_v49 = vmax.f32 %v2063_v27, %v2095_v39  ;;  %v2242_v27 = vld [vmem:[#allocation4 + $0x360] sm:$0xff]  ;;  %2352 = vmatpush.msra.mxu3 %v2210_v43  ;;  %2387 = vmatpush.msrb.mxu0 %v2284_v11  ;;  %v2191_v39 = vld [vmem:[#allocation4 + $0x1c8] sm:$0xff]  ;;  %v2264_v43 = vld [vmem:[#allocation4 + $0x410] sm:$0xff]  ;;  %vm5074_vm14 = vcmask 744448  }
 0x6b5   :  { %v2099_v54 = vmax.f32 %v4471_v24, %v2096_v47  ;;  %2372 = vmatpush.msrb.mxu1 %v2242_v27  ;;  %2410 = vmatpush.msrb.mxu2 %v2151_v12  ;;  %v2270_v47 = vld [vmem:[#allocation4 + $0x440] sm:$0xff]  ;;  %v2215_v27 = vld [vmem:[#allocation4 + $0x288] sm:$0xff] }
 0x6b6   :  { %2117 = vrot.lane.b32.xlu0 %v2100_v49, %s4995_s29  ;;  %2353 = vmatpush.msra.mxu3 %v2208_v45  ;;  %v2189_v49 = vld [vmem:[#allocation4 + $0x1b8] sm:$0xff] }
 0x6b7   :  { %2373 = vmatpush.msrb.mxu1 %v2240_v58  ;;  %2411 = vmatpush.msrb.mxu2 %v2149_v13  ;;  %v2181_v45 = vld [vmem:[#allocation4 + $0x178] sm:$0xff]  ;;  %v2211_v58 = vld [vmem:[#allocation4 + $0x268] sm:$0xff] }
 0x6b8   :  { %2354 = vmatpush.msra.mxu3 %v2206_v9  ;;  %2388 = vmatpush.msrb.mxu0 %v2282_v20  ;;  %v2177_v9 = vld [vmem:[#allocation4 + $0x158] sm:$0xff]  ;;  %v2287_v20 = vld [vmem:[#allocation4 + $0x4c8] sm:$0xff] }
 0x6b9   :  { %2115 = vrot.lane.b32.xlu2 %v2099_v54, %s4995_s29  ;;  %2374 = vmatpush.msrb.mxu1 %v2238_v5  ;;  %v2185_v54 = vld [vmem:[#allocation4 + $0x198] sm:$0xff]  ;;  %v2207_v5 = vld [vmem:[#allocation4 + $0x248] sm:$0xff] }
 0x6ba   :  { %2355 = vmatpush.msra.mxu3 %v2204_v59  ;;  %2412 = vmatpush.msrb.mxu2 %v2147_v60  ;;  %v2173_v59 = vld [vmem:[#allocation4 + $0x138] sm:$0xff]  ;;  %v2167_v60 = vld [vmem:[#allocation4 + $0x108] sm:$0xff] }
 0x6bb   :  { %2375 = vmatpush.msrb.mxu1 %v2236_v3  ;;  %2389 = vmatpush.msrb.mxu0 %v2280_v15  ;;  %v2171_v3 = vld [vmem:[#allocation4 + $0x128] sm:$0xff]  ;;  %v2293_v13 = vld [vmem:[#allocation4 + $0x4f8] sm:$0x7f] }
 0x6bc   :  { %2356 = vmatpush.msra.mxu3 %v2202_v4  ;;  %2413 = vmatpush.msrb.mxu2 %v2145_v61  ;;  %v2199_v61 = vld [vmem:[#allocation4 + $0x208] sm:$0xff] }
 0x6bd   :  { %2376 = vmatpush.msrb.mxu1 %v2234_v8  ;;  %2390 = vmatpush.msrb.mxu0 %v2278_v34  ;;  %v2169_v8 = vld [vmem:[#allocation4 + $0x118] sm:$0xff]  ;;  %v2279_v15 = vld [vmem:[#allocation4 + $0x488] sm:$0xff] }
 0x6be   :  { %2414 = vmatpush.msrb.mxu2 %v2143_v18  ;;  %2357 = vmatpush.msra.mxu3 %v2200_v25  ;;  %v2291_v18 = vld [vmem:[#allocation4 + $0x4e8] sm:$0xff]  ;;  %v2281_v25 = vld [vmem:[#allocation4 + $0x498] sm:$0xff] }
 0x6bf   :  { %2377 = vmatpush.msrb.mxu1 %v2232_v56  ;;  %2391 = vmatpush.msrb.mxu0 %v2276_v16  ;;  %v2277_v34 = vld [vmem:[#allocation4 + $0x478] sm:$0xff] }
 0x6c0   :  { %2415 = vmatpush.msrb.mxu2 %v2141_v19  ;;  %2358 = vmatpush.msra.mxu3 %v2198_v29  ;;  %v2289_v19 = vld [vmem:[#allocation4 + $0x4d8] sm:$0xff] }
 0x6c1   :  { %2378 = vmatpush.msrb.mxu1 %v2230_v33  ;;  %2392 = vmatpush.msrb.mxu0 %v2274_v37  ;;  %v2261_v33 = vld [vmem:[#allocation4 + $0x3f8] sm:$0xff] }
 0x6c2   :  { %2416 = vmatpush.msrb.mxu2 %v2139_v22  ;;  %2423 = vmatpush.msrb.mxu3 %v2197_v51  ;;  %v2285_v22 = vld [vmem:[#allocation4 + $0x4b8] sm:$0xff]  ;;  %v2275_v51 = vld [vmem:[#allocation4 + $0x468] sm:$0xff] }
 0x6c3   :  { %2443 = vmatpush.msra.mxu1 %v2229_v2  ;;  %2393 = vmatpush.msrb.mxu0 %v2272_v38  ;;  %v2255_v38 = vld [vmem:[#allocation4 + $0x3c8] sm:$0xff] }
 0x6c4   :  { %2417 = vmatpush.msrb.mxu2 %v2137_v28  ;;  %2424 = vmatpush.msrb.mxu3 %v2195_v48  ;;  %v2257_v48 = vld [vmem:[#allocation4 + $0x3d8] sm:$0xff] }
 0x6c5   :  { %2444 = vmatpush.msra.mxu1 %v2227_v36  ;;  %2394 = vmatpush.msrb.mxu0 %v2270_v47  ;;  %v2273_v36 = vld [vmem:[#allocation4 + $0x458] sm:$0xff] }
 0x6c6   :  { %2418 = vmatpush.msrb.mxu2 %v2135_v35  ;;  %2425 = vmatpush.msrb.mxu3 %v2193_v21  ;;  %v2259_v35 = vld [vmem:[#allocation4 + $0x3e8] sm:$0xff]  ;;  %v2253_v47 = vld [vmem:[#allocation4 + $0x3b8] sm:$0xff] }
 0x6c7   :  { %2445 = vmatpush.msra.mxu1 %v2225_v23  ;;  %2395 = vmatpush.msrb.mxu0 %v2268_v42 }
 0x6c8   :  { %2426 = vmatpush.msrb.mxu3 %v2191_v39  ;;  %v2271_v39 = vld [vmem:[#allocation4 + $0x448] sm:$0xff] }
 0x6c9   :  { %2446 = vmatpush.msra.mxu1 %v2223_v40  ;;  %2396 = vmatpush.msrb.mxu0 %v2266_v53  ;;  %v1682_v40 = vld [vmem:[%s4925_s12] sm:$0x1] }
 0x6ca   :  { %2427 = vmatpush.msrb.mxu3 %v2189_v49  ;;  %v2269_v49 = vld [vmem:[#allocation4 + $0x438] sm:$0xff]  ;;  %v2267_v53 = vld [vmem:[#allocation4 + $0x428] sm:$0xff] }
 0x6cb   :  { %2447 = vmatpush.msra.mxu1 %v2221_v50  ;;  %2397 = vmatpush.msrb.mxu0 %v2264_v43  ;;  %v2092_v50 = vmax.f32 %v4471_v24, %v4535_v31  ;;  %v2265_v43 = vld [vmem:[#allocation4 + $0x418] sm:$0xff]  ;;  %v2247_v24 = vld [vmem:[#allocation4 + $0x388] sm:$0xff] }
 0x6cc   :  { %2428 = vmatpush.msrb.mxu3 %v2187_v52  ;;  %v2263_v31 = vld [vmem:[#allocation4 + $0x408] sm:$0xff] }
 0x6cd   :  { %2448 = vmatpush.msra.mxu1 %v2219_v46  ;;  %2398 = vmatpush.msrb.mxu0 %v2262_v44  ;;  %v2251_v46 = vld [vmem:[#allocation4 + $0x3a8] sm:$0xff]  ;;  %v2241_v44 = vld [vmem:[#allocation4 + $0x358] sm:$0xff] }
 0x6ce   :  { %2429 = vmatpush.msrb.mxu3 %v2185_v54 }
 0x6cf   :  { %2449 = vmatpush.msra.mxu1 %v2217_v41  ;;  %v2249_v41 = vld [vmem:[#allocation4 + $0x398] sm:$0xff] }
 0x6d0   :  { %2430 = vmatpush.msrb.mxu3 %v2183_v26  ;;  %v2245_v26 = vld [vmem:[#allocation4 + $0x378] sm:$0xff] }
 0x6d1   :  { %2450 = vmatpush.msra.mxu1 %v2215_v27  ;;  %v2243_v27 = vld [vmem:[#allocation4 + $0x368] sm:$0xff] }
 0x6d2   :  { %2431 = vmatpush.msrb.mxu3 %v2181_v45  ;;  %v2239_v45 = vld [vmem:[#allocation4 + $0x348] sm:$0xff] }
 0x6d3   :  { %2451 = vmatpush.msra.mxu1 %v2213_v55  ;;  %v2237_v55 = vld [vmem:[#allocation4 + $0x338] sm:$0xff] }
 0x6d4   :  { %2432 = vmatpush.msrb.mxu3 %v2179_v57  ;;  %v2235_v57 = vld [vmem:[#allocation4 + $0x328] sm:$0xff] }
 0x6d5   :  { %2452 = vmatpush.msra.mxu1 %v2211_v58  ;;  %v2233_v58 = vld [vmem:[#allocation4 + $0x318] sm:$0xff] }
 0x6d6   :  { %2433 = vmatpush.msrb.mxu3 %v2177_v9  ;;  %v2231_v9 = vld [vmem:[#allocation4 + $0x308] sm:$0xff] }
 0x6d7   :  { %2453 = vmatpush.msra.mxu1 %v2209_v62 }
 0x6d8   :  { %2434 = vmatpush.msrb.mxu3 %v2175_v63 }
 0x6d9   :  { %2454 = vmatpush.msra.mxu1 %v2207_v5 }
 0x6da   :  { %2435 = vmatpush.msrb.mxu3 %v2173_v59 }
 0x6db   :  { %2455 = vmatpush.msra.mxu1 %v2205_v0 }
 0x6dc   :  { %2436 = vmatpush.msrb.mxu3 %v2171_v3 }
 0x6dd   :  { %2456 = vmatpush.msra.mxu1 %v2203_v7 }
 0x6de   :  { %2437 = vmatpush.msrb.mxu3 %v2169_v8 }
 0x6df   :  { %2457 = vmatpush.msra.mxu1 %v2201_v10 }
 0x6e0   :  { %2438 = vmatpush.msrb.mxu3 %v2167_v60 }
 0x6e1   :  { %2458 = vmatpush.msra.mxu1 %v2199_v61 }
 0x70b   :  { %v3511_v1 = vpop.permute.xlu2 %3510 }
 0x70c   :  { %v3513_v4 = vunpack.i.h.bf16 %v3511_v1  ;;  %v3512_v6 = vunpack.i.l.bf16 %v3511_v1 }
 0x70e   :  { %v2120_v11 = vsel %vm108_vm6, %v3512_v6, %v3513_v4 }
 0x70f   :  { %v4562_v12 = vmax.f32 %v4539_v32, %v2120_v11  ;;  %v2283_v32 = vld [vmem:[#allocation4 + $0x4a8] sm:$0xff] }
 0x711   :  { %2339 = vmatmul.f32.vlgmr.msra.gmra.mxu2 %v4562_v12 }
 0x712   :  { %3383 = vmatpush.msk.msra.mxu2 %vm698_vm3, %v2293_v13 }
 0x713   :  { %v2116_v2 = vpop.permute.xlu2 %2115 }
 0x714   :  { %2484 = vmatpush.msra.mxu2 %v2291_v18 }
 0x716   :  { %2485 = vmatpush.msra.mxu2 %v2289_v19  ;;  %v2653_v19 = vld [vmem:[%s4918_s5 + $0x8] sm:$0xff] }
 0x718   :  { %2486 = vmatpush.msra.mxu2 %v2287_v20 }
 0x71a   :  { %2487 = vmatpush.msra.mxu2 %v2285_v22 }
 0x71c   :  { %2488 = vmatpush.msra.mxu2 %v2283_v32 }
 0x71d   :  { %v2108_v56 = vpop.permute.xlu0 %2107 }
 0x71e   :  { %v2119_v28 = vsel %vm108_vm6, %v2108_v56, %v3512_v6  ;;  %2489 = vmatpush.msra.mxu2 %v2281_v25 }
 0x71f   :  { %v2129_v29 = vmax.f32 %v4524_v14, %v2119_v28 }
 0x720   :  { %2490 = vmatpush.msra.mxu2 %v2279_v15 }
 0x721   :  { %2319 = vmatmul.f32.vlgmr.msra.gmra.mxu0 %v2129_v29  ;;  %2419 = vmatmul.f32.vlgmr.msrb.gmra.mxu2 %v2129_v29 }
 0x722   :  { %2463 = vmatpush.msra.mxu0 %v2261_v33  ;;  %2491 = vmatpush.msra.mxu2 %v2277_v34 }
 0x723   :  { %v2114_v16 = vpop.permute.xlu1 %2113 }
 0x724   :  { %v2121_v37 = vsel %vm108_vm6, %v3513_v4, %v2114_v16  ;;  %v2122_v21 = vsel %vm108_vm6, %v2114_v16, %v2116_v2  ;;  %2464 = vmatpush.msra.mxu0 %v2259_v35  ;;  %2492 = vmatpush.msra.mxu2 %v2275_v51 }
 0x725   :  { %v2131_v14 = vmax.f32 %v4533_v30, %v2121_v37  ;;  %v2132_v23 = vmax.f32 %v4545_v17, %v2122_v21 }
 0x726   :  { %2465 = vmatpush.msra.mxu0 %v2257_v48  ;;  %2493 = vmatpush.msra.mxu2 %v2273_v36 }
 0x727   :  { %2359 = vmatmul.f32.vlgmr.msra.gmra.mxu3 %v2131_v14  ;;  %2379 = vmatmul.f32.vlgmr.msrb.gmra.mxu1 %v2132_v23 }
 0x728   :  { %2466 = vmatpush.msra.mxu0 %v2255_v38  ;;  %2494 = vmatpush.msra.mxu2 %v2271_v39  ;;  %v1708_v30 = vpop.f32.mrf.mxu0  ;;  %v2118_v17 = vpop.permute.xlu0 %2117 }
 0x729   :  { %v1709_v42 = vadd.f32 %v1708_v30, %v1682_v40  ;;  %v2123_v52 = vsel %vm108_vm6, %v2116_v2, %v2118_v17  ;;  %vm5056_vm6 = vmmov %vm5051_vm5 }
 0x72a   :  { %v2133_v54 = vmax.f32 %v2092_v50, %v2123_v52  ;;  %2467 = vmatpush.msra.mxu0 %v2253_v47  ;;  %2495 = vmatpush.msra.mxu2 %v2269_v49 }
 0x72b   :  { %1712 = vst.msk [vmem:[#allocation7] sm:$0x1] %vm1711_vm15, %v1709_v42 }
 0x72c   :  { %2468 = vmatpush.msra.mxu0 %v2251_v46  ;;  %2496 = vmatpush.msra.mxu2 %v2267_v53 }
 0x72d   :  { %3382 = vmatmul.msk.f32.vlgmr.msrb.gmra.mxu0 %vm5051_vm5, %v2133_v54  ;;  %vm5075_vm5 = vcmask 736256  }
 0x72e   :  { %2469 = vmatpush.msra.mxu0 %v2249_v41  ;;  %2497 = vmatpush.msra.mxu2 %v2265_v43 }
 0x72f   :  { %2439 = vmatmul.f32.vlgmr.msrb.gmra.mxu3 %v4562_v12  ;;  %2459 = vmatmul.f32.vlgmr.msra.gmra.mxu1 %v2131_v14 }
 0x730   :  { %2470 = vmatpush.msra.mxu0 %v2247_v24  ;;  %2498 = vmatpush.msra.mxu2 %v2263_v31 }
 0x731   :  { %3384 = vmatmul.msk.f32.vlgmr.msra.gmra.mxu2 %vm5056_vm6, %v2133_v54  ;;  %vm5076_vm6 = vcmask 621568  }
 0x732   :  { %2471 = vmatpush.msra.mxu0 %v2245_v26 }
 0x734   :  { %2472 = vmatpush.msra.mxu0 %v2243_v27 }
 0x736   :  { %2473 = vmatpush.msra.mxu0 %v2241_v44 }
 0x738   :  { %2474 = vmatpush.msra.mxu0 %v2239_v45 }
 0x73a   :  { %2475 = vmatpush.msra.mxu0 %v2237_v55 }
 0x73c   :  { %2476 = vmatpush.msra.mxu0 %v2235_v57 }
 0x73e   :  { %2477 = vmatpush.msra.mxu0 %v2233_v58  ;;  %v2652_v58 = vld [vmem:[%s4918_s5] sm:$0xff] }
 0x740   :  { %2478 = vmatpush.msra.mxu0 %v2231_v9 }
 0x741   :  { %2479 = vmatmul.f32.vlgmr.msra.gmra.mxu0 %v2132_v23 }
 0x794   :  { %v2340_v63 = vpop.f32.mrf.mxu2 }
 0x79e   :  { %v2320_v62 = vpop.f32.mrf.mxu0 }
 0x79f   :  { %v2341_v5 = vadd.f32 %v2340_v63, %v2320_v62 }
 0x7a4   :  { %v2380_v1 = vpop.f32.mrf.mxu1  ;;  %v2420_v8 = vpop.f32.mrf.mxu2 }
 0x7aa   :  { %v2360_v59 = vpop.f32.mrf.mxu3  ;;  %v2400_v4 = vpop.f32.mrf.mxu0 }
 0x7ab   :  { %v2361_v0 = vadd.f32 %v2360_v59, %v2341_v5 }
 0x7ac   :  { %v2460_v11 = vpop.f32.mrf.mxu1 }
 0x7ad   :  { %v2381_v3 = vadd.f32 %v2380_v1, %v2361_v0 }
 0x7af   :  { %v2401_v6 = vadd.f32 %v2400_v4, %v2381_v3 }
 0x7b1   :  { %2503 = vst.msk [vmem:[#allocation3] sm:$0x3f] %vm905_vm10, %v2401_v6  ;;  %2580 = vrot.lane.b32.xlu2 %v2401_v6, %s3594_s26  ;;  %2601 = vrot.lane.b32.xlu0 %v2401_v6, %s3595_s30 }
 0x7b2   :  { %2594 = vrot.lane.b32.xlu1 %v2401_v6, %s3596_s3  ;;  %v2440_v7 = vpop.f32.mrf.mxu3 }
 0x7b3   :  { %v2441_v10 = vadd.f32 %v2440_v7, %v2420_v8 }
 0x7b4   :  { %v2500_v61 = vpop.f32.mrf.mxu2 }
 0x7b5   :  { %v2461_v13 = vadd.f32 %v2460_v11, %v2441_v10 }
 0x7b9   :  { %2566 = vrot.lane.b32.xlu2 %v2401_v6, %s3597_s23  ;;  %2573 = vrot.lane.b32.xlu0 %v2401_v6, %s5057_s2 }
 0x7ba   :  { %2587 = vrot.lane.b32.xlu1 %v2401_v6, %s5058_s15 }
 0x7be   :  { %v2480_v12 = vpop.f32.mrf.mxu0 }
 0x7bf   :  { %v2481_v60 = vadd.f32 %v2480_v12, %v2461_v13  ;;  %v2629_v13 = vld [vmem:[%s4917_s4] sm:$0xff] }
 0x7c1   :  { %2561 = vrot.lane.b32.xlu2 %v2401_v6, %s5059_s22  ;;  %2553 = vrot.lane.b32.xlu0 %v2401_v6, %s5060_s0  ;;  %v2501_v18 = vadd.f32 %v2500_v61, %v2481_v60 }
 0x7c2   :  { %2557 = vrot.lane.b32.xlu1 %v2401_v6, %s4995_s29  ;;  %s5065_s29 = smov 115  }
 0x7c9   :  { %2541 = vrot.lane.b32.xlu2 %v2401_v6, %s5061_s14  ;;  %2545 = vrot.lane.b32.xlu0 %v2401_v6, %s5062_s20 }
 0x7ca   :  { %2549 = vrot.lane.b32.xlu1 %v2401_v6, %s5063_s25 }
 0x7d1   :  { %2596 = vrot.lane.b32.xlu2 %v2501_v18, %s3596_s3  ;;  %2582 = vrot.lane.b32.xlu0 %v2501_v18, %s3594_s26  ;;  %s5067_s3 = smov 114   ;;  %s5068_s26 = smov 76  }
 0x7d2   :  { %2537 = vrot.lane.b32.xlu1 %v2401_v6, %s5064_s18 }
 0x7d9   :  { %2589 = vrot.lane.b32.xlu2 %v2501_v18, %s5058_s15  ;;  %2525 = vrot.lane.b32.xlu0 %v2401_v6, %s5065_s29 }
 0x7da   :  { %2603 = vrot.lane.b32.xlu1 %v2501_v18, %s3595_s30  ;;  %s5069_s30 = smov 78  }
 0x7e1   :  { %2533 = vrot.lane.b32.xlu2 %v2401_v6, %s5066_s1  ;;  %2568 = vrot.lane.b32.xlu0 %v2501_v18, %s3597_s23  ;;  %s5070_s23 = smov 77  }
 0x7e2   :  { %2575 = vrot.lane.b32.xlu1 %v2501_v18, %s5057_s2  ;;  %s3613_s2 = smov [#allocation7]  }
 0x7e3   :  { %s3285_s15 = sshll.u32 %s3613_s2, 4  ;;  %s3286_s15 = int_to_ptr.vmem [resolvable:$true] %s3285_s15 }
 0x7e9   :  { %2521 = vrot.lane.b32.xlu2 %v2401_v6, %s3608_s17  ;;  %2517 = vrot.lane.b32.xlu0 %v2401_v6, %s3589_s27 }
 0x7ea   :  { %2529 = vrot.lane.b32.xlu1 %v2401_v6, %s5067_s3 }
 0x7f1   :  { %2513 = vrot.lane.b32.xlu2 %v2401_v6, %s3587_s24  ;;  %2505 = vrot.lane.b32.xlu0 %v2401_v6, %s3586_s16 }
 0x7f2   :  { %2509 = vrot.lane.b32.xlu1 %v2401_v6, %s3588_s21 }
 0x7f9   :  { %2624 = vrot.lane.b32.xlu2 %v2501_v18, %s5068_s26  ;;  %2608 = vrot.lane.b32.xlu0 %v2401_v6, %s5069_s30 }
 0x7fa   :  { %2622 = vrot.lane.b32.xlu1 %v2401_v6, %s5068_s26 }
 0x801   :  { %2615 = vrot.lane.b32.xlu2 %v2401_v6, %s5070_s23  ;;  %2617 = vrot.lane.b32.xlu0 %v2501_v18, %s5070_s23 }
 0x802   :  { %2610 = vrot.lane.b32.xlu1 %v2501_v18, %s5069_s30  ;;  %v2631_v18 = vld [vmem:[%s4917_s4 + $0x10] sm:$0xff] }
 0x809   :  { %2661 = vperm.xlu2 %3503, %v2653_v19   ;;  %v2630_v19 = vld [vmem:[%s4917_s4 + $0x8] sm:$0xff] }
 0x80a   :  { %2656 = vperm.xlu1 %3514, %v2652_v58   ;;  %v3411_v58 = vld [vmem:[%s4920_s7 + $0x78] sm:$0xff] }
 0x80b   :  { %v2581_v20 = vpop.permute.xlu2 %2580 }
 0x813   :  { %v2567_v22 = vpop.permute.xlu2 %2566 }
 0x81b   :  { %v2562_v32 = vpop.permute.xlu2 %2561 }
 0x81c   :  { %2564 = vst.msk [vmem:[#allocation3 + $0x5a] sm:$0x3f] %vm905_vm10, %v2562_v32 }
 0x823   :  { %v2542_v25 = vpop.permute.xlu2 %2541  ;;  %v2602_v56 = vpop.permute.xlu0 %2601 }
 0x824   :  { %2544 = vst.msk [vmem:[#allocation3 + $0x3c] sm:$0x3f] %vm905_vm10, %v2542_v25  ;;  %v2595_v15 = vpop.permute.xlu1 %2594 }
 0x82b   :  { %v2597_v28 = vpop.permute.xlu2 %2596  ;;  %v2574_v29 = vpop.permute.xlu0 %2573 }
 0x82c   :  { %v2598_v33 = vsel %vm5071_vm7, %v2595_v15, %v2597_v28  ;;  %v2588_v34 = vpop.permute.xlu1 %2587  ;;  %vm5077_vm7 = vcmask 1045504  }
 0x82d   :  { %2600 = vst.msk [vmem:[#allocation3 + $0x78] sm:$0x3f] %vm905_vm10, %v2598_v33 }
 0x833   :  { %v2590_v35 = vpop.permute.xlu2 %2589  ;;  %v2554_v51 = vpop.permute.xlu0 %2553 }
 0x834   :  { %v2591_v2 = vsel %vm5072_vm11, %v2588_v34, %v2590_v35  ;;  %2556 = vst.msk [vmem:[#allocation3 + $0x4e] sm:$0x3f] %vm905_vm10, %v2554_v51  ;;  %v2558_v16 = vpop.permute.xlu1 %2557 }
 0x835   :  { %2593 = vst.msk [vmem:[#allocation3 + $0x72] sm:$0x3f] %vm905_vm10, %v2591_v2 }
 0x836   :  { %2560 = vst.msk [vmem:[#allocation3 + $0x54] sm:$0x3f] %vm905_vm10, %v2558_v16 }
 0x83b   :  { %v2534_v48 = vpop.permute.xlu2 %2533  ;;  %v2546_v36 = vpop.permute.xlu0 %2545 }
 0x83c   :  { %2536 = vst.msk [vmem:[#allocation3 + $0x30] sm:$0x3f] %vm905_vm10, %v2534_v48  ;;  %v2550_v37 = vpop.permute.xlu1 %2549  ;;  %v2750_v48 = vld [vmem:[%s4919_s6 + $0x48] sm:$0x7f] }
 0x83d   :  { %2548 = vst.msk [vmem:[#allocation3 + $0x42] sm:$0x3f] %vm905_vm10, %v2546_v36  ;;  %v2644_v24 = vld [vmem:[#allocation3 + $0x58] sm:$0xff]  ;;  %v2643_v26 = vld [vmem:[#allocation3 + $0x50] sm:$0xff]  ;;  %v2749_v36 = vld [vmem:[%s4919_s6 + $0x40] sm:$0xff] }
 0x83e   :  { %2552 = vst.msk [vmem:[#allocation3 + $0x48] sm:$0x3f] %vm905_vm10, %v2550_v37  ;;  %v2748_v37 = vld [vmem:[%s4919_s6 + $0x38] sm:$0xff] }
 0x843   :  { %v2522_v21 = vpop.permute.xlu2 %2521  ;;  %v2583_v14 = vpop.permute.xlu0 %2582 }
 0x844   :  { %2524 = vst.msk [vmem:[#allocation3 + $0x1e] sm:$0x3f] %vm905_vm10, %v2522_v21  ;;  %v2584_v23 = vsel %vm5073_vm12, %v2581_v20, %v2583_v14  ;;  %v2538_v38 = vpop.permute.xlu1 %2537  ;;  %v2641_v45 = vld [vmem:[#allocation3 + $0x40] sm:$0xff]  ;;  %v2747_v21 = vld [vmem:[%s4919_s6 + $0x30] sm:$0xff]  ;;  %v2746_v14 = vld [vmem:[%s4919_s6 + $0x28] sm:$0xff] }
 0x845   :  { %2586 = vst.msk [vmem:[#allocation3 + $0x6c] sm:$0x3f] %vm905_vm10, %v2584_v23  ;;  %v2642_v44 = vld [vmem:[#allocation3 + $0x48] sm:$0xff]  ;;  %v2745_v23 = vld [vmem:[%s4919_s6 + $0x20] sm:$0xff] }
 0x846   :  { %2540 = vst.msk [vmem:[#allocation3 + $0x36] sm:$0x3f] %vm905_vm10, %v2538_v38  ;;  %v2744_v38 = vld [vmem:[%s4919_s6 + $0x18] sm:$0xff] }
 0x84b   :  { %v2514_v39 = vpop.permute.xlu2 %2513  ;;  %v2526_v40 = vpop.permute.xlu0 %2525 }
 0x84c   :  { %2516 = vst.msk [vmem:[#allocation3 + $0x12] sm:$0x3f] %vm905_vm10, %v2514_v39  ;;  %v2604_v47 = vpop.permute.xlu1 %2603  ;;  %v2647_v46 = vld [vmem:[#allocation3 + $0x70] sm:$0xff] }
 0x84d   :  { %2528 = vst.msk [vmem:[#allocation3 + $0x24] sm:$0x3f] %vm905_vm10, %v2526_v40  ;;  %v2605_v49 = vsel %vm1013_vm9, %v2602_v56, %v2604_v47  ;;  %v2640_v57 = vld [vmem:[#allocation3 + $0x38] sm:$0xff]  ;;  %v2639_v62 = vld [vmem:[#allocation3 + $0x30] sm:$0xff]  ;;  %v2742_v40 = vld [vmem:[%s4919_s6 + $0x8] sm:$0xff] }
 0x84e   :  { %2607 = vst.msk [vmem:[#allocation3 + $0x7e] sm:$0x3f] %vm905_vm10, %v2605_v49  ;;  %v2743_v39 = vld [vmem:[%s4919_s6 + $0x10] sm:$0xff] }
 0x853   :  { %v2569_v50 = vpop.permute.xlu0 %2568  ;;  %v2625_v55 = vpop.permute.xlu2 %2624 }
 0x854   :  { %v2570_v30 = vsel %vm5074_vm14, %v2567_v22, %v2569_v50  ;;  %v2576_v17 = vpop.permute.xlu1 %2575  ;;  %v2637_v0 = vld [vmem:[#allocation3 + $0x20] sm:$0xff]  ;;  %v2632_v22 = vld [vmem:[%s4917_s4 + $0x18] sm:$0xff] }
 0x855   :  { %2572 = vst.msk [vmem:[#allocation3 + $0x60] sm:$0x3f] %vm905_vm10, %v2570_v30  ;;  %v2577_v42 = vsel %vm5075_vm5, %v2574_v29, %v2576_v17  ;;  %v2648_v52 = vld [vmem:[#allocation3 + $0x78] sm:$0xff]  ;;  %v2741_v17 = vld [vmem:[%s4919_s6] sm:$0xff] }
 0x856   :  { %2579 = vst.msk [vmem:[#allocation3 + $0x66] sm:$0x3f] %vm905_vm10, %v2577_v42  ;;  %2673 = vmatpush.msra.mxu3 %v2648_v52 }
 0x858   :  { %2674 = vmatpush.msra.mxu3 %v2647_v46  ;;  %v2785_v46 = vld [vmem:[%s4920_s7 + $0x8] sm:$0xff] }
 0x859   :  { %2803 = vmatpush.msrb.mxu0 %v2785_v46  ;;  %v3206_v46 = vld [vmem:[%s4922_s9 + $0x28] sm:$0xff] }
 0x85b   :  { %v2518_v53 = vpop.permute.xlu0 %2517  ;;  %v2616_v3 = vpop.permute.xlu2 %2615 }
 0x85c   :  { %2520 = vst.msk [vmem:[#allocation3 + $0x18] sm:$0x3f] %vm905_vm10, %v2518_v53  ;;  %v2530_v54 = vpop.permute.xlu1 %2529 }
 0x85d   :  { %2532 = vst.msk [vmem:[#allocation3 + $0x2a] sm:$0x3f] %vm905_vm10, %v2530_v54  ;;  %v2646_v41 = vld [vmem:[#allocation3 + $0x68] sm:$0xff]  ;;  %v2645_v43 = vld [vmem:[#allocation3 + $0x60] sm:$0xff] }
 0x85e   :  { %2675 = vmatpush.msra.mxu3 %v2646_v41  ;;  %v2784_v41 = vld [vmem:[%s4920_s7] sm:$0xff] }
 0x85f   :  { %2804 = vmatpush.msrb.mxu0 %v2784_v41 }
 0x860   :  { %2676 = vmatpush.msra.mxu3 %v2645_v43  ;;  %v3393_v43 = vld [vmem:[%s4920_s7 + $0x18] sm:$0xff] }
 0x861   :  { %2829 = vmatpush.msrb.mxu2 %v3393_v43  ;;  %v3204_v43 = vld [vmem:[%s4922_s9 + $0x18] sm:$0xff] }
 0x862   :  { %2677 = vmatpush.msra.mxu3 %v2644_v24  ;;  %v3399_v24 = vld [vmem:[%s4920_s7 + $0x38] sm:$0xff] }
 0x863   :  { %v2506_v31 = vpop.permute.xlu0 %2505  ;;  %v2636_v1 = vld [vmem:[#allocation3 + $0x18] sm:$0xff]  ;;  %v2662_v33 = vpop.permute.xlu2 %2661 }
 0x864   :  { %2508 = vst.msk [vmem:[#allocation3 + $0x6] sm:$0x3f] %vm905_vm10, %v2506_v31  ;;  %2678 = vmatpush.msra.mxu3 %v2643_v26  ;;  %v2510_v27 = vpop.permute.xlu1 %2509  ;;  %v2638_v59 = vld [vmem:[#allocation3 + $0x28] sm:$0xff]  ;;  %v3405_v31 = vld [vmem:[%s4920_s7 + $0x58] sm:$0xff]  ;;  %v3392_v26 = vld [vmem:[%s4920_s7 + $0x10] sm:$0xff] }
 0x865   :  { %2512 = vst.msk [vmem:[#allocation3 + $0xc] sm:$0x3f] %vm905_vm10, %v2510_v27  ;;  %v3398_v27 = vld [vmem:[%s4920_s7 + $0x30] sm:$0xff]  ;;  %2830 = vmatpush.msrb.mxu2 %v3392_v26 }
 0x866   :  { %2679 = vmatpush.msra.mxu3 %v2642_v44  ;;  %v3404_v44 = vld [vmem:[%s4920_s7 + $0x50] sm:$0xff] }
 0x868   :  { %2680 = vmatpush.msra.mxu3 %v2641_v45  ;;  %v3396_v45 = vld [vmem:[%s4920_s7 + $0x28] sm:$0xff] }
 0x869   :  { %2855 = vmatpush.msra.mxu0 %v3396_v45  ;;  %v3201_v45 = vld [vmem:[%s4922_s9] sm:$0xff] }
 0x86a   :  { %2681 = vmatpush.msra.mxu3 %v2640_v57  ;;  %v3402_v57 = vld [vmem:[%s4920_s7 + $0x48] sm:$0xff] }
 0x86b   :  { %v2609_v9 = vpop.permute.xlu0 %2608  ;;  %v2633_v60 = vld [vmem:[#allocation3] sm:$0xff]  ;;  %2907 = vmatpush.msra.mxu2 %v3402_v57  ;;  %v3251_v57 = vld [vmem:[%s4924_s11 + $0x50] sm:$0xf] }
 0x86c   :  { %2682 = vmatpush.msra.mxu3 %v2639_v62  ;;  %v2623_v63 = vpop.permute.xlu1 %2622  ;;  %v2635_v6 = vld [vmem:[#allocation3 + $0x10] sm:$0xff]  ;;  %v2634_v11 = vld [vmem:[#allocation3 + $0x8] sm:$0xff] }
 0x86d   :  { %v2626_v5 = vsel %vm5076_vm6, %v2623_v63, %v2625_v55  ;;  %v3395_v55 = vld [vmem:[%s4920_s7 + $0x20] sm:$0xff]  ;;  %v3410_v62 = vld [vmem:[%s4920_s7 + $0x70] sm:$0xff]  ;;  %v3417_v63 = vld [vmem:[%s4920_s7 + $0x98] sm:$0xff] }
 0x86e   :  { %2628 = vst.msk [vmem:[#allocation3 + $0x90] sm:$0x3f] %vm905_vm10, %v2626_v5  ;;  %2683 = vmatpush.msra.mxu3 %v2638_v59  ;;  %2856 = vmatpush.msra.mxu0 %v3395_v55  ;;  %v3408_v5 = vld [vmem:[%s4920_s7 + $0x68] sm:$0xff] }
 0x870   :  { %2684 = vmatpush.msra.mxu3 %v2637_v0 }
 0x872   :  { %2685 = vmatpush.msra.mxu3 %v2636_v1 }
 0x873   :  { %v2618_v4 = vpop.permute.xlu0 %2617 }
 0x874   :  { %v2619_v7 = vsel %vm1029_vm2, %v2616_v3, %v2618_v4  ;;  %2686 = vmatpush.msra.mxu3 %v2635_v6  ;;  %v2611_v8 = vpop.permute.xlu1 %2610  ;;  %vm5078_vm2 = vcmask 130048   ;;  %v3407_v4 = vld [vmem:[%s4920_s7 + $0x60] sm:$0xff]  ;;  %v3416_v6 = vld [vmem:[%s4920_s7 + $0x90] sm:$0xff] }
 0x875   :  { %2621 = vst.msk [vmem:[#allocation3 + $0x8a] sm:$0x3f] %vm905_vm10, %v2619_v7  ;;  %v2612_v10 = vsel %vm1021_vm8, %v2609_v9, %v2611_v8  ;;  %v2651_v12 = vld [vmem:[#allocation3 + $0x90] sm:$0x3f]  ;;  %v3401_v9 = vld [vmem:[%s4920_s7 + $0x40] sm:$0xff]  ;;  %v3414_v7 = vld [vmem:[%s4920_s7 + $0x88] sm:$0xff] }
 0x876   :  { %2614 = vst.msk [vmem:[#allocation3 + $0x84] sm:$0x3f] %vm905_vm10, %v2612_v10  ;;  %2687 = vmatpush.msra.mxu3 %v2634_v11  ;;  %3385 = vmatpush.msk.msrb.mxu1 %vm5077_vm7, %v2651_v12  ;;  %v3423_v8 = vld [vmem:[%s4920_s7 + $0xb8] sm:$0xff]  ;;  %vm5080_vm8 = vmmov %vm5078_vm2  ;;  %v3413_v10 = vld [vmem:[%s4920_s7 + $0x80] sm:$0xff] }
 0x877   :  { %2908 = vmatpush.msra.mxu2 %v3401_v9  ;;  %v3422_v11 = vld [vmem:[%s4920_s7 + $0xb0] sm:$0xff]  ;;  %v3429_v12 = vld [vmem:[%s4920_s7 + $0xd8] sm:$0xff]  ;;  %vm5082_vm10 = vmmov %vm5078_vm2 }
 0x878   :  { %2688 = vmatpush.msra.mxu3 %v2633_v60  ;;  %v3420_v60 = vld [vmem:[%s4920_s7 + $0xa8] sm:$0xff]  ;;  %vm5084_vm11 = vmmov %vm5078_vm2  ;;  %v3249_v9 = vld [vmem:[%s4924_s11 + $0x40] sm:$0xff] }
 0x879   :  { %2689 = vmatmul.f32.vlgmr.msra.gmra.mxu3 %v2629_v13  ;;  %vm5085_vm12 = vmmov %vm5078_vm2 }
 0x87a   :  { %2933 = vmatpush.msrb.mxu3 %v3405_v31  ;;  %vm5086_vm14 = vmmov %vm5078_vm2 }
 0x87b   :  { %vm5087_vm5 = vmmov %vm5078_vm2 }
 0x87c   :  { %v2657_v32 = vpop.permute.xlu1 %2656  ;;  %2934 = vmatpush.msrb.mxu3 %v3404_v44  ;;  %vm5088_vm6 = vmmov %vm5078_vm2  ;;  %v3202_v44 = vld [vmem:[%s4922_s9 + $0x8] sm:$0xff] }
 0x87d   :  { %v2650_v61 = vld [vmem:[#allocation3 + $0x88] sm:$0xff]  ;;  %v2649_v20 = vld [vmem:[#allocation3 + $0x80] sm:$0xff]  ;;  %vm5089_vm7 = vmmov %vm5078_vm2 }
 0x87e   :  { %2710 = vmatpush.msrb.mxu1 %v2650_v61  ;;  %3037 = vmatpush.msra.mxu3 %v3417_v63 }
 0x880   :  { %2711 = vmatpush.msrb.mxu1 %v2649_v20  ;;  %3038 = vmatpush.msra.mxu3 %v3416_v6  ;;  %v3426_v20 = vld [vmem:[%s4920_s7 + $0xc8] sm:$0xff]  ;;  %v3245_v6 = vld [vmem:[%s4924_s11 + $0x20] sm:$0xff] }
 0x881   :  { %2692 = vmatmul.f32.gmra.mxu3 %v2631_v18  ;;  %3386 = vmatmul.msk.f32.vlgmr.msrb.gmra.mxu1 %vm1076_vm13, %v2630_v19  ;;  %v3419_v19 = vld [vmem:[%s4920_s7 + $0xa0] sm:$0xff] }
 0x882   :  { %3388 = vmatpush.msk.msra.mxu1 %vm698_vm3, %v2750_v48  ;;  %vm5079_vm3 = vmmov %vm5078_vm2 }
 0x884   :  { %2767 = vmatpush.msra.mxu1 %v2749_v36 }
 0x886   :  { %2768 = vmatpush.msra.mxu1 %v2748_v37  ;;  %v3215_v37 = vld [vmem:[%s4922_s9 + $0x70] sm:$0xff] }
 0x888   :  { %2769 = vmatpush.msra.mxu1 %v2747_v21  ;;  %v3214_v21 = vld [vmem:[%s4922_s9 + $0x68] sm:$0xff] }
 0x889   :  { %3387 = vmatmul.msk.f32.gmra.mxu1 %vm1076_vm13, %v2632_v22  ;;  %v3428_v22 = vld [vmem:[%s4920_s7 + $0xd0] sm:$0xff]  ;;  %vm5083_vm13 = vmmov %vm5078_vm2 }
 0x88a   :  { %2770 = vmatpush.msra.mxu1 %v2746_v14  ;;  %v3213_v14 = vld [vmem:[%s4922_s9 + $0x60] sm:$0xff] }
 0x88c   :  { %2771 = vmatpush.msra.mxu1 %v2745_v23  ;;  %v3212_v23 = vld [vmem:[%s4922_s9 + $0x58] sm:$0xff] }
 0x88e   :  { %2772 = vmatpush.msra.mxu1 %v2744_v38  ;;  %v3211_v38 = vld [vmem:[%s4922_s9 + $0x50] sm:$0xff] }
 0x890   :  { %2773 = vmatpush.msra.mxu1 %v2743_v39  ;;  %v3210_v39 = vld [vmem:[%s4922_s9 + $0x48] sm:$0xff] }
 0x892   :  { %2774 = vmatpush.msra.mxu1 %v2742_v40 }
 0x894   :  { %2775 = vmatpush.msra.mxu1 %v2741_v17 }
 0x896   :  { %2881 = vmatpush.msrb.mxu1 %v3399_v24  ;;  %v3203_v24 = vld [vmem:[%s4922_s9 + $0x10] sm:$0xff] }
 0x898   :  { %2882 = vmatpush.msrb.mxu1 %v3398_v27 }
 0x8fc   :  { %v2690_v25 = vpop.f32.mrf.mxu3 }
 0x8fd   :  { %v2691_v56 = vadd.f32 %v2690_v25, %v2657_v32  ;;  %v3435_v32 = vld [vmem:[%s4920_s7 + $0xf8] sm:$0xff]  ;;  %v3425_v25 = vld [vmem:[%s4920_s7 + $0xc0] sm:$0xff] }
 0x8fe   :  { %v2713_v15 = vpop.f32.mrf.mxu1 }
 0x8ff   :  { %v2714_v28 = vadd.f32 %v2713_v15, %v2691_v56  ;;  %v3434_v56 = vld [vmem:[%s4920_s7 + $0xf0] sm:$0xff] }
 0x901   :  { %v2719_v29 = vmax.f32 %v2714_v28, 0.0  ;;  %v3432_v28 = vld [vmem:[%s4920_s7 + $0xe8] sm:$0xff] }
 0x903   :  { %2723 = vrot.lane.b32.xlu0 %v2719_v29, %s3586_s16 }
 0x904   :  { %v2693_v34 = vpop.f32.mrf.mxu3 }
 0x905   :  { %v2694_v35 = vadd.f32 %v2693_v34, %v2662_v33 }
 0x906   :  { %v2716_v51 = vpop.f32.mrf.mxu1 }
 0x907   :  { %v2717_v2 = vadd.f32 %v2716_v51, %v2694_v35 }
 0x909   :  { %v2720_v16 = vmax.f32 %v2717_v2, 0.0 }
 0x90b   :  { %2725 = vrot.lane.b32.xlu1 %v2720_v16, %s3586_s16 }
 0x975   :  { %v2724_v47 = vpop.permute.xlu0 %2723 }
 0x976   :  { %v2729_v49 = vmax.f32 %v2719_v29, %v2724_v47  ;;  %v3431_v29 = vld [vmem:[%s4920_s7 + $0xe0] sm:$0xff] }
 0x977   :  { %v3209_v47 = vld [vmem:[%s4922_s9 + $0x40] sm:$0xff] }
 0x978   :  { %2733 = vrot.lane.b32.xlu2 %v2729_v49, %s3608_s17 }
 0x97d   :  { %v2726_v50 = vpop.permute.xlu1 %2725 }
 0x97e   :  { %v2730_v30 = vmax.f32 %v2720_v16, %v2726_v50  ;;  %v3208_v50 = vld [vmem:[%s4922_s9 + $0x38] sm:$0xff] }
 0x980   :  { %2735 = vrot.lane.b32.xlu0 %v2730_v30, %s3608_s17 }
 0x9d2   :  { %v2734_v42 = vpop.permute.xlu2 %2733 }
 0x9d3   :  { %v2739_v52 = vmax.f32 %v2729_v49, %v2734_v42  ;;  %v2783_v49 = vld [vmem:[%s4921_s8] sm:$0x1] }
 0x9d5   :  { %3389 = vmatmul.msk.f32.vlgmr.msra.gmra.mxu1 %vm1013_vm9, %v2739_v52 }
 0x9d6   :  { %2985 = vmatpush.msra.mxu1 %v3411_v58  ;;  %v3250_v58 = vld [vmem:[%s4924_s11 + $0x48] sm:$0xff] }
 0x9d8   :  { %2986 = vmatpush.msra.mxu1 %v3410_v62 }
 0x9f2   :  { %v2736_v53 = vpop.permute.xlu0 %2735 }
 0x9f3   :  { %v2740_v54 = vmax.f32 %v2730_v30, %v2736_v53  ;;  %v3207_v30 = vld [vmem:[%s4922_s9 + $0x30] sm:$0xff]  ;;  %v3205_v53 = vld [vmem:[%s4922_s9 + $0x20] sm:$0xff] }
 0x9f5   :  { %3390 = vmatmul.msk.f32.gmra.mxu1 %vm1013_vm9, %v2740_v54  ;;  %vm5081_vm9 = vmmov %vm5078_vm2 }
 0xa52   :  { %v2777_v59 = vpop.f32.mrf.mxu1 }
 0xa53   :  { %3391 = vmatmul.msk.f32.vlgmr.msrb.gmra.mxu0 %vm5078_vm2, %v2777_v59  ;;  %v2812_v0 = vrot.slane %v2777_v59, 1  ;;  %v2864_v1 = vrot.slane %v2777_v59, 3  ;;  %v2916_v3 = vrot.slane %v2777_v59, 5  ;;  %v2838_v13 = vrot.slane %v2777_v59, 2 }
 0xa54   :  { %2959 = vmatpush.msrb.mxu0 %v3408_v5  ;;  %v2890_v61 = vrot.slane %v2777_v59, 4  ;;  %v2968_v18 = vrot.slane %v2777_v59, 7  ;;  %v2942_v15 = vrot.slane %v2777_v59, 6  ;;  %v3248_v5 = vld [vmem:[%s4924_s11 + $0x38] sm:$0xff]  ;;  %v3247_v59 = vld [vmem:[%s4924_s11 + $0x30] sm:$0xff] }
 0xa55   :  { %3394 = vmatmul.msk.f32.vlgmr.msrb.gmra.mxu2 %vm5079_vm3, %v2812_v0  ;;  %3400 = vmatmul.msk.f32.vlgmr.msrb.gmra.mxu1 %vm5080_vm8, %v2864_v1  ;;  %vm5090_vm3 = vmmov %vm5078_vm2 }
 0xa56   :  { %3406 = vmatmul.msk.f32.vlgmr.msrb.gmra.mxu3 %vm5081_vm9, %v2916_v3  ;;  %2960 = vmatpush.msrb.mxu0 %v3407_v4  ;;  %vm5091_vm8 = vmmov %vm5078_vm2  ;;  %v3246_v3 = vld [vmem:[%s4924_s11 + $0x28] sm:$0xff] }
 0xa57   :  { %3011 = vmatpush.msrb.mxu2 %v3414_v7  ;;  %3089 = vmatpush.msrb.mxu1 %v3423_v8  ;;  %vm5092_vm9 = vmmov %vm5078_vm2  ;;  %v3244_v8 = vld [vmem:[%s4924_s11 + $0x18] sm:$0xff] }
 0xa58   :  { %3141 = vmatpush.msrb.mxu3 %v3429_v12 }
 0xa59   :  { %3012 = vmatpush.msrb.mxu2 %v3413_v10  ;;  %3090 = vmatpush.msrb.mxu1 %v3422_v11 }
 0xa5a   :  { %3142 = vmatpush.msrb.mxu3 %v3428_v22 }
 0xa5b   :  { %3397 = vmatmul.msk.f32.vlgmr.msra.gmra.mxu0 %vm5082_vm10, %v2838_v13 }
 0xa5c   :  { %3063 = vmatpush.msra.mxu0 %v3420_v60 }
 0xa5d   :  { %3403 = vmatmul.msk.f32.vlgmr.msra.gmra.mxu2 %vm5083_vm13, %v2890_v61  ;;  %3412 = vmatmul.msk.f32.vlgmr.msra.gmra.mxu1 %vm5084_vm11, %v2968_v18 }
 0xa5e   :  { %3064 = vmatpush.msra.mxu0 %v3419_v19  ;;  %3115 = vmatpush.msra.mxu2 %v3426_v20 }
 0xa5f   :  { %3193 = vmatpush.msra.mxu1 %v3435_v32 }
 0xa60   :  { %3116 = vmatpush.msra.mxu2 %v3425_v25 }
 0xa61   :  { %3194 = vmatpush.msra.mxu1 %v3434_v56 }
 0xa63   :  { %3409 = vmatmul.msk.f32.vlgmr.msrb.gmra.mxu0 %vm5085_vm12, %v2942_v15 }
 0xa64   :  { %3167 = vmatpush.msrb.mxu0 %v3432_v28 }
 0xa66   :  { %3168 = vmatpush.msrb.mxu0 %v3431_v29 }
 0xa72   :  { %v2780_v33 = vpop.f32.mrf.mxu1 }
 0xa73   :  { %3415 = vmatmul.msk.f32.vlgmr.msrb.gmra.mxu2 %vm5086_vm14, %v2780_v33  ;;  %v3020_v34 = vrot.slane %v2780_v33, 1  ;;  %v3046_v35 = vrot.slane %v2780_v33, 2  ;;  %v3072_v51 = vrot.slane %v2780_v33, 3  ;;  %v3098_v2 = vrot.slane %v2780_v33, 4 }
 0xa74   :  { %v3124_v16 = vrot.slane %v2780_v33, 5  ;;  %v3150_v48 = vrot.slane %v2780_v33, 6  ;;  %v3176_v36 = vrot.slane %v2780_v33, 7  ;;  %3221 = vmatpush.msrb.mxu2 %v3215_v37  ;;  %v3252_v37 = vld [vmem:[%s4925_s12] sm:$0x1] }
 0xa75   :  { %3418 = vmatmul.msk.f32.vlgmr.msra.gmra.mxu3 %vm5087_vm5, %v3020_v34  ;;  %3421 = vmatmul.msk.f32.vlgmr.msra.gmra.mxu0 %vm5088_vm6, %v3046_v35  ;;  %v3243_v34 = vld [vmem:[%s4924_s11 + $0x10] sm:$0xff]  ;;  %v3242_v35 = vld [vmem:[%s4924_s11 + $0x8] sm:$0xff] }
 0xa76   :  { %3424 = vmatmul.msk.f32.vlgmr.msrb.gmra.mxu1 %vm5089_vm7, %v3072_v51  ;;  %3222 = vmatpush.msrb.mxu2 %v3214_v21  ;;  %v3241_v51 = vld [vmem:[%s4924_s11] sm:$0xff]  ;;  %s3287_s11 = sshll.u32 %s4926_s13, 4  ;;  %s3288_s11 = int_to_ptr.hbm [resolvable:$true] %s3287_s11 }
 0xa77   :  { %3438 = vmatpush.msk.msra.mxu3 %vm1687_vm1, %v3251_v57 }
 0xa78   :  { %3223 = vmatpush.msrb.mxu2 %v3213_v14 }
 0xa79   :  { %3265 = vmatpush.msra.mxu3 %v3250_v58 }
 0xa7a   :  { %3224 = vmatpush.msrb.mxu2 %v3212_v23 }
 0xa7b   :  { %3427 = vmatmul.msk.f32.vlgmr.msra.gmra.mxu2 %vm5078_vm2, %v3098_v2  ;;  %3266 = vmatpush.msra.mxu3 %v3249_v9  ;;  %v3216_v2 = vld [vmem:[%s4923_s10] sm:$0x1] }
 0xa7c   :  { %3225 = vmatpush.msrb.mxu2 %v3211_v38 }
 0xa7d   :  { %3430 = vmatmul.msk.f32.vlgmr.msrb.gmra.mxu3 %vm5090_vm3, %v3124_v16  ;;  %3433 = vmatmul.msk.f32.vlgmr.msrb.gmra.mxu0 %vm5091_vm8, %v3150_v48 }
 0xa7e   :  { %3436 = vmatmul.msk.f32.vlgmr.msra.gmra.mxu1 %vm5092_vm9, %v3176_v36  ;;  %3226 = vmatpush.msrb.mxu2 %v3210_v39 }
 0xa7f   :  { %3267 = vmatpush.msra.mxu3 %v3248_v5 }
 0xa80   :  { %3227 = vmatpush.msrb.mxu2 %v3209_v47 }
 0xa81   :  { %3268 = vmatpush.msra.mxu3 %v3247_v59 }
 0xa82   :  { %3228 = vmatpush.msrb.mxu2 %v3208_v50 }
 0xa83   :  { %3269 = vmatpush.msra.mxu3 %v3246_v3 }
 0xa84   :  { %3229 = vmatpush.msrb.mxu2 %v3207_v30 }
 0xa85   :  { %3270 = vmatpush.msra.mxu3 %v3245_v6 }
 0xa86   :  { %3230 = vmatpush.msrb.mxu2 %v3206_v46 }
 0xa87   :  { %3271 = vmatpush.msra.mxu3 %v3244_v8 }
 0xa88   :  { %3231 = vmatpush.msrb.mxu2 %v3205_v53 }
 0xa89   :  { %3272 = vmatpush.msra.mxu3 %v3243_v34 }
 0xa8a   :  { %3232 = vmatpush.msrb.mxu2 %v3204_v43 }
 0xa8b   :  { %3273 = vmatpush.msra.mxu3 %v3242_v35 }
 0xa8c   :  { %3233 = vmatpush.msrb.mxu2 %v3203_v24 }
 0xa8d   :  { %3274 = vmatpush.msra.mxu3 %v3241_v51 }
 0xa8e   :  { %3234 = vmatpush.msrb.mxu2 %v3202_v44 }
 0xa90   :  { %3235 = vmatpush.msrb.mxu2 %v3201_v45 }
 0xad0   :  { %v2806_v40 = vpop.f32.mrf.mxu0 }
 0xad1   :  { %v2809_v42 = vadd.f32 %v2806_v40, %v2783_v49 }
 0xad2   :  { %v2884_v31 = vpop.f32.mrf.mxu1 }
 0xad8   :  { %v2832_v17 = vpop.f32.mrf.mxu2  ;;  %v2858_v54 = vpop.f32.mrf.mxu0 }
 0xad9   :  { %v2835_v52 = vadd.f32 %v2832_v17, %v2809_v42  ;;  %v2936_v62 = vpop.f32.mrf.mxu3 }
 0xada   :  { %v2988_v4 = vpop.f32.mrf.mxu1 }
 0xadb   :  { %v2861_v41 = vadd.f32 %v2858_v54, %v2835_v52 }
 0xadd   :  { %v2887_v27 = vadd.f32 %v2884_v31, %v2861_v41 }
 0xae0   :  { %v2910_v26 = vpop.f32.mrf.mxu2  ;;  %v2962_v0 = vpop.f32.mrf.mxu0 }
 0xae1   :  { %v2913_v55 = vadd.f32 %v2910_v26, %v2887_v27 }
 0xae3   :  { %v2939_v63 = vadd.f32 %v2936_v62, %v2913_v55 }
 0xae5   :  { %v2965_v1 = vadd.f32 %v2962_v0, %v2939_v63 }
 0xae7   :  { %v2991_v7 = vadd.f32 %v2988_v4, %v2965_v1 }
 0xaf2   :  { %v3066_v12 = vpop.f32.mrf.mxu0 }
 0xaf3   :  { %v3092_v61 = vpop.f32.mrf.mxu1 }
 0xaf6   :  { %v3014_v10 = vpop.f32.mrf.mxu2 }
 0xaf7   :  { %v3017_v11 = vadd.f32 %v3014_v10, %v2991_v7 }
 0xaf8   :  { %v3040_v13 = vpop.f32.mrf.mxu3 }
 0xaf9   :  { %v3043_v60 = vadd.f32 %v3040_v13, %v3017_v11 }
 0xafa   :  { %v3170_v56 = vpop.f32.mrf.mxu0 }
 0xafb   :  { %v3069_v18 = vadd.f32 %v3066_v12, %v3043_v60  ;;  %v3196_v28 = vpop.f32.mrf.mxu1 }
 0xafd   :  { %v3095_v19 = vadd.f32 %v3092_v61, %v3069_v18 }
 0xafe   :  { %v3118_v20 = vpop.f32.mrf.mxu2 }
 0xaff   :  { %v3121_v22 = vadd.f32 %v3118_v20, %v3095_v19 }
 0xb00   :  { %v3144_v32 = vpop.f32.mrf.mxu3 }
 0xb01   :  { %v3147_v25 = vadd.f32 %v3144_v32, %v3121_v22 }
 0xb03   :  { %v3173_v15 = vadd.f32 %v3170_v56, %v3147_v25 }
 0xb05   :  { %v3199_v29 = vadd.f32 %v3196_v28, %v3173_v15 }
 0xb07   :  { %v3200_v33 = vmax.f32 %v3199_v29, 0.0 }
 0xb09   :  { %3437 = vmatmul.msk.f32.vlgmr.msrb.gmra.mxu2 %vm1646_vm0, %v3200_v33 }
 0xb8c   :  { %v3237_v16 = vpop.f32.mrf.mxu2 }
 0xb8d   :  { %v3238_v48 = vadd.f32 %v3237_v16, %v3216_v2 }
 0xb8f   :  { %v3240_v36 = vmax.f32 %v3238_v48, 0.0 }
 0xb91   :  { %3439 = vmatmul.msk.f32.vlgmr.msra.gmra.mxu3 %vm1683_vm4, %v3240_v36 }
 0xc14   :  { %v3276_v21 = vpop.f32.mrf.mxu3 }
 0xc15   :  { %v3277_v14 = vadd.f32 %v3276_v21, %v3252_v37 }
 0xc17   :  { %3279 = vst.msk [vmem:[#allocation7 + $0x1] sm:$0x1] %vm1711_vm15, %v3277_v14 }
 0xc18   :  { %3290 = dma.vmem_to_hbm [thread:$0]  %s3286_s15, 32, %s3288_s11, [#allocation6]  }
 0xc19   :  { %3565 = dma.done.wait [#allocation6], 32  }
 0xc1a   :  { %3566 = vsyncadd [#allocation6], 4294967264 }
 0xc1b   :  { %3295 = vsyncpa [#allocation5], 1 }
 0xc1c   :  { %3296 = vsyncpa [#allocation6], 1 }

</bundles_post_ra>
